<compile_context>
chip_gen: v5e
topology: v5e:2x2
jax: 0.10.0
libtpu: 0.0.40
codegen_flags: <defaults>
</compile_context>

<pallas_src>
import functools
import math

import jax
import jax.numpy as jnp
from jax import lax
from jax.experimental import pallas as pl
from jax.experimental.pallas import tpu as pltpu


LN_EPS = 1e-12  # BertConfig default layer_norm_eps


def _entity_aware_attention_kernel(hid_ref, mask_ref,
                                   qw_w_ref, qw_e_ref, qb_w_ref, qb_e_ref,
                                   kvw_ref, kvb_ref, wo_ref, obgb_ref,
                                   out_ref,
                                   qcat_ref, ctx_ref,
                                   *, num_heads, head_dim, n_word):
    # hid_ref  : (1, T, H) f32  concatenated [word rows ; entity rows]
    # mask_ref : (1, 1, Tp) f32 additive mask, padded to lane multiple
    # qw_w_ref : (H, 2H) bf16   [w_q | w_w2e]      (word-row queries)
    # qw_e_ref : (H, 2H) bf16   [w_e2w | w_e2e]    (entity-row queries)
    # qb_*_ref : (1, 2H) f32    matching biases
    # kvw_ref  : (H, 2H) bf16   [w_k | w_v]
    # kvb_ref  : (1, 2H) f32
    # wo_ref   : (H, H)  bf16   output dense weight (in, out)
    # obgb_ref : (3, H)  f32    [b_o ; ln_gamma ; ln_beta]
    # out_ref  : (1, T, H) f32
    # qcat_ref : (T, 2H) f32 scratch  [queries-vs-word-keys | queries-vs-entity-keys]
    # ctx_ref  : (T, H)  f32 scratch  per-head contexts gathered head-major
    f32 = jnp.float32
    bf16 = jnp.bfloat16

    hidden = hid_ref[0]                       # (T, H) f32 (kept f32 for residual/LN)
    hid_bf = hidden.astype(bf16)
    T = hidden.shape[0]
    H = wo_ref.shape[0]
    W = n_word

    # --- Entity-aware query projections: one wide matmul per row group. ---
    qcat_ref[:W, :] = (jnp.dot(hid_bf[:W], qw_w_ref[...],
                               preferred_element_type=f32) + qb_w_ref[...])
    qcat_ref[W:, :] = (jnp.dot(hid_bf[W:], qw_e_ref[...],
                               preferred_element_type=f32) + qb_e_ref[...])

    # --- Shared key / value projection over the full (T, H) row stream. ---
    kv = (jnp.dot(hid_bf, kvw_ref[...], preferred_element_type=f32)
          + kvb_ref[...])                     # (T, 2H) f32
    k_all = kv[:, :H].astype(bf16)            # lane-aligned split at 128*k
    v_all = kv[:, H:].astype(bf16)

    mask_row = mask_ref[0]                    # (1, Tp)
    mask_w = mask_row[:, :W]                  # (1, W) additive mask, word keys
    mask_e = mask_row[:, W:T]                 # (1, M) additive mask, entity keys

    scale = 1.0 / math.sqrt(head_dim)

    def dot_nt(a, b):  # (R, d) x (C, d) -> (R, C), contraction over d, f32 acc
        return lax.dot_general(a, b, (((1,), (1,)), ((), ())),
                               preferred_element_type=f32)

    # Static loop over heads (num_heads is small in the demo).
    for h in range(num_heads):
        lo = h * head_dim
        hi = lo + head_dim
        q_wk = qcat_ref[:, lo:hi].astype(bf16)           # (T, d) rows vs word keys
        q_ek = qcat_ref[:, H + lo:H + hi].astype(bf16)   # (T, d) rows vs entity keys

        # Block-wise softmax over the concatenated [word keys | entity keys]
        # axis, fused for word and entity rows at once (all T rows).
        s_w = dot_nt(q_wk, k_all[:W, lo:hi]) * scale + mask_w   # (T, W) f32
        s_e = dot_nt(q_ek, k_all[W:, lo:hi]) * scale + mask_e   # (T, M) f32
        m = jnp.maximum(jnp.max(s_w, axis=-1, keepdims=True),
                        jnp.max(s_e, axis=-1, keepdims=True))
        ea = jnp.exp(s_w - m)
        eb = jnp.exp(s_e - m)
        denom = (jnp.sum(ea, axis=-1, keepdims=True)
                 + jnp.sum(eb, axis=-1, keepdims=True))
        ctx_h = (jnp.dot(ea.astype(bf16), v_all[:W, lo:hi],
                         preferred_element_type=f32)
                 + jnp.dot(eb.astype(bf16), v_all[W:, lo:hi],
                           preferred_element_type=f32))          # (T, d)
        ctx_ref[:, lo:hi] = ctx_h * pl.reciprocal(denom, approx=True)

    # --- Single full-contraction output dense + BertSelfOutput (res + LN). ---
    acc = jnp.dot(ctx_ref[...].astype(bf16), wo_ref[...],
                  preferred_element_type=f32)                    # (T, H)
    b_o = obgb_ref[0:1, :]
    gamma = obgb_ref[1:2, :]
    beta = obgb_ref[2:3, :]
    pre = acc + b_o + hidden
    mean = jnp.mean(pre, axis=-1, keepdims=True)
    var = jnp.mean(jnp.square(pre - mean), axis=-1, keepdims=True)
    out_ref[0] = (pre - mean) * lax.rsqrt(var + LN_EPS) * gamma + beta


def prepare_params(params, *, weight_dtype=jnp.bfloat16):
    """One-time parameter preparation (stack / concat / cast).

    Done once outside the forward so no per-call HBM copies are created.
    Weights are stored transposed w.r.t. nn.Linear.weight, i.e. (in, out).
    """
    H = params["w_q"].shape[0]
    f32 = jnp.float32
    return {
        "qw_word": jnp.concatenate([params["w_q"], params["w_w2e"]],
                                   axis=1).astype(weight_dtype),       # (H, 2H)
        "qw_ent": jnp.concatenate([params["w_e2w"], params["w_e2e"]],
                                  axis=1).astype(weight_dtype),        # (H, 2H)
        "qb_word": jnp.concatenate([params["b_q"], params["b_w2e"]]
                                   ).reshape(1, 2 * H).astype(f32),
        "qb_ent": jnp.concatenate([params["b_e2w"], params["b_e2e"]]
                                  ).reshape(1, 2 * H).astype(f32),
        "kvw": jnp.concatenate([params["w_k"], params["w_v"]],
                               axis=1).astype(weight_dtype),           # (H, 2H)
        "kvb": jnp.concatenate([params["b_k"], params["b_v"]]
                               ).reshape(1, 2 * H).astype(f32),
        "wo": params["w_o"].astype(weight_dtype),                      # (H, H)
        "obgb": jnp.stack([params["b_o"], params["ln_gamma"],
                           params["ln_beta"]]).astype(f32),            # (3, H)
    }


def entity_aware_attention_forward(prepped, word_hidden_states,
                                   entity_hidden_states, attention_mask,
                                   *, num_heads, single_buffer_weights=True):
    """Pallas implementation of EntityAwareAttention.forward (eval mode).

    word_hidden_states:   (B, W, H) float32
    entity_hidden_states: (B, M, H) float32
    attention_mask:       (B, T) or (B, 1, 1, T) additive mask, T = W + M
    returns: (word_output (B, W, H), entity_output (B, M, H))
    """
    B, W, H = word_hidden_states.shape
    M = entity_hidden_states.shape[1]
    T = W + M
    assert H % num_heads == 0
    head_dim = H // num_heads
    # Word / entity row groups become sublane slices of one (T, H) stream.
    assert W % 8 == 0 and M % 8 == 0, "row groups must be sublane (8) aligned"

    hidden = jnp.concatenate([word_hidden_states, entity_hidden_states],
                             axis=1).astype(jnp.float32)               # (B, T, H)

    # Lane-dense mask block: pad the key axis up to a multiple of 128.
    Tp = ((T + 127) // 128) * 128
    mask = attention_mask.reshape(B, 1, T).astype(jnp.float32)
    if Tp != T:
        mask = jnp.pad(mask, ((0, 0), (0, 0), (0, Tp - T)),
                       constant_values=-1e9)

    kernel = functools.partial(_entity_aware_attention_kernel,
                               num_heads=num_heads, head_dim=head_dim,
                               n_word=W)

    # Advisory cost estimate (lets XLA schedule around the custom call).
    flops = B * (2 * T * H * (2 * H)      # entity-aware query projections
                 + 2 * T * H * (2 * H)    # fused key/value projection
                 + 2 * T * H * H          # output dense
                 + 4 * T * T * H)         # scores + context over all heads
    transcendentals = B * num_heads * T * T
    weight_bytes = sum(int(v.size) * v.dtype.itemsize for v in prepped.values())
    bytes_accessed = weight_bytes + B * (2 * T * H * 4 + Tp * 4)
    cost = pl.CostEstimate(flops=flops, transcendentals=transcendentals,
                           bytes_accessed=bytes_accessed)

    # VMEM budget: blocks + weights (x2 buffering worst case) + scratch, with
    # headroom; clamped to [32 MiB, 100 MiB] so small/realistic sizes both fit.
    scratch_bytes = T * 2 * H * 4 + T * H * 4
    needed = 2 * (2 * T * H * 4 + Tp * 4) + 2 * weight_bytes + scratch_bytes
    vmem_limit = int(min(100 * 2**20, max(32 * 2**20, 4 * needed)))

    def run(weight_mode):
        def const_spec(shape):
            idx = lambda b: (0,) * len(shape)
            if weight_mode is None:
                return pl.BlockSpec(shape, idx)
            return pl.BlockSpec(shape, idx, pipeline_mode=weight_mode)

        grid_spec = pltpu.PrefetchScalarGridSpec(
            num_scalar_prefetch=0,
            grid=(B,),
            in_specs=[
                pl.BlockSpec((1, T, H), lambda b: (b, 0, 0)),    # hidden
                pl.BlockSpec((1, 1, Tp), lambda b: (b, 0, 0)),   # mask
                const_spec((H, 2 * H)),                          # qw_word
                const_spec((H, 2 * H)),                          # qw_ent
                const_spec((1, 2 * H)),                          # qb_word
                const_spec((1, 2 * H)),                          # qb_ent
                const_spec((H, 2 * H)),                          # kvw
                const_spec((1, 2 * H)),                          # kvb
                const_spec((H, H)),                              # wo
                const_spec((3, H)),                              # b_o/gamma/beta
            ],
            out_specs=pl.BlockSpec((1, T, H), lambda b: (b, 0, 0)),
            scratch_shapes=[
                pltpu.VMEM((T, 2 * H), jnp.float32),             # qcat
                pltpu.VMEM((T, H), jnp.float32),                 # ctx
            ],
        )
        out = pl.pallas_call(
            kernel,
            out_shape=jax.ShapeDtypeStruct((B, T, H), jnp.float32),
            grid_spec=grid_spec,
            compiler_params=pltpu.CompilerParams(
                dimension_semantics=("parallel",),
                vmem_limit_bytes=vmem_limit),
            cost_estimate=cost,
        )(hidden, mask,
          prepped["qw_word"], prepped["qw_ent"],
          prepped["qb_word"], prepped["qb_ent"],
          prepped["kvw"], prepped["kvb"],
          prepped["wo"], prepped["obgb"])
        return jax.block_until_ready(out)

    if single_buffer_weights:
        try:
            # Grid-invariant weights: single-buffer (halves weight VMEM; key
            # on v7x's 64 MiB).  Fall back if this JAX build rejects it.
            out = run(pl.Buffered(1))
        except Exception:
            out = run(None)
    else:
        out = run(None)

    return out[:, :W], out[:, W:]


def _reference_forward(params, word_h, ent_h, attention_mask, *, num_heads):
    """Pure-JAX f32 reference mirroring the PyTorch module (eval mode)."""
    prec = jax.lax.Precision.HIGHEST
    B, W, H = word_h.shape
    M = ent_h.shape[1]
    d = H // num_heads
    mask = attention_mask.reshape(B, W + M).astype(jnp.float32)

    def linear(x, w, b):
        return jnp.einsum("bsh,hk->bsk", x, w, precision=prec) + b

    def split_heads(x):  # (B, S, H) -> (B, nh, S, d)
        b_, s_, _ = x.shape
        return x.reshape(b_, s_, num_heads, d).transpose(0, 2, 1, 3)

    w2w_q = split_heads(linear(word_h, params["w_q"], params["b_q"]))
    w2e_q = split_heads(linear(word_h, params["w_w2e"], params["b_w2e"]))
    e2w_q = split_heads(linear(ent_h, params["w_e2w"], params["b_e2w"]))
    e2e_q = split_heads(linear(ent_h, params["w_e2e"], params["b_e2e"]))

    h_all = jnp.concatenate([word_h, ent_h], axis=1)
    k = split_heads(linear(h_all, params["w_k"], params["b_k"]))
    v = split_heads(linear(h_all, params["w_v"], params["b_v"]))
    k_w, k_e = k[:, :, :W], k[:, :, W:]

    def sc(q, kk):
        return jnp.einsum("bhqd,bhkd->bhqk", q, kk, precision=prec)

    word_scores = jnp.concatenate([sc(w2w_q, k_w), sc(w2e_q, k_e)], axis=3)
    ent_scores = jnp.concatenate([sc(e2w_q, k_w), sc(e2e_q, k_e)], axis=3)
    scores = jnp.concatenate([word_scores, ent_scores], axis=2)
    scores = scores / math.sqrt(d) + mask[:, None, None, :]
    probs = jax.nn.softmax(scores, axis=-1)
    ctx = jnp.einsum("bhqk,bhkd->bhqd", probs, v, precision=prec)
    ctx = ctx.transpose(0, 2, 1, 3).reshape(B, W + M, H)

    out = jnp.einsum("bsh,hk->bsk", ctx, params["w_o"], precision=prec)
    out = out + params["b_o"] + h_all
    mean = jnp.mean(out, axis=-1, keepdims=True)
    var = jnp.mean(jnp.square(out - mean), axis=-1, keepdims=True)
    out = (out - mean) / jnp.sqrt(var + LN_EPS) * params["ln_gamma"] + params["ln_beta"]
    return out[:, :W], out[:, W:]


def init_params(key, *, hidden_size):
    ks = jax.random.split(key, 16)

    def w(k):
        return 0.02 * jax.random.normal(k, (hidden_size, hidden_size), jnp.float32)

    def b(k):
        return 0.02 * jax.random.normal(k, (hidden_size,), jnp.float32)

    return {
        "w_q": w(ks[0]), "b_q": b(ks[1]),
        "w_w2e": w(ks[2]), "b_w2e": b(ks[3]),
        "w_e2w": w(ks[4]), "b_e2w": b(ks[5]),
        "w_e2e": w(ks[6]), "b_e2e": b(ks[7]),
        "w_k": w(ks[8]), "b_k": b(ks[9]),
        "w_v": w(ks[10]), "b_v": b(ks[11]),
        "w_o": w(ks[12]), "b_o": b(ks[13]),
        "ln_gamma": jnp.ones((hidden_size,), jnp.float32)
                    + 0.05 * jax.random.normal(ks[14], (hidden_size,), jnp.float32),
        "ln_beta": 0.05 * jax.random.normal(ks[15], (hidden_size,), jnp.float32),
    }


if __name__ == "__main__":
    key = jax.random.PRNGKey(0)

    # Small config; H=128 keeps the hidden/lane dimension dense on TPU.
    B, W_LEN, M_LEN = 2, 16, 8
    H, NUM_HEADS = 128, 4
    T = W_LEN + M_LEN

    kp, kw, ke, km = jax.random.split(key, 4)
    params = init_params(kp, hidden_size=H)
    prepped = prepare_params(params)          # one-time stacking / bf16 cast

    word_h = jax.random.normal(kw, (B, W_LEN, H), jnp.float32)
    ent_h = jax.random.normal(ke, (B, M_LEN, H), jnp.float32)

    # Binary key mask -> additive mask (0 keep / -10000 drop), BERT-style.
    keep = (jax.random.uniform(km, (B, T)) > 0.2).astype(jnp.float32)
    attn_mask = (1.0 - keep) * -10000.0

    out_w, out_e = entity_aware_attention_forward(
        prepped, word_h, ent_h, attn_mask, num_heads=NUM_HEADS)
    out_w = jax.block_until_ready(out_w)
    out_e = jax.block_until_ready(out_e)

    ref_w, ref_e = _reference_forward(
        params, word_h, ent_h, attn_mask, num_heads=NUM_HEADS)

    assert out_w.shape == (B, W_LEN, H)
    assert out_e.shape == (B, M_LEN, H)
    # bf16 MXU inputs + approx reciprocal vs. f32 HIGHEST reference -> ~1e-3
    # level agreement on LayerNorm-scale outputs; 1e-2 tolerance is ample.
    assert jnp.allclose(out_w, ref_w, atol=1e-2, rtol=1e-2)
    assert jnp.allclose(out_e, ref_e, atol=1e-2, rtol=1e-2)

    print("KERNEL_OK")
</pallas_src>

<mosaic_0001>
module attributes {stable_mosaic.version = 11 : i64} {
  func.func @_entity_aware_attention_kernel(%arg0: i32, %arg1: memref<1x24x128xf32, #tpu.memory_space<vmem>>, %arg2: memref<1x1x128xf32, #tpu.memory_space<vmem>>, %arg3: memref<128x256xbf16, #tpu.memory_space<vmem>>, %arg4: memref<128x256xbf16, #tpu.memory_space<vmem>>, %arg5: memref<1x256xf32, #tpu.memory_space<vmem>>, %arg6: memref<1x256xf32, #tpu.memory_space<vmem>>, %arg7: memref<128x256xbf16, #tpu.memory_space<vmem>>, %arg8: memref<1x256xf32, #tpu.memory_space<vmem>>, %arg9: memref<128x128xbf16, #tpu.memory_space<vmem>>, %arg10: memref<3x128xf32, #tpu.memory_space<vmem>>, %arg11: memref<1x24x128xf32, #tpu.memory_space<vmem>>, %arg12: memref<24x256xf32, #tpu.memory_space<vmem>>, %arg13: memref<24x128xf32, #tpu.memory_space<vmem>>) attributes {dimension_semantics = [#tpu.dimension_semantics<parallel>], iteration_bounds = array<i64: 2>, scalar_prefetch = 0 : i64, scratch_operands = 2 : i64, tpu.core_type = #tpu.core_type<tc>, window_params = [{transform_indices = @transform_0, window_bounds = array<i64: 1, 24, 128>}, {transform_indices = @transform_1, window_bounds = array<i64: 1, 1, 128>}, {pipeline_mode = #tpu.pipeline_mode<synchronous>, transform_indices = @transform_2, window_bounds = array<i64: 128, 256>}, {pipeline_mode = #tpu.pipeline_mode<synchronous>, transform_indices = @transform_3, window_bounds = array<i64: 128, 256>}, {pipeline_mode = #tpu.pipeline_mode<synchronous>, transform_indices = @transform_4, window_bounds = array<i64: 1, 256>}, {pipeline_mode = #tpu.pipeline_mode<synchronous>, transform_indices = @transform_5, window_bounds = array<i64: 1, 256>}, {pipeline_mode = #tpu.pipeline_mode<synchronous>, transform_indices = @transform_6, window_bounds = array<i64: 128, 256>}, {pipeline_mode = #tpu.pipeline_mode<synchronous>, transform_indices = @transform_7, window_bounds = array<i64: 1, 256>}, {pipeline_mode = #tpu.pipeline_mode<synchronous>, transform_indices = @transform_8, window_bounds = array<i64: 128, 128>}, {pipeline_mode = #tpu.pipeline_mode<synchronous>, transform_indices = @transform_9, window_bounds = array<i64: 3, 128>}, {transform_indices = @transform_10, window_bounds = array<i64: 1, 24, 128>}]} {
    %c0 = arith.constant 0 : index
    %c0_0 = arith.constant 0 : index
    %c0_1 = arith.constant 0 : index
    %0 = vector.load %arg1[%c0, %c0_0, %c0_1] : memref<1x24x128xf32, #tpu.memory_space<vmem>>, vector<1x24x128xf32>
    %1 = vector.shape_cast %0 : vector<1x24x128xf32> to vector<24x128xf32>
    %2 = arith.truncf %1 : vector<24x128xf32> to vector<24x128xbf16>
    %3 = vector.extract_strided_slice %2 {offsets = [0, 0], sizes = [16, 128], strides = [1, 1]} : vector<24x128xbf16> to vector<16x128xbf16>
    %c0_2 = arith.constant 0 : index
    %c0_3 = arith.constant 0 : index
    %4 = vector.load %arg3[%c0_2, %c0_3] : memref<128x256xbf16, #tpu.memory_space<vmem>>, vector<128x256xbf16>
    %cst = arith.constant dense<0.000000e+00> : vector<16x256xf32>
    %5 = tpu.matmul %3, %4, %cst {dimension_numbers = #tpu.dot_dimension_numbers<[1], [0], [0], [1], [0, 0, 1, 1], [], []>} : vector<16x128xbf16>, vector<128x256xbf16>, vector<16x256xf32> -> vector<16x256xf32>
    %c0_4 = arith.constant 0 : index
    %c0_5 = arith.constant 0 : index
    %6 = vector.load %arg5[%c0_4, %c0_5] : memref<1x256xf32, #tpu.memory_space<vmem>>, vector<1x256xf32>
    %7 = vector.broadcast %6 : vector<1x256xf32> to vector<16x256xf32>
    %8 = arith.addf %5, %7 : vector<16x256xf32>
    %c0_6 = arith.constant 0 : index
    %c0_7 = arith.constant 0 : index
    %9 = vector.load %arg12[%c0_6, %c0_7] : memref<24x256xf32, #tpu.memory_space<vmem>>, vector<16x256xf32>
    tpu.vector_store %arg12[%c0_6, %c0_7], %8 {strides = array<i32>} : memref<24x256xf32, #tpu.memory_space<vmem>>, vector<16x256xf32>,
    %10 = vector.extract_strided_slice %2 {offsets = [16, 0], sizes = [8, 128], strides = [1, 1]} : vector<24x128xbf16> to vector<8x128xbf16>
    %c0_8 = arith.constant 0 : index
    %c0_9 = arith.constant 0 : index
    %11 = vector.load %arg4[%c0_8, %c0_9] : memref<128x256xbf16, #tpu.memory_space<vmem>>, vector<128x256xbf16>
    %cst_10 = arith.constant dense<0.000000e+00> : vector<8x256xf32>
    %12 = tpu.matmul %10, %11, %cst_10 {dimension_numbers = #tpu.dot_dimension_numbers<[1], [0], [0], [1], [0, 0, 1, 1], [], []>} : vector<8x128xbf16>, vector<128x256xbf16>, vector<8x256xf32> -> vector<8x256xf32>
    %c0_11 = arith.constant 0 : index
    %c0_12 = arith.constant 0 : index
    %13 = vector.load %arg6[%c0_11, %c0_12] : memref<1x256xf32, #tpu.memory_space<vmem>>, vector<1x256xf32>
    %14 = vector.broadcast %13 : vector<1x256xf32> to vector<8x256xf32>
    %15 = arith.addf %12, %14 : vector<8x256xf32>
    %c16 = arith.constant 16 : index
    %c0_13 = arith.constant 0 : index
    %16 = vector.load %arg12[%c16, %c0_13] : memref<24x256xf32, #tpu.memory_space<vmem>>, vector<8x256xf32>
    tpu.vector_store %arg12[%c16, %c0_13], %15 {strides = array<i32>} : memref<24x256xf32, #tpu.memory_space<vmem>>, vector<8x256xf32>,
    %c0_14 = arith.constant 0 : index
    %c0_15 = arith.constant 0 : index
    %17 = vector.load %arg7[%c0_14, %c0_15] : memref<128x256xbf16, #tpu.memory_space<vmem>>, vector<128x256xbf16>
    %cst_16 = arith.constant dense<0.000000e+00> : vector<24x256xf32>
    %18 = tpu.matmul %2, %17, %cst_16 {dimension_numbers = #tpu.dot_dimension_numbers<[1], [0], [0], [1], [0, 0, 1, 1], [], []>} : vector<24x128xbf16>, vector<128x256xbf16>, vector<24x256xf32> -> vector<24x256xf32>
    %c0_17 = arith.constant 0 : index
    %c0_18 = arith.constant 0 : index
    %19 = vector.load %arg8[%c0_17, %c0_18] : memref<1x256xf32, #tpu.memory_space<vmem>>, vector<1x256xf32>
    %20 = vector.broadcast %19 : vector<1x256xf32> to vector<24x256xf32>
    %21 = arith.addf %18, %20 : vector<24x256xf32>
    %22 = vector.extract_strided_slice %21 {offsets = [0, 0], sizes = [24, 128], strides = [1, 1]} : vector<24x256xf32> to vector<24x128xf32>
    %23 = arith.truncf %22 : vector<24x128xf32> to vector<24x128xbf16>
    %24 = vector.extract_strided_slice %21 {offsets = [0, 128], sizes = [24, 128], strides = [1, 1]} : vector<24x256xf32> to vector<24x128xf32>
    %25 = arith.truncf %24 : vector<24x128xf32> to vector<24x128xbf16>
    %c0_19 = arith.constant 0 : index
    %c0_20 = arith.constant 0 : index
    %c0_21 = arith.constant 0 : index
    %26 = vector.load %arg2[%c0_19, %c0_20, %c0_21] : memref<1x1x128xf32, #tpu.memory_space<vmem>>, vector<1x1x128xf32>
    %27 = vector.shape_cast %26 : vector<1x1x128xf32> to vector<1x128xf32>
    %28 = vector.extract_strided_slice %27 {offsets = [0, 0], sizes = [1, 16], strides = [1, 1]} : vector<1x128xf32> to vector<1x16xf32>
    %29 = vector.extract_strided_slice %27 {offsets = [0, 16], sizes = [1, 8], strides = [1, 1]} : vector<1x128xf32> to vector<1x8xf32>
    %c0_22 = arith.constant 0 : index
    %c0_23 = arith.constant 0 : index
    %30 = vector.load %arg12[%c0_22, %c0_23] : memref<24x256xf32, #tpu.memory_space<vmem>>, vector<24x32xf32>
    %31 = arith.truncf %30 : vector<24x32xf32> to vector<24x32xbf16>
    %c0_24 = arith.constant 0 : index
    %c128 = arith.constant 128 : index
    %32 = vector.load %arg12[%c0_24, %c128] : memref<24x256xf32, #tpu.memory_space<vmem>>, vector<24x32xf32>
    %33 = arith.truncf %32 : vector<24x32xf32> to vector<24x32xbf16>
    %34 = vector.extract_strided_slice %23 {offsets = [0, 0], sizes = [16, 32], strides = [1, 1]} : vector<24x128xbf16> to vector<16x32xbf16>
    %cst_25 = arith.constant dense<0.000000e+00> : vector<24x16xf32>
    %35 = tpu.matmul %31, %34, %cst_25 {dimension_numbers = #tpu.dot_dimension_numbers<[1], [1], [0], [0], [0, 0, 1, 0], [], []>} : vector<24x32xbf16>, vector<16x32xbf16>, vector<24x16xf32> -> vector<24x16xf32>
    %cst_26 = arith.constant 0.176776692 : f32
    %36 = vector.broadcast %cst_26 : f32 to vector<24x16xf32>
    %37 = arith.mulf %35, %36 : vector<24x16xf32>
    %38 = vector.broadcast %28 : vector<1x16xf32> to vector<24x16xf32>
    %39 = arith.addf %37, %38 : vector<24x16xf32>
    %40 = vector.extract_strided_slice %23 {offsets = [16, 0], sizes = [8, 32], strides = [1, 1]} : vector<24x128xbf16> to vector<8x32xbf16>
    %cst_27 = arith.constant dense<0.000000e+00> : vector<24x8xf32>
    %41 = tpu.matmul %33, %40, %cst_27 {dimension_numbers = #tpu.dot_dimension_numbers<[1], [1], [0], [0], [0, 0, 1, 0], [], []>} : vector<24x32xbf16>, vector<8x32xbf16>, vector<24x8xf32> -> vector<24x8xf32>
    %cst_28 = arith.constant 0.176776692 : f32
    %42 = vector.broadcast %cst_28 : f32 to vector<24x8xf32>
    %43 = arith.mulf %41, %42 : vector<24x8xf32>
    %44 = vector.broadcast %29 : vector<1x8xf32> to vector<24x8xf32>
    %45 = arith.addf %43, %44 : vector<24x8xf32>
    %cst_29 = arith.constant dense<0xFF800000> : vector<24xf32>
    %46 = vector.multi_reduction <maximumf>, %39, %cst_29 [1] : vector<24x16xf32> to vector<24xf32>
    %47 = vector.shape_cast %46 : vector<24xf32> to vector<24x1xf32>
    %cst_30 = arith.constant dense<0xFF800000> : vector<24xf32>
    %48 = vector.multi_reduction <maximumf>, %45, %cst_30 [1] : vector<24x8xf32> to vector<24xf32>
    %49 = vector.shape_cast %48 : vector<24xf32> to vector<24x1xf32>
    %50 = arith.maximumf %47, %49 : vector<24x1xf32>
    %51 = vector.broadcast %50 : vector<24x1xf32> to vector<24x16xf32>
    %52 = arith.subf %39, %51 : vector<24x16xf32>
    %53 = math.exp %52 : vector<24x16xf32>
    %54 = vector.broadcast %50 : vector<24x1xf32> to vector<24x8xf32>
    %55 = arith.subf %45, %54 : vector<24x8xf32>
    %56 = math.exp %55 : vector<24x8xf32>
    %cst_31 = arith.constant dense<0.000000e+00> : vector<24xf32>
    %57 = vector.multi_reduction <add>, %53, %cst_31 [1] : vector<24x16xf32> to vector<24xf32>
    %58 = vector.shape_cast %57 : vector<24xf32> to vector<24x1xf32>
    %cst_32 = arith.constant dense<0.000000e+00> : vector<24xf32>
    %59 = vector.multi_reduction <add>, %56, %cst_32 [1] : vector<24x8xf32> to vector<24xf32>
    %60 = vector.shape_cast %59 : vector<24xf32> to vector<24x1xf32>
    %61 = arith.addf %58, %60 : vector<24x1xf32>
    %62 = arith.truncf %53 : vector<24x16xf32> to vector<24x16xbf16>
    %63 = vector.extract_strided_slice %25 {offsets = [0, 0], sizes = [16, 32], strides = [1, 1]} : vector<24x128xbf16> to vector<16x32xbf16>
    %cst_33 = arith.constant dense<0.000000e+00> : vector<24x32xf32>
    %64 = tpu.matmul %62, %63, %cst_33 {dimension_numbers = #tpu.dot_dimension_numbers<[1], [0], [0], [1], [0, 0, 1, 1], [], []>} : vector<24x16xbf16>, vector<16x32xbf16>, vector<24x32xf32> -> vector<24x32xf32>
    %65 = arith.truncf %56 : vector<24x8xf32> to vector<24x8xbf16>
    %66 = vector.extract_strided_slice %25 {offsets = [16, 0], sizes = [8, 32], strides = [1, 1]} : vector<24x128xbf16> to vector<8x32xbf16>
    %cst_34 = arith.constant dense<0.000000e+00> : vector<24x32xf32>
    %67 = tpu.matmul %65, %66, %cst_34 {dimension_numbers = #tpu.dot_dimension_numbers<[1], [0], [0], [1], [0, 0, 1, 1], [], []>} : vector<24x8xbf16>, vector<8x32xbf16>, vector<24x32xf32> -> vector<24x32xf32>
    %68 = arith.addf %64, %67 : vector<24x32xf32>
    %69 = tpu.reciprocal %61 {approx = true} : vector<24x1xf32> -> vector<24x1xf32>
    %70 = vector.broadcast %69 : vector<24x1xf32> to vector<24x32xf32>
    %71 = arith.mulf %68, %70 : vector<24x32xf32>
    %c0_35 = arith.constant 0 : index
    %c0_36 = arith.constant 0 : index
    %72 = vector.load %arg13[%c0_35, %c0_36] : memref<24x128xf32, #tpu.memory_space<vmem>>, vector<24x32xf32>
    tpu.vector_store %arg13[%c0_35, %c0_36], %71 {strides = array<i32>} : memref<24x128xf32, #tpu.memory_space<vmem>>, vector<24x32xf32>,
    %c0_37 = arith.constant 0 : index
    %c32 = arith.constant 32 : index
    %73 = vector.load %arg12[%c0_37, %c32] : memref<24x256xf32, #tpu.memory_space<vmem>>, vector<24x32xf32>
    %74 = arith.truncf %73 : vector<24x32xf32> to vector<24x32xbf16>
    %c0_38 = arith.constant 0 : index
    %c160 = arith.constant 160 : index
    %75 = vector.load %arg12[%c0_38, %c160] : memref<24x256xf32, #tpu.memory_space<vmem>>, vector<24x32xf32>
    %76 = arith.truncf %75 : vector<24x32xf32> to vector<24x32xbf16>
    %77 = vector.extract_strided_slice %23 {offsets = [0, 32], sizes = [16, 32], strides = [1, 1]} : vector<24x128xbf16> to vector<16x32xbf16>
    %cst_39 = arith.constant dense<0.000000e+00> : vector<24x16xf32>
    %78 = tpu.matmul %74, %77, %cst_39 {dimension_numbers = #tpu.dot_dimension_numbers<[1], [1], [0], [0], [0, 0, 1, 0], [], []>} : vector<24x32xbf16>, vector<16x32xbf16>, vector<24x16xf32> -> vector<24x16xf32>
    %cst_40 = arith.constant 0.176776692 : f32
    %79 = vector.broadcast %cst_40 : f32 to vector<24x16xf32>
    %80 = arith.mulf %78, %79 : vector<24x16xf32>
    %81 = vector.broadcast %28 : vector<1x16xf32> to vector<24x16xf32>
    %82 = arith.addf %80, %81 : vector<24x16xf32>
    %83 = vector.extract_strided_slice %23 {offsets = [16, 32], sizes = [8, 32], strides = [1, 1]} : vector<24x128xbf16> to vector<8x32xbf16>
    %cst_41 = arith.constant dense<0.000000e+00> : vector<24x8xf32>
    %84 = tpu.matmul %76, %83, %cst_41 {dimension_numbers = #tpu.dot_dimension_numbers<[1], [1], [0], [0], [0, 0, 1, 0], [], []>} : vector<24x32xbf16>, vector<8x32xbf16>, vector<24x8xf32> -> vector<24x8xf32>
    %cst_42 = arith.constant 0.176776692 : f32
    %85 = vector.broadcast %cst_42 : f32 to vector<24x8xf32>
    %86 = arith.mulf %84, %85 : vector<24x8xf32>
    %87 = vector.broadcast %29 : vector<1x8xf32> to vector<24x8xf32>
    %88 = arith.addf %86, %87 : vector<24x8xf32>
    %cst_43 = arith.constant dense<0xFF800000> : vector<24xf32>
    %89 = vector.multi_reduction <maximumf>, %82, %cst_43 [1] : vector<24x16xf32> to vector<24xf32>
    %90 = vector.shape_cast %89 : vector<24xf32> to vector<24x1xf32>
    %cst_44 = arith.constant dense<0xFF800000> : vector<24xf32>
    %91 = vector.multi_reduction <maximumf>, %88, %cst_44 [1] : vector<24x8xf32> to vector<24xf32>
    %92 = vector.shape_cast %91 : vector<24xf32> to vector<24x1xf32>
    %93 = arith.maximumf %90, %92 : vector<24x1xf32>
    %94 = vector.broadcast %93 : vector<24x1xf32> to vector<24x16xf32>
    %95 = arith.subf %82, %94 : vector<24x16xf32>
    %96 = math.exp %95 : vector<24x16xf32>
    %97 = vector.broadcast %93 : vector<24x1xf32> to vector<24x8xf32>
    %98 = arith.subf %88, %97 : vector<24x8xf32>
    %99 = math.exp %98 : vector<24x8xf32>
    %cst_45 = arith.constant dense<0.000000e+00> : vector<24xf32>
    %100 = vector.multi_reduction <add>, %96, %cst_45 [1] : vector<24x16xf32> to vector<24xf32>
    %101 = vector.shape_cast %100 : vector<24xf32> to vector<24x1xf32>
    %cst_46 = arith.constant dense<0.000000e+00> : vector<24xf32>
    %102 = vector.multi_reduction <add>, %99, %cst_46 [1] : vector<24x8xf32> to vector<24xf32>
    %103 = vector.shape_cast %102 : vector<24xf32> to vector<24x1xf32>
    %104 = arith.addf %101, %103 : vector<24x1xf32>
    %105 = arith.truncf %96 : vector<24x16xf32> to vector<24x16xbf16>
    %106 = vector.extract_strided_slice %25 {offsets = [0, 32], sizes = [16, 32], strides = [1, 1]} : vector<24x128xbf16> to vector<16x32xbf16>
    %cst_47 = arith.constant dense<0.000000e+00> : vector<24x32xf32>
    %107 = tpu.matmul %105, %106, %cst_47 {dimension_numbers = #tpu.dot_dimension_numbers<[1], [0], [0], [1], [0, 0, 1, 1], [], []>} : vector<24x16xbf16>, vector<16x32xbf16>, vector<24x32xf32> -> vector<24x32xf32>
    %108 = arith.truncf %99 : vector<24x8xf32> to vector<24x8xbf16>
    %109 = vector.extract_strided_slice %25 {offsets = [16, 32], sizes = [8, 32], strides = [1, 1]} : vector<24x128xbf16> to vector<8x32xbf16>
    %cst_48 = arith.constant dense<0.000000e+00> : vector<24x32xf32>
    %110 = tpu.matmul %108, %109, %cst_48 {dimension_numbers = #tpu.dot_dimension_numbers<[1], [0], [0], [1], [0, 0, 1, 1], [], []>} : vector<24x8xbf16>, vector<8x32xbf16>, vector<24x32xf32> -> vector<24x32xf32>
    %111 = arith.addf %107, %110 : vector<24x32xf32>
    %112 = tpu.reciprocal %104 {approx = true} : vector<24x1xf32> -> vector<24x1xf32>
    %113 = vector.broadcast %112 : vector<24x1xf32> to vector<24x32xf32>
    %114 = arith.mulf %111, %113 : vector<24x32xf32>
    %c0_49 = arith.constant 0 : index
    %c32_50 = arith.constant 32 : index
    %115 = vector.load %arg13[%c0_49, %c32_50] : memref<24x128xf32, #tpu.memory_space<vmem>>, vector<24x32xf32>
    tpu.vector_store %arg13[%c0_49, %c32_50], %114 {strides = array<i32>} : memref<24x128xf32, #tpu.memory_space<vmem>>, vector<24x32xf32>,
    %c0_51 = arith.constant 0 : index
    %c64 = arith.constant 64 : index
    %116 = vector.load %arg12[%c0_51, %c64] : memref<24x256xf32, #tpu.memory_space<vmem>>, vector<24x32xf32>
    %117 = arith.truncf %116 : vector<24x32xf32> to vector<24x32xbf16>
    %c0_52 = arith.constant 0 : index
    %c192 = arith.constant 192 : index
    %118 = vector.load %arg12[%c0_52, %c192] : memref<24x256xf32, #tpu.memory_space<vmem>>, vector<24x32xf32>
    %119 = arith.truncf %118 : vector<24x32xf32> to vector<24x32xbf16>
    %120 = vector.extract_strided_slice %23 {offsets = [0, 64], sizes = [16, 32], strides = [1, 1]} : vector<24x128xbf16> to vector<16x32xbf16>
    %cst_53 = arith.constant dense<0.000000e+00> : vector<24x16xf32>
    %121 = tpu.matmul %117, %120, %cst_53 {dimension_numbers = #tpu.dot_dimension_numbers<[1], [1], [0], [0], [0, 0, 1, 0], [], []>} : vector<24x32xbf16>, vector<16x32xbf16>, vector<24x16xf32> -> vector<24x16xf32>
    %cst_54 = arith.constant 0.176776692 : f32
    %122 = vector.broadcast %cst_54 : f32 to vector<24x16xf32>
    %123 = arith.mulf %121, %122 : vector<24x16xf32>
    %124 = vector.broadcast %28 : vector<1x16xf32> to vector<24x16xf32>
    %125 = arith.addf %123, %124 : vector<24x16xf32>
    %126 = vector.extract_strided_slice %23 {offsets = [16, 64], sizes = [8, 32], strides = [1, 1]} : vector<24x128xbf16> to vector<8x32xbf16>
    %cst_55 = arith.constant dense<0.000000e+00> : vector<24x8xf32>
    %127 = tpu.matmul %119, %126, %cst_55 {dimension_numbers = #tpu.dot_dimension_numbers<[1], [1], [0], [0], [0, 0, 1, 0], [], []>} : vector<24x32xbf16>, vector<8x32xbf16>, vector<24x8xf32> -> vector<24x8xf32>
    %cst_56 = arith.constant 0.176776692 : f32
    %128 = vector.broadcast %cst_56 : f32 to vector<24x8xf32>
    %129 = arith.mulf %127, %128 : vector<24x8xf32>
    %130 = vector.broadcast %29 : vector<1x8xf32> to vector<24x8xf32>
    %131 = arith.addf %129, %130 : vector<24x8xf32>
    %cst_57 = arith.constant dense<0xFF800000> : vector<24xf32>
    %132 = vector.multi_reduction <maximumf>, %125, %cst_57 [1] : vector<24x16xf32> to vector<24xf32>
    %133 = vector.shape_cast %132 : vector<24xf32> to vector<24x1xf32>
    %cst_58 = arith.constant dense<0xFF800000> : vector<24xf32>
    %134 = vector.multi_reduction <maximumf>, %131, %cst_58 [1] : vector<24x8xf32> to vector<24xf32>
    %135 = vector.shape_cast %134 : vector<24xf32> to vector<24x1xf32>
    %136 = arith.maximumf %133, %135 : vector<24x1xf32>
    %137 = vector.broadcast %136 : vector<24x1xf32> to vector<24x16xf32>
    %138 = arith.subf %125, %137 : vector<24x16xf32>
    %139 = math.exp %138 : vector<24x16xf32>
    %140 = vector.broadcast %136 : vector<24x1xf32> to vector<24x8xf32>
    %141 = arith.subf %131, %140 : vector<24x8xf32>
    %142 = math.exp %141 : vector<24x8xf32>
    %cst_59 = arith.constant dense<0.000000e+00> : vector<24xf32>
    %143 = vector.multi_reduction <add>, %139, %cst_59 [1] : vector<24x16xf32> to vector<24xf32>
    %144 = vector.shape_cast %143 : vector<24xf32> to vector<24x1xf32>
    %cst_60 = arith.constant dense<0.000000e+00> : vector<24xf32>
    %145 = vector.multi_reduction <add>, %142, %cst_60 [1] : vector<24x8xf32> to vector<24xf32>
    %146 = vector.shape_cast %145 : vector<24xf32> to vector<24x1xf32>
    %147 = arith.addf %144, %146 : vector<24x1xf32>
    %148 = arith.truncf %139 : vector<24x16xf32> to vector<24x16xbf16>
    %149 = vector.extract_strided_slice %25 {offsets = [0, 64], sizes = [16, 32], strides = [1, 1]} : vector<24x128xbf16> to vector<16x32xbf16>
    %cst_61 = arith.constant dense<0.000000e+00> : vector<24x32xf32>
    %150 = tpu.matmul %148, %149, %cst_61 {dimension_numbers = #tpu.dot_dimension_numbers<[1], [0], [0], [1], [0, 0, 1, 1], [], []>} : vector<24x16xbf16>, vector<16x32xbf16>, vector<24x32xf32> -> vector<24x32xf32>
    %151 = arith.truncf %142 : vector<24x8xf32> to vector<24x8xbf16>
    %152 = vector.extract_strided_slice %25 {offsets = [16, 64], sizes = [8, 32], strides = [1, 1]} : vector<24x128xbf16> to vector<8x32xbf16>
    %cst_62 = arith.constant dense<0.000000e+00> : vector<24x32xf32>
    %153 = tpu.matmul %151, %152, %cst_62 {dimension_numbers = #tpu.dot_dimension_numbers<[1], [0], [0], [1], [0, 0, 1, 1], [], []>} : vector<24x8xbf16>, vector<8x32xbf16>, vector<24x32xf32> -> vector<24x32xf32>
    %154 = arith.addf %150, %153 : vector<24x32xf32>
    %155 = tpu.reciprocal %147 {approx = true} : vector<24x1xf32> -> vector<24x1xf32>
    %156 = vector.broadcast %155 : vector<24x1xf32> to vector<24x32xf32>
    %157 = arith.mulf %154, %156 : vector<24x32xf32>
    %c0_63 = arith.constant 0 : index
    %c64_64 = arith.constant 64 : index
    %158 = vector.load %arg13[%c0_63, %c64_64] : memref<24x128xf32, #tpu.memory_space<vmem>>, vector<24x32xf32>
    tpu.vector_store %arg13[%c0_63, %c64_64], %157 {strides = array<i32>} : memref<24x128xf32, #tpu.memory_space<vmem>>, vector<24x32xf32>,
    %c0_65 = arith.constant 0 : index
    %c96 = arith.constant 96 : index
    %159 = vector.load %arg12[%c0_65, %c96] : memref<24x256xf32, #tpu.memory_space<vmem>>, vector<24x32xf32>
    %160 = arith.truncf %159 : vector<24x32xf32> to vector<24x32xbf16>
    %c0_66 = arith.constant 0 : index
    %c224 = arith.constant 224 : index
    %161 = vector.load %arg12[%c0_66, %c224] : memref<24x256xf32, #tpu.memory_space<vmem>>, vector<24x32xf32>
    %162 = arith.truncf %161 : vector<24x32xf32> to vector<24x32xbf16>
    %163 = vector.extract_strided_slice %23 {offsets = [0, 96], sizes = [16, 32], strides = [1, 1]} : vector<24x128xbf16> to vector<16x32xbf16>
    %cst_67 = arith.constant dense<0.000000e+00> : vector<24x16xf32>
    %164 = tpu.matmul %160, %163, %cst_67 {dimension_numbers = #tpu.dot_dimension_numbers<[1], [1], [0], [0], [0, 0, 1, 0], [], []>} : vector<24x32xbf16>, vector<16x32xbf16>, vector<24x16xf32> -> vector<24x16xf32>
    %cst_68 = arith.constant 0.176776692 : f32
    %165 = vector.broadcast %cst_68 : f32 to vector<24x16xf32>
    %166 = arith.mulf %164, %165 : vector<24x16xf32>
    %167 = vector.broadcast %28 : vector<1x16xf32> to vector<24x16xf32>
    %168 = arith.addf %166, %167 : vector<24x16xf32>
    %169 = vector.extract_strided_slice %23 {offsets = [16, 96], sizes = [8, 32], strides = [1, 1]} : vector<24x128xbf16> to vector<8x32xbf16>
    %cst_69 = arith.constant dense<0.000000e+00> : vector<24x8xf32>
    %170 = tpu.matmul %162, %169, %cst_69 {dimension_numbers = #tpu.dot_dimension_numbers<[1], [1], [0], [0], [0, 0, 1, 0], [], []>} : vector<24x32xbf16>, vector<8x32xbf16>, vector<24x8xf32> -> vector<24x8xf32>
    %cst_70 = arith.constant 0.176776692 : f32
    %171 = vector.broadcast %cst_70 : f32 to vector<24x8xf32>
    %172 = arith.mulf %170, %171 : vector<24x8xf32>
    %173 = vector.broadcast %29 : vector<1x8xf32> to vector<24x8xf32>
    %174 = arith.addf %172, %173 : vector<24x8xf32>
    %cst_71 = arith.constant dense<0xFF800000> : vector<24xf32>
    %175 = vector.multi_reduction <maximumf>, %168, %cst_71 [1] : vector<24x16xf32> to vector<24xf32>
    %176 = vector.shape_cast %175 : vector<24xf32> to vector<24x1xf32>
    %cst_72 = arith.constant dense<0xFF800000> : vector<24xf32>
    %177 = vector.multi_reduction <maximumf>, %174, %cst_72 [1] : vector<24x8xf32> to vector<24xf32>
    %178 = vector.shape_cast %177 : vector<24xf32> to vector<24x1xf32>
    %179 = arith.maximumf %176, %178 : vector<24x1xf32>
    %180 = vector.broadcast %179 : vector<24x1xf32> to vector<24x16xf32>
    %181 = arith.subf %168, %180 : vector<24x16xf32>
    %182 = math.exp %181 : vector<24x16xf32>
    %183 = vector.broadcast %179 : vector<24x1xf32> to vector<24x8xf32>
    %184 = arith.subf %174, %183 : vector<24x8xf32>
    %185 = math.exp %184 : vector<24x8xf32>
    %cst_73 = arith.constant dense<0.000000e+00> : vector<24xf32>
    %186 = vector.multi_reduction <add>, %182, %cst_73 [1] : vector<24x16xf32> to vector<24xf32>
    %187 = vector.shape_cast %186 : vector<24xf32> to vector<24x1xf32>
    %cst_74 = arith.constant dense<0.000000e+00> : vector<24xf32>
    %188 = vector.multi_reduction <add>, %185, %cst_74 [1] : vector<24x8xf32> to vector<24xf32>
    %189 = vector.shape_cast %188 : vector<24xf32> to vector<24x1xf32>
    %190 = arith.addf %187, %189 : vector<24x1xf32>
    %191 = arith.truncf %182 : vector<24x16xf32> to vector<24x16xbf16>
    %192 = vector.extract_strided_slice %25 {offsets = [0, 96], sizes = [16, 32], strides = [1, 1]} : vector<24x128xbf16> to vector<16x32xbf16>
    %cst_75 = arith.constant dense<0.000000e+00> : vector<24x32xf32>
    %193 = tpu.matmul %191, %192, %cst_75 {dimension_numbers = #tpu.dot_dimension_numbers<[1], [0], [0], [1], [0, 0, 1, 1], [], []>} : vector<24x16xbf16>, vector<16x32xbf16>, vector<24x32xf32> -> vector<24x32xf32>
    %194 = arith.truncf %185 : vector<24x8xf32> to vector<24x8xbf16>
    %195 = vector.extract_strided_slice %25 {offsets = [16, 96], sizes = [8, 32], strides = [1, 1]} : vector<24x128xbf16> to vector<8x32xbf16>
    %cst_76 = arith.constant dense<0.000000e+00> : vector<24x32xf32>
    %196 = tpu.matmul %194, %195, %cst_76 {dimension_numbers = #tpu.dot_dimension_numbers<[1], [0], [0], [1], [0, 0, 1, 1], [], []>} : vector<24x8xbf16>, vector<8x32xbf16>, vector<24x32xf32> -> vector<24x32xf32>
    %197 = arith.addf %193, %196 : vector<24x32xf32>
    %198 = tpu.reciprocal %190 {approx = true} : vector<24x1xf32> -> vector<24x1xf32>
    %199 = vector.broadcast %198 : vector<24x1xf32> to vector<24x32xf32>
    %200 = arith.mulf %197, %199 : vector<24x32xf32>
    %c0_77 = arith.constant 0 : index
    %c96_78 = arith.constant 96 : index
    %201 = vector.load %arg13[%c0_77, %c96_78] : memref<24x128xf32, #tpu.memory_space<vmem>>, vector<24x32xf32>
    tpu.vector_store %arg13[%c0_77, %c96_78], %200 {strides = array<i32>} : memref<24x128xf32, #tpu.memory_space<vmem>>, vector<24x32xf32>,
    %c0_79 = arith.constant 0 : index
    %c0_80 = arith.constant 0 : index
    %202 = vector.load %arg13[%c0_79, %c0_80] : memref<24x128xf32, #tpu.memory_space<vmem>>, vector<24x128xf32>
    %203 = arith.truncf %202 : vector<24x128xf32> to vector<24x128xbf16>
    %c0_81 = arith.constant 0 : index
    %c0_82 = arith.constant 0 : index
    %204 = vector.load %arg9[%c0_81, %c0_82] : memref<128x128xbf16, #tpu.memory_space<vmem>>, vector<128x128xbf16>
    %cst_83 = arith.constant dense<0.000000e+00> : vector<24x128xf32>
    %205 = tpu.matmul %203, %204, %cst_83 {dimension_numbers = #tpu.dot_dimension_numbers<[1], [0], [0], [1], [0, 0, 1, 1], [], []>} : vector<24x128xbf16>, vector<128x128xbf16>, vector<24x128xf32> -> vector<24x128xf32>
    %c0_84 = arith.constant 0 : index
    %c0_85 = arith.constant 0 : index
    %206 = vector.load %arg10[%c0_84, %c0_85] : memref<3x128xf32, #tpu.memory_space<vmem>>, vector<1x128xf32>
    %c1 = arith.constant 1 : index
    %c0_86 = arith.constant 0 : index
    %207 = vector.load %arg10[%c1, %c0_86] : memref<3x128xf32, #tpu.memory_space<vmem>>, vector<1x128xf32>
    %c2 = arith.constant 2 : index
    %c0_87 = arith.constant 0 : index
    %208 = vector.load %arg10[%c2, %c0_87] : memref<3x128xf32, #tpu.memory_space<vmem>>, vector<1x128xf32>
    %209 = vector.broadcast %206 : vector<1x128xf32> to vector<24x128xf32>
    %210 = arith.addf %205, %209 : vector<24x128xf32>
    %211 = arith.addf %210, %1 : vector<24x128xf32>
    %cst_88 = arith.constant dense<0.000000e+00> : vector<24xf32>
    %212 = vector.multi_reduction <add>, %211, %cst_88 [1] : vector<24x128xf32> to vector<24xf32>
    %213 = vector.shape_cast %212 : vector<24xf32> to vector<24x1xf32>
    %cst_89 = arith.constant 1.280000e+02 : f32
    %214 = vector.broadcast %cst_89 : f32 to vector<24x1xf32>
    %215 = arith.divf %213, %214 : vector<24x1xf32>
    %216 = vector.broadcast %215 : vector<24x1xf32> to vector<24x128xf32>
    %217 = arith.subf %211, %216 : vector<24x128xf32>
    %218 = arith.mulf %217, %217 : vector<24x128xf32>
    %cst_90 = arith.constant dense<0.000000e+00> : vector<24xf32>
    %219 = vector.multi_reduction <add>, %218, %cst_90 [1] : vector<24x128xf32> to vector<24xf32>
    %220 = vector.shape_cast %219 : vector<24xf32> to vector<24x1xf32>
    %cst_91 = arith.constant 1.280000e+02 : f32
    %221 = vector.broadcast %cst_91 : f32 to vector<24x1xf32>
    %222 = arith.divf %220, %221 : vector<24x1xf32>
    %223 = vector.broadcast %215 : vector<24x1xf32> to vector<24x128xf32>
    %224 = arith.subf %211, %223 : vector<24x128xf32>
    %cst_92 = arith.constant 9.99999996E-13 : f32
    %225 = vector.broadcast %cst_92 : f32 to vector<24x1xf32>
    %226 = arith.addf %222, %225 : vector<24x1xf32>
    %227 = math.rsqrt %226 : vector<24x1xf32>
    %228 = vector.broadcast %227 : vector<24x1xf32> to vector<24x128xf32>
    %229 = arith.mulf %224, %228 : vector<24x128xf32>
    %230 = vector.broadcast %207 : vector<1x128xf32> to vector<24x128xf32>
    %231 = arith.mulf %229, %230 : vector<24x128xf32>
    %232 = vector.broadcast %208 : vector<1x128xf32> to vector<24x128xf32>
    %233 = arith.addf %231, %232 : vector<24x128xf32>
    %c0_93 = arith.constant 0 : index
    %c0_94 = arith.constant 0 : index
    %c0_95 = arith.constant 0 : index
    %234 = vector.load %arg11[%c0_93, %c0_94, %c0_95] : memref<1x24x128xf32, #tpu.memory_space<vmem>>, vector<1x24x128xf32>
    %235 = vector.shape_cast %234 : vector<1x24x128xf32> to vector<24x128xf32>
    %236 = vector.shape_cast %233 : vector<24x128xf32> to vector<1x24x128xf32>
    tpu.vector_store %arg11[%c0_93, %c0_94, %c0_95], %236 {strides = array<i32>} : memref<1x24x128xf32, #tpu.memory_space<vmem>>, vector<1x24x128xf32>,
    return
  }
  func.func @transform_0(%arg0: i32) -> (i32, i32, i32) {
    %c0_i32 = arith.constant 0 : i32
    %c0_i32_0 = arith.constant 0 : i32
    %c0_i32_1 = arith.constant 0 : i32
    return %arg0, %c0_i32, %c0_i32_0 : i32, i32, i32
  }
  func.func @transform_1(%arg0: i32) -> (i32, i32, i32) {
    %c0_i32 = arith.constant 0 : i32
    %c0_i32_0 = arith.constant 0 : i32
    %c0_i32_1 = arith.constant 0 : i32
    return %arg0, %c0_i32, %c0_i32_0 : i32, i32, i32
  }
  func.func @transform_2(%arg0: i32) -> (i32, i32) {
    %c0_i32 = arith.constant 0 : i32
    %c0_i32_0 = arith.constant 0 : i32
    %c0_i32_1 = arith.constant 0 : i32
    return %c0_i32, %c0_i32_0 : i32, i32
  }
  func.func @transform_3(%arg0: i32) -> (i32, i32) {
    %c0_i32 = arith.constant 0 : i32
    %c0_i32_0 = arith.constant 0 : i32
    %c0_i32_1 = arith.constant 0 : i32
    return %c0_i32, %c0_i32_0 : i32, i32
  }
  func.func @transform_4(%arg0: i32) -> (i32, i32) {
    %c0_i32 = arith.constant 0 : i32
    %c0_i32_0 = arith.constant 0 : i32
    %c0_i32_1 = arith.constant 0 : i32
    return %c0_i32, %c0_i32_0 : i32, i32
  }
  func.func @transform_5(%arg0: i32) -> (i32, i32) {
    %c0_i32 = arith.constant 0 : i32
    %c0_i32_0 = arith.constant 0 : i32
    %c0_i32_1 = arith.constant 0 : i32
    return %c0_i32, %c0_i32_0 : i32, i32
  }
  func.func @transform_6(%arg0: i32) -> (i32, i32) {
    %c0_i32 = arith.constant 0 : i32
    %c0_i32_0 = arith.constant 0 : i32
    %c0_i32_1 = arith.constant 0 : i32
    return %c0_i32, %c0_i32_0 : i32, i32
  }
  func.func @transform_7(%arg0: i32) -> (i32, i32) {
    %c0_i32 = arith.constant 0 : i32
    %c0_i32_0 = arith.constant 0 : i32
    %c0_i32_1 = arith.constant 0 : i32
    return %c0_i32, %c0_i32_0 : i32, i32
  }
  func.func @transform_8(%arg0: i32) -> (i32, i32) {
    %c0_i32 = arith.constant 0 : i32
    %c0_i32_0 = arith.constant 0 : i32
    %c0_i32_1 = arith.constant 0 : i32
    return %c0_i32, %c0_i32_0 : i32, i32
  }
  func.func @transform_9(%arg0: i32) -> (i32, i32) {
    %c0_i32 = arith.constant 0 : i32
    %c0_i32_0 = arith.constant 0 : i32
    %c0_i32_1 = arith.constant 0 : i32
    return %c0_i32, %c0_i32_0 : i32, i32
  }
  func.func @transform_10(%arg0: i32) -> (i32, i32, i32) {
    %c0_i32 = arith.constant 0 : i32
    %c0_i32_0 = arith.constant 0 : i32
    %c0_i32_1 = arith.constant 0 : i32
    return %arg0, %c0_i32, %c0_i32_0 : i32, i32, i32
  }
}

module attributes {stable_mosaic.version = 11 : i64} {
  func.func @_entity_aware_attention_kernel(%arg0: i32, %arg1: memref<1x24x128xf32, #tpu.memory_space<vmem>>, %arg2: memref<1x1x128xf32, #tpu.memory_space<vmem>>, %arg3: memref<128x256xbf16, #tpu.memory_space<vmem>>, %arg4: memref<128x256xbf16, #tpu.memory_space<vmem>>, %arg5: memref<1x256xf32, #tpu.memory_space<vmem>>, %arg6: memref<1x256xf32, #tpu.memory_space<vmem>>, %arg7: memref<128x256xbf16, #tpu.memory_space<vmem>>, %arg8: memref<1x256xf32, #tpu.memory_space<vmem>>, %arg9: memref<128x128xbf16, #tpu.memory_space<vmem>>, %arg10: memref<3x128xf32, #tpu.memory_space<vmem>>, %arg11: memref<1x24x128xf32, #tpu.memory_space<vmem>>, %arg12: memref<24x256xf32, #tpu.memory_space<vmem>>, %arg13: memref<24x128xf32, #tpu.memory_space<vmem>>) attributes {dimension_semantics = [#tpu.dimension_semantics<parallel>], iteration_bounds = array<i64: 2>, scalar_prefetch = 0 : i64, scratch_operands = 2 : i64, tpu.core_type = #tpu.core_type<tc>, window_params = [{transform_indices = @transform_0, window_bounds = array<i64: 1, 24, 128>}, {transform_indices = @transform_1, window_bounds = array<i64: 1, 1, 128>}, {pipeline_mode = #tpu.pipeline_mode<synchronous>, transform_indices = @transform_2, window_bounds = array<i64: 128, 256>}, {pipeline_mode = #tpu.pipeline_mode<synchronous>, transform_indices = @transform_3, window_bounds = array<i64: 128, 256>}, {pipeline_mode = #tpu.pipeline_mode<synchronous>, transform_indices = @transform_4, window_bounds = array<i64: 1, 256>}, {pipeline_mode = #tpu.pipeline_mode<synchronous>, transform_indices = @transform_5, window_bounds = array<i64: 1, 256>}, {pipeline_mode = #tpu.pipeline_mode<synchronous>, transform_indices = @transform_6, window_bounds = array<i64: 128, 256>}, {pipeline_mode = #tpu.pipeline_mode<synchronous>, transform_indices = @transform_7, window_bounds = array<i64: 1, 256>}, {pipeline_mode = #tpu.pipeline_mode<synchronous>, transform_indices = @transform_8, window_bounds = array<i64: 128, 128>}, {pipeline_mode = #tpu.pipeline_mode<synchronous>, transform_indices = @transform_9, window_bounds = array<i64: 3, 128>}, {transform_indices = @transform_10, window_bounds = array<i64: 1, 24, 128>}]} {
    %c0 = arith.constant 0 : index
    %c0_0 = arith.constant 0 : index
    %c0_1 = arith.constant 0 : index
    %0 = vector.load %arg1[%c0, %c0_0, %c0_1] : memref<1x24x128xf32, #tpu.memory_space<vmem>>, vector<1x24x128xf32>
    %1 = vector.shape_cast %0 : vector<1x24x128xf32> to vector<24x128xf32>
    %2 = arith.truncf %1 : vector<24x128xf32> to vector<24x128xbf16>
    %3 = vector.extract_strided_slice %2 {offsets = [0, 0], sizes = [16, 128], strides = [1, 1]} : vector<24x128xbf16> to vector<16x128xbf16>
    %c0_2 = arith.constant 0 : index
    %c0_3 = arith.constant 0 : index
    %4 = vector.load %arg3[%c0_2, %c0_3] : memref<128x256xbf16, #tpu.memory_space<vmem>>, vector<128x256xbf16>
    %cst = arith.constant dense<0.000000e+00> : vector<16x256xf32>
    %5 = tpu.matmul %3, %4, %cst {dimension_numbers = #tpu.dot_dimension_numbers<[1], [0], [0], [1], [0, 0, 1, 1], [], []>} : vector<16x128xbf16>, vector<128x256xbf16>, vector<16x256xf32> -> vector<16x256xf32>
    %c0_4 = arith.constant 0 : index
    %c0_5 = arith.constant 0 : index
    %6 = vector.load %arg5[%c0_4, %c0_5] : memref<1x256xf32, #tpu.memory_space<vmem>>, vector<1x256xf32>
    %7 = vector.broadcast %6 : vector<1x256xf32> to vector<16x256xf32>
    %8 = arith.addf %5, %7 : vector<16x256xf32>
    %c0_6 = arith.constant 0 : index
    %c0_7 = arith.constant 0 : index
    %9 = vector.load %arg12[%c0_6, %c0_7] : memref<24x256xf32, #tpu.memory_space<vmem>>, vector<16x256xf32>
    tpu.vector_store %arg12[%c0_6, %c0_7], %8 {strides = array<i32>} : memref<24x256xf32, #tpu.memory_space<vmem>>, vector<16x256xf32>,
    %10 = vector.extract_strided_slice %2 {offsets = [16, 0], sizes = [8, 128], strides = [1, 1]} : vector<24x128xbf16> to vector<8x128xbf16>
    %c0_8 = arith.constant 0 : index
    %c0_9 = arith.constant 0 : index
    %11 = vector.load %arg4[%c0_8, %c0_9] : memref<128x256xbf16, #tpu.memory_space<vmem>>, vector<128x256xbf16>
    %cst_10 = arith.constant dense<0.000000e+00> : vector<8x256xf32>
    %12 = tpu.matmul %10, %11, %cst_10 {dimension_numbers = #tpu.dot_dimension_numbers<[1], [0], [0], [1], [0, 0, 1, 1], [], []>} : vector<8x128xbf16>, vector<128x256xbf16>, vector<8x256xf32> -> vector<8x256xf32>
    %c0_11 = arith.constant 0 : index
    %c0_12 = arith.constant 0 : index
    %13 = vector.load %arg6[%c0_11, %c0_12] : memref<1x256xf32, #tpu.memory_space<vmem>>, vector<1x256xf32>
    %14 = vector.broadcast %13 : vector<1x256xf32> to vector<8x256xf32>
    %15 = arith.addf %12, %14 : vector<8x256xf32>
    %c16 = arith.constant 16 : index
    %c0_13 = arith.constant 0 : index
    %16 = vector.load %arg12[%c16, %c0_13] : memref<24x256xf32, #tpu.memory_space<vmem>>, vector<8x256xf32>
    tpu.vector_store %arg12[%c16, %c0_13], %15 {strides = array<i32>} : memref<24x256xf32, #tpu.memory_space<vmem>>, vector<8x256xf32>,
    %c0_14 = arith.constant 0 : index
    %c0_15 = arith.constant 0 : index
    %17 = vector.load %arg7[%c0_14, %c0_15] : memref<128x256xbf16, #tpu.memory_space<vmem>>, vector<128x256xbf16>
    %cst_16 = arith.constant dense<0.000000e+00> : vector<24x256xf32>
    %18 = tpu.matmul %2, %17, %cst_16 {dimension_numbers = #tpu.dot_dimension_numbers<[1], [0], [0], [1], [0, 0, 1, 1], [], []>} : vector<24x128xbf16>, vector<128x256xbf16>, vector<24x256xf32> -> vector<24x256xf32>
    %c0_17 = arith.constant 0 : index
    %c0_18 = arith.constant 0 : index
    %19 = vector.load %arg8[%c0_17, %c0_18] : memref<1x256xf32, #tpu.memory_space<vmem>>, vector<1x256xf32>
    %20 = vector.broadcast %19 : vector<1x256xf32> to vector<24x256xf32>
    %21 = arith.addf %18, %20 : vector<24x256xf32>
    %22 = vector.extract_strided_slice %21 {offsets = [0, 0], sizes = [24, 128], strides = [1, 1]} : vector<24x256xf32> to vector<24x128xf32>
    %23 = arith.truncf %22 : vector<24x128xf32> to vector<24x128xbf16>
    %24 = vector.extract_strided_slice %21 {offsets = [0, 128], sizes = [24, 128], strides = [1, 1]} : vector<24x256xf32> to vector<24x128xf32>
    %25 = arith.truncf %24 : vector<24x128xf32> to vector<24x128xbf16>
    %c0_19 = arith.constant 0 : index
    %c0_20 = arith.constant 0 : index
    %c0_21 = arith.constant 0 : index
    %26 = vector.load %arg2[%c0_19, %c0_20, %c0_21] : memref<1x1x128xf32, #tpu.memory_space<vmem>>, vector<1x1x128xf32>
    %27 = vector.shape_cast %26 : vector<1x1x128xf32> to vector<1x128xf32>
    %28 = vector.extract_strided_slice %27 {offsets = [0, 0], sizes = [1, 16], strides = [1, 1]} : vector<1x128xf32> to vector<1x16xf32>
    %29 = vector.extract_strided_slice %27 {offsets = [0, 16], sizes = [1, 8], strides = [1, 1]} : vector<1x128xf32> to vector<1x8xf32>
    %c0_22 = arith.constant 0 : index
    %c0_23 = arith.constant 0 : index
    %30 = vector.load %arg12[%c0_22, %c0_23] : memref<24x256xf32, #tpu.memory_space<vmem>>, vector<24x32xf32>
    %31 = arith.truncf %30 : vector<24x32xf32> to vector<24x32xbf16>
    %c0_24 = arith.constant 0 : index
    %c128 = arith.constant 128 : index
    %32 = vector.load %arg12[%c0_24, %c128] : memref<24x256xf32, #tpu.memory_space<vmem>>, vector<24x32xf32>
    %33 = arith.truncf %32 : vector<24x32xf32> to vector<24x32xbf16>
    %34 = vector.extract_strided_slice %23 {offsets = [0, 0], sizes = [16, 32], strides = [1, 1]} : vector<24x128xbf16> to vector<16x32xbf16>
    %cst_25 = arith.constant dense<0.000000e+00> : vector<24x16xf32>
    %35 = tpu.matmul %31, %34, %cst_25 {dimension_numbers = #tpu.dot_dimension_numbers<[1], [1], [0], [0], [0, 0, 1, 0], [], []>} : vector<24x32xbf16>, vector<16x32xbf16>, vector<24x16xf32> -> vector<24x16xf32>
    %cst_26 = arith.constant 0.176776692 : f32
    %36 = vector.broadcast %cst_26 : f32 to vector<24x16xf32>
    %37 = arith.mulf %35, %36 : vector<24x16xf32>
    %38 = vector.broadcast %28 : vector<1x16xf32> to vector<24x16xf32>
    %39 = arith.addf %37, %38 : vector<24x16xf32>
    %40 = vector.extract_strided_slice %23 {offsets = [16, 0], sizes = [8, 32], strides = [1, 1]} : vector<24x128xbf16> to vector<8x32xbf16>
    %cst_27 = arith.constant dense<0.000000e+00> : vector<24x8xf32>
    %41 = tpu.matmul %33, %40, %cst_27 {dimension_numbers = #tpu.dot_dimension_numbers<[1], [1], [0], [0], [0, 0, 1, 0], [], []>} : vector<24x32xbf16>, vector<8x32xbf16>, vector<24x8xf32> -> vector<24x8xf32>
    %cst_28 = arith.constant 0.176776692 : f32
    %42 = vector.broadcast %cst_28 : f32 to vector<24x8xf32>
    %43 = arith.mulf %41, %42 : vector<24x8xf32>
    %44 = vector.broadcast %29 : vector<1x8xf32> to vector<24x8xf32>
    %45 = arith.addf %43, %44 : vector<24x8xf32>
    %cst_29 = arith.constant dense<0xFF800000> : vector<24xf32>
    %46 = vector.multi_reduction <maximumf>, %39, %cst_29 [1] : vector<24x16xf32> to vector<24xf32>
    %47 = vector.shape_cast %46 : vector<24xf32> to vector<24x1xf32>
    %cst_30 = arith.constant dense<0xFF800000> : vector<24xf32>
    %48 = vector.multi_reduction <maximumf>, %45, %cst_30 [1] : vector<24x8xf32> to vector<24xf32>
    %49 = vector.shape_cast %48 : vector<24xf32> to vector<24x1xf32>
    %50 = arith.maximumf %47, %49 : vector<24x1xf32>
    %51 = vector.broadcast %50 : vector<24x1xf32> to vector<24x16xf32>
    %52 = arith.subf %39, %51 : vector<24x16xf32>
    %53 = math.exp %52 : vector<24x16xf32>
    %54 = vector.broadcast %50 : vector<24x1xf32> to vector<24x8xf32>
    %55 = arith.subf %45, %54 : vector<24x8xf32>
    %56 = math.exp %55 : vector<24x8xf32>
    %cst_31 = arith.constant dense<0.000000e+00> : vector<24xf32>
    %57 = vector.multi_reduction <add>, %53, %cst_31 [1] : vector<24x16xf32> to vector<24xf32>
    %58 = vector.shape_cast %57 : vector<24xf32> to vector<24x1xf32>
    %cst_32 = arith.constant dense<0.000000e+00> : vector<24xf32>
    %59 = vector.multi_reduction <add>, %56, %cst_32 [1] : vector<24x8xf32> to vector<24xf32>
    %60 = vector.shape_cast %59 : vector<24xf32> to vector<24x1xf32>
    %61 = arith.addf %58, %60 : vector<24x1xf32>
    %62 = arith.truncf %53 : vector<24x16xf32> to vector<24x16xbf16>
    %63 = vector.extract_strided_slice %25 {offsets = [0, 0], sizes = [16, 32], strides = [1, 1]} : vector<24x128xbf16> to vector<16x32xbf16>
    %cst_33 = arith.constant dense<0.000000e+00> : vector<24x32xf32>
    %64 = tpu.matmul %62, %63, %cst_33 {dimension_numbers = #tpu.dot_dimension_numbers<[1], [0], [0], [1], [0, 0, 1, 1], [], []>} : vector<24x16xbf16>, vector<16x32xbf16>, vector<24x32xf32> -> vector<24x32xf32>
    %65 = arith.truncf %56 : vector<24x8xf32> to vector<24x8xbf16>
    %66 = vector.extract_strided_slice %25 {offsets = [16, 0], sizes = [8, 32], strides = [1, 1]} : vector<24x128xbf16> to vector<8x32xbf16>
    %cst_34 = arith.constant dense<0.000000e+00> : vector<24x32xf32>
    %67 = tpu.matmul %65, %66, %cst_34 {dimension_numbers = #tpu.dot_dimension_numbers<[1], [0], [0], [1], [0, 0, 1, 1], [], []>} : vector<24x8xbf16>, vector<8x32xbf16>, vector<24x32xf32> -> vector<24x32xf32>
    %68 = arith.addf %64, %67 : vector<24x32xf32>
    %69 = tpu.reciprocal %61 {approx = true} : vector<24x1xf32> -> vector<24x1xf32>
    %70 = vector.broadcast %69 : vector<24x1xf32> to vector<24x32xf32>
    %71 = arith.mulf %68, %70 : vector<24x32xf32>
    %c0_35 = arith.constant 0 : index
    %c0_36 = arith.constant 0 : index
    %72 = vector.load %arg13[%c0_35, %c0_36] : memref<24x128xf32, #tpu.memory_space<vmem>>, vector<24x32xf32>
    tpu.vector_store %arg13[%c0_35, %c0_36], %71 {strides = array<i32>} : memref<24x128xf32, #tpu.memory_space<vmem>>, vector<24x32xf32>,
    %c0_37 = arith.constant 0 : index
    %c32 = arith.constant 32 : index
    %73 = vector.load %arg12[%c0_37, %c32] : memref<24x256xf32, #tpu.memory_space<vmem>>, vector<24x32xf32>
    %74 = arith.truncf %73 : vector<24x32xf32> to vector<24x32xbf16>
    %c0_38 = arith.constant 0 : index
    %c160 = arith.constant 160 : index
    %75 = vector.load %arg12[%c0_38, %c160] : memref<24x256xf32, #tpu.memory_space<vmem>>, vector<24x32xf32>
    %76 = arith.truncf %75 : vector<24x32xf32> to vector<24x32xbf16>
    %77 = vector.extract_strided_slice %23 {offsets = [0, 32], sizes = [16, 32], strides = [1, 1]} : vector<24x128xbf16> to vector<16x32xbf16>
    %cst_39 = arith.constant dense<0.000000e+00> : vector<24x16xf32>
    %78 = tpu.matmul %74, %77, %cst_39 {dimension_numbers = #tpu.dot_dimension_numbers<[1], [1], [0], [0], [0, 0, 1, 0], [], []>} : vector<24x32xbf16>, vector<16x32xbf16>, vector<24x16xf32> -> vector<24x16xf32>
    %cst_40 = arith.constant 0.176776692 : f32
    %79 = vector.broadcast %cst_40 : f32 to vector<24x16xf32>
    %80 = arith.mulf %78, %79 : vector<24x16xf32>
    %81 = vector.broadcast %28 : vector<1x16xf32> to vector<24x16xf32>
    %82 = arith.addf %80, %81 : vector<24x16xf32>
    %83 = vector.extract_strided_slice %23 {offsets = [16, 32], sizes = [8, 32], strides = [1, 1]} : vector<24x128xbf16> to vector<8x32xbf16>
    %cst_41 = arith.constant dense<0.000000e+00> : vector<24x8xf32>
    %84 = tpu.matmul %76, %83, %cst_41 {dimension_numbers = #tpu.dot_dimension_numbers<[1], [1], [0], [0], [0, 0, 1, 0], [], []>} : vector<24x32xbf16>, vector<8x32xbf16>, vector<24x8xf32> -> vector<24x8xf32>
    %cst_42 = arith.constant 0.176776692 : f32
    %85 = vector.broadcast %cst_42 : f32 to vector<24x8xf32>
    %86 = arith.mulf %84, %85 : vector<24x8xf32>
    %87 = vector.broadcast %29 : vector<1x8xf32> to vector<24x8xf32>
    %88 = arith.addf %86, %87 : vector<24x8xf32>
    %cst_43 = arith.constant dense<0xFF800000> : vector<24xf32>
    %89 = vector.multi_reduction <maximumf>, %82, %cst_43 [1] : vector<24x16xf32> to vector<24xf32>
    %90 = vector.shape_cast %89 : vector<24xf32> to vector<24x1xf32>
    %cst_44 = arith.constant dense<0xFF800000> : vector<24xf32>
    %91 = vector.multi_reduction <maximumf>, %88, %cst_44 [1] : vector<24x8xf32> to vector<24xf32>
    %92 = vector.shape_cast %91 : vector<24xf32> to vector<24x1xf32>
    %93 = arith.maximumf %90, %92 : vector<24x1xf32>
    %94 = vector.broadcast %93 : vector<24x1xf32> to vector<24x16xf32>
    %95 = arith.subf %82, %94 : vector<24x16xf32>
    %96 = math.exp %95 : vector<24x16xf32>
    %97 = vector.broadcast %93 : vector<24x1xf32> to vector<24x8xf32>
    %98 = arith.subf %88, %97 : vector<24x8xf32>
    %99 = math.exp %98 : vector<24x8xf32>
    %cst_45 = arith.constant dense<0.000000e+00> : vector<24xf32>
    %100 = vector.multi_reduction <add>, %96, %cst_45 [1] : vector<24x16xf32> to vector<24xf32>
    %101 = vector.shape_cast %100 : vector<24xf32> to vector<24x1xf32>
    %cst_46 = arith.constant dense<0.000000e+00> : vector<24xf32>
    %102 = vector.multi_reduction <add>, %99, %cst_46 [1] : vector<24x8xf32> to vector<24xf32>
    %103 = vector.shape_cast %102 : vector<24xf32> to vector<24x1xf32>
    %104 = arith.addf %101, %103 : vector<24x1xf32>
    %105 = arith.truncf %96 : vector<24x16xf32> to vector<24x16xbf16>
    %106 = vector.extract_strided_slice %25 {offsets = [0, 32], sizes = [16, 32], strides = [1, 1]} : vector<24x128xbf16> to vector<16x32xbf16>
    %cst_47 = arith.constant dense<0.000000e+00> : vector<24x32xf32>
    %107 = tpu.matmul %105, %106, %cst_47 {dimension_numbers = #tpu.dot_dimension_numbers<[1], [0], [0], [1], [0, 0, 1, 1], [], []>} : vector<24x16xbf16>, vector<16x32xbf16>, vector<24x32xf32> -> vector<24x32xf32>
    %108 = arith.truncf %99 : vector<24x8xf32> to vector<24x8xbf16>
    %109 = vector.extract_strided_slice %25 {offsets = [16, 32], sizes = [8, 32], strides = [1, 1]} : vector<24x128xbf16> to vector<8x32xbf16>
    %cst_48 = arith.constant dense<0.000000e+00> : vector<24x32xf32>
    %110 = tpu.matmul %108, %109, %cst_48 {dimension_numbers = #tpu.dot_dimension_numbers<[1], [0], [0], [1], [0, 0, 1, 1], [], []>} : vector<24x8xbf16>, vector<8x32xbf16>, vector<24x32xf32> -> vector<24x32xf32>
    %111 = arith.addf %107, %110 : vector<24x32xf32>
    %112 = tpu.reciprocal %104 {approx = true} : vector<24x1xf32> -> vector<24x1xf32>
    %113 = vector.broadcast %112 : vector<24x1xf32> to vector<24x32xf32>
    %114 = arith.mulf %111, %113 : vector<24x32xf32>
    %c0_49 = arith.constant 0 : index
    %c32_50 = arith.constant 32 : index
    %115 = vector.load %arg13[%c0_49, %c32_50] : memref<24x128xf32, #tpu.memory_space<vmem>>, vector<24x32xf32>
    tpu.vector_store %arg13[%c0_49, %c32_50], %114 {strides = array<i32>} : memref<24x128xf32, #tpu.memory_space<vmem>>, vector<24x32xf32>,
    %c0_51 = arith.constant 0 : index
    %c64 = arith.constant 64 : index
    %116 = vector.load %arg12[%c0_51, %c64] : memref<24x256xf32, #tpu.memory_space<vmem>>, vector<24x32xf32>
    %117 = arith.truncf %116 : vector<24x32xf32> to vector<24x32xbf16>
    %c0_52 = arith.constant 0 : index
    %c192 = arith.constant 192 : index
    %118 = vector.load %arg12[%c0_52, %c192] : memref<24x256xf32, #tpu.memory_space<vmem>>, vector<24x32xf32>
    %119 = arith.truncf %118 : vector<24x32xf32> to vector<24x32xbf16>
    %120 = vector.extract_strided_slice %23 {offsets = [0, 64], sizes = [16, 32], strides = [1, 1]} : vector<24x128xbf16> to vector<16x32xbf16>
    %cst_53 = arith.constant dense<0.000000e+00> : vector<24x16xf32>
    %121 = tpu.matmul %117, %120, %cst_53 {dimension_numbers = #tpu.dot_dimension_numbers<[1], [1], [0], [0], [0, 0, 1, 0], [], []>} : vector<24x32xbf16>, vector<16x32xbf16>, vector<24x16xf32> -> vector<24x16xf32>
    %cst_54 = arith.constant 0.176776692 : f32
    %122 = vector.broadcast %cst_54 : f32 to vector<24x16xf32>
    %123 = arith.mulf %121, %122 : vector<24x16xf32>
    %124 = vector.broadcast %28 : vector<1x16xf32> to vector<24x16xf32>
    %125 = arith.addf %123, %124 : vector<24x16xf32>
    %126 = vector.extract_strided_slice %23 {offsets = [16, 64], sizes = [8, 32], strides = [1, 1]} : vector<24x128xbf16> to vector<8x32xbf16>
    %cst_55 = arith.constant dense<0.000000e+00> : vector<24x8xf32>
    %127 = tpu.matmul %119, %126, %cst_55 {dimension_numbers = #tpu.dot_dimension_numbers<[1], [1], [0], [0], [0, 0, 1, 0], [], []>} : vector<24x32xbf16>, vector<8x32xbf16>, vector<24x8xf32> -> vector<24x8xf32>
    %cst_56 = arith.constant 0.176776692 : f32
    %128 = vector.broadcast %cst_56 : f32 to vector<24x8xf32>
    %129 = arith.mulf %127, %128 : vector<24x8xf32>
    %130 = vector.broadcast %29 : vector<1x8xf32> to vector<24x8xf32>
    %131 = arith.addf %129, %130 : vector<24x8xf32>
    %cst_57 = arith.constant dense<0xFF800000> : vector<24xf32>
    %132 = vector.multi_reduction <maximumf>, %125, %cst_57 [1] : vector<24x16xf32> to vector<24xf32>
    %133 = vector.shape_cast %132 : vector<24xf32> to vector<24x1xf32>
    %cst_58 = arith.constant dense<0xFF800000> : vector<24xf32>
    %134 = vector.multi_reduction <maximumf>, %131, %cst_58 [1] : vector<24x8xf32> to vector<24xf32>
    %135 = vector.shape_cast %134 : vector<24xf32> to vector<24x1xf32>
    %136 = arith.maximumf %133, %135 : vector<24x1xf32>
    %137 = vector.broadcast %136 : vector<24x1xf32> to vector<24x16xf32>
    %138 = arith.subf %125, %137 : vector<24x16xf32>
    %139 = math.exp %138 : vector<24x16xf32>
    %140 = vector.broadcast %136 : vector<24x1xf32> to vector<24x8xf32>
    %141 = arith.subf %131, %140 : vector<24x8xf32>
    %142 = math.exp %141 : vector<24x8xf32>
    %cst_59 = arith.constant dense<0.000000e+00> : vector<24xf32>
    %143 = vector.multi_reduction <add>, %139, %cst_59 [1] : vector<24x16xf32> to vector<24xf32>
    %144 = vector.shape_cast %143 : vector<24xf32> to vector<24x1xf32>
    %cst_60 = arith.constant dense<0.000000e+00> : vector<24xf32>
    %145 = vector.multi_reduction <add>, %142, %cst_60 [1] : vector<24x8xf32> to vector<24xf32>
    %146 = vector.shape_cast %145 : vector<24xf32> to vector<24x1xf32>
    %147 = arith.addf %144, %146 : vector<24x1xf32>
    %148 = arith.truncf %139 : vector<24x16xf32> to vector<24x16xbf16>
    %149 = vector.extract_strided_slice %25 {offsets = [0, 64], sizes = [16, 32], strides = [1, 1]} : vector<24x128xbf16> to vector<16x32xbf16>
    %cst_61 = arith.constant dense<0.000000e+00> : vector<24x32xf32>
    %150 = tpu.matmul %148, %149, %cst_61 {dimension_numbers = #tpu.dot_dimension_numbers<[1], [0], [0], [1], [0, 0, 1, 1], [], []>} : vector<24x16xbf16>, vector<16x32xbf16>, vector<24x32xf32> -> vector<24x32xf32>
    %151 = arith.truncf %142 : vector<24x8xf32> to vector<24x8xbf16>
    %152 = vector.extract_strided_slice %25 {offsets = [16, 64], sizes = [8, 32], strides = [1, 1]} : vector<24x128xbf16> to vector<8x32xbf16>
    %cst_62 = arith.constant dense<0.000000e+00> : vector<24x32xf32>
    %153 = tpu.matmul %151, %152, %cst_62 {dimension_numbers = #tpu.dot_dimension_numbers<[1], [0], [0], [1], [0, 0, 1, 1], [], []>} : vector<24x8xbf16>, vector<8x32xbf16>, vector<24x32xf32> -> vector<24x32xf32>
    %154 = arith.addf %150, %153 : vector<24x32xf32>
    %155 = tpu.reciprocal %147 {approx = true} : vector<24x1xf32> -> vector<24x1xf32>
    %156 = vector.broadcast %155 : vector<24x1xf32> to vector<24x32xf32>
    %157 = arith.mulf %154, %156 : vector<24x32xf32>
    %c0_63 = arith.constant 0 : index
    %c64_64 = arith.constant 64 : index
    %158 = vector.load %arg13[%c0_63, %c64_64] : memref<24x128xf32, #tpu.memory_space<vmem>>, vector<24x32xf32>
    tpu.vector_store %arg13[%c0_63, %c64_64], %157 {strides = array<i32>} : memref<24x128xf32, #tpu.memory_space<vmem>>, vector<24x32xf32>,
    %c0_65 = arith.constant 0 : index
    %c96 = arith.constant 96 : index
    %159 = vector.load %arg12[%c0_65, %c96] : memref<24x256xf32, #tpu.memory_space<vmem>>, vector<24x32xf32>
    %160 = arith.truncf %159 : vector<24x32xf32> to vector<24x32xbf16>
    %c0_66 = arith.constant 0 : index
    %c224 = arith.constant 224 : index
    %161 = vector.load %arg12[%c0_66, %c224] : memref<24x256xf32, #tpu.memory_space<vmem>>, vector<24x32xf32>
    %162 = arith.truncf %161 : vector<24x32xf32> to vector<24x32xbf16>
    %163 = vector.extract_strided_slice %23 {offsets = [0, 96], sizes = [16, 32], strides = [1, 1]} : vector<24x128xbf16> to vector<16x32xbf16>
    %cst_67 = arith.constant dense<0.000000e+00> : vector<24x16xf32>
    %164 = tpu.matmul %160, %163, %cst_67 {dimension_numbers = #tpu.dot_dimension_numbers<[1], [1], [0], [0], [0, 0, 1, 0], [], []>} : vector<24x32xbf16>, vector<16x32xbf16>, vector<24x16xf32> -> vector<24x16xf32>
    %cst_68 = arith.constant 0.176776692 : f32
    %165 = vector.broadcast %cst_68 : f32 to vector<24x16xf32>
    %166 = arith.mulf %164, %165 : vector<24x16xf32>
    %167 = vector.broadcast %28 : vector<1x16xf32> to vector<24x16xf32>
    %168 = arith.addf %166, %167 : vector<24x16xf32>
    %169 = vector.extract_strided_slice %23 {offsets = [16, 96], sizes = [8, 32], strides = [1, 1]} : vector<24x128xbf16> to vector<8x32xbf16>
    %cst_69 = arith.constant dense<0.000000e+00> : vector<24x8xf32>
    %170 = tpu.matmul %162, %169, %cst_69 {dimension_numbers = #tpu.dot_dimension_numbers<[1], [1], [0], [0], [0, 0, 1, 0], [], []>} : vector<24x32xbf16>, vector<8x32xbf16>, vector<24x8xf32> -> vector<24x8xf32>
    %cst_70 = arith.constant 0.176776692 : f32
    %171 = vector.broadcast %cst_70 : f32 to vector<24x8xf32>
    %172 = arith.mulf %170, %171 : vector<24x8xf32>
    %173 = vector.broadcast %29 : vector<1x8xf32> to vector<24x8xf32>
    %174 = arith.addf %172, %173 : vector<24x8xf32>
    %cst_71 = arith.constant dense<0xFF800000> : vector<24xf32>
    %175 = vector.multi_reduction <maximumf>, %168, %cst_71 [1] : vector<24x16xf32> to vector<24xf32>
    %176 = vector.shape_cast %175 : vector<24xf32> to vector<24x1xf32>
    %cst_72 = arith.constant dense<0xFF800000> : vector<24xf32>
    %177 = vector.multi_reduction <maximumf>, %174, %cst_72 [1] : vector<24x8xf32> to vector<24xf32>
    %178 = vector.shape_cast %177 : vector<24xf32> to vector<24x1xf32>
    %179 = arith.maximumf %176, %178 : vector<24x1xf32>
    %180 = vector.broadcast %179 : vector<24x1xf32> to vector<24x16xf32>
    %181 = arith.subf %168, %180 : vector<24x16xf32>
    %182 = math.exp %181 : vector<24x16xf32>
    %183 = vector.broadcast %179 : vector<24x1xf32> to vector<24x8xf32>
    %184 = arith.subf %174, %183 : vector<24x8xf32>
    %185 = math.exp %184 : vector<24x8xf32>
    %cst_73 = arith.constant dense<0.000000e+00> : vector<24xf32>
    %186 = vector.multi_reduction <add>, %182, %cst_73 [1] : vector<24x16xf32> to vector<24xf32>
    %187 = vector.shape_cast %186 : vector<24xf32> to vector<24x1xf32>
    %cst_74 = arith.constant dense<0.000000e+00> : vector<24xf32>
    %188 = vector.multi_reduction <add>, %185, %cst_74 [1] : vector<24x8xf32> to vector<24xf32>
    %189 = vector.shape_cast %188 : vector<24xf32> to vector<24x1xf32>
    %190 = arith.addf %187, %189 : vector<24x1xf32>
    %191 = arith.truncf %182 : vector<24x16xf32> to vector<24x16xbf16>
    %192 = vector.extract_strided_slice %25 {offsets = [0, 96], sizes = [16, 32], strides = [1, 1]} : vector<24x128xbf16> to vector<16x32xbf16>
    %cst_75 = arith.constant dense<0.000000e+00> : vector<24x32xf32>
    %193 = tpu.matmul %191, %192, %cst_75 {dimension_numbers = #tpu.dot_dimension_numbers<[1], [0], [0], [1], [0, 0, 1, 1], [], []>} : vector<24x16xbf16>, vector<16x32xbf16>, vector<24x32xf32> -> vector<24x32xf32>
    %194 = arith.truncf %185 : vector<24x8xf32> to vector<24x8xbf16>
    %195 = vector.extract_strided_slice %25 {offsets = [16, 96], sizes = [8, 32], strides = [1, 1]} : vector<24x128xbf16> to vector<8x32xbf16>
    %cst_76 = arith.constant dense<0.000000e+00> : vector<24x32xf32>
    %196 = tpu.matmul %194, %195, %cst_76 {dimension_numbers = #tpu.dot_dimension_numbers<[1], [0], [0], [1], [0, 0, 1, 1], [], []>} : vector<24x8xbf16>, vector<8x32xbf16>, vector<24x32xf32> -> vector<24x32xf32>
    %197 = arith.addf %193, %196 : vector<24x32xf32>
    %198 = tpu.reciprocal %190 {approx = true} : vector<24x1xf32> -> vector<24x1xf32>
    %199 = vector.broadcast %198 : vector<24x1xf32> to vector<24x32xf32>
    %200 = arith.mulf %197, %199 : vector<24x32xf32>
    %c0_77 = arith.constant 0 : index
    %c96_78 = arith.constant 96 : index
    %201 = vector.load %arg13[%c0_77, %c96_78] : memref<24x128xf32, #tpu.memory_space<vmem>>, vector<24x32xf32>
    tpu.vector_store %arg13[%c0_77, %c96_78], %200 {strides = array<i32>} : memref<24x128xf32, #tpu.memory_space<vmem>>, vector<24x32xf32>,
    %c0_79 = arith.constant 0 : index
    %c0_80 = arith.constant 0 : index
    %202 = vector.load %arg13[%c0_79, %c0_80] : memref<24x128xf32, #tpu.memory_space<vmem>>, vector<24x128xf32>
    %203 = arith.truncf %202 : vector<24x128xf32> to vector<24x128xbf16>
    %c0_81 = arith.constant 0 : index
    %c0_82 = arith.constant 0 : index
    %204 = vector.load %arg9[%c0_81, %c0_82] : memref<128x128xbf16, #tpu.memory_space<vmem>>, vector<128x128xbf16>
    %cst_83 = arith.constant dense<0.000000e+00> : vector<24x128xf32>
    %205 = tpu.matmul %203, %204, %cst_83 {dimension_numbers = #tpu.dot_dimension_numbers<[1], [0], [0], [1], [0, 0, 1, 1], [], []>} : vector<24x128xbf16>, vector<128x128xbf16>, vector<24x128xf32> -> vector<24x128xf32>
    %c0_84 = arith.constant 0 : index
    %c0_85 = arith.constant 0 : index
    %206 = vector.load %arg10[%c0_84, %c0_85] : memref<3x128xf32, #tpu.memory_space<vmem>>, vector<1x128xf32>
    %c1 = arith.constant 1 : index
    %c0_86 = arith.constant 0 : index
    %207 = vector.load %arg10[%c1, %c0_86] : memref<3x128xf32, #tpu.memory_space<vmem>>, vector<1x128xf32>
    %c2 = arith.constant 2 : index
    %c0_87 = arith.constant 0 : index
    %208 = vector.load %arg10[%c2, %c0_87] : memref<3x128xf32, #tpu.memory_space<vmem>>, vector<1x128xf32>
    %209 = vector.broadcast %206 : vector<1x128xf32> to vector<24x128xf32>
    %210 = arith.addf %205, %209 : vector<24x128xf32>
    %211 = arith.addf %210, %1 : vector<24x128xf32>
    %cst_88 = arith.constant dense<0.000000e+00> : vector<24xf32>
    %212 = vector.multi_reduction <add>, %211, %cst_88 [1] : vector<24x128xf32> to vector<24xf32>
    %213 = vector.shape_cast %212 : vector<24xf32> to vector<24x1xf32>
    %cst_89 = arith.constant 1.280000e+02 : f32
    %214 = vector.broadcast %cst_89 : f32 to vector<24x1xf32>
    %215 = arith.divf %213, %214 : vector<24x1xf32>
    %216 = vector.broadcast %215 : vector<24x1xf32> to vector<24x128xf32>
    %217 = arith.subf %211, %216 : vector<24x128xf32>
    %218 = arith.mulf %217, %217 : vector<24x128xf32>
    %cst_90 = arith.constant dense<0.000000e+00> : vector<24xf32>
    %219 = vector.multi_reduction <add>, %218, %cst_90 [1] : vector<24x128xf32> to vector<24xf32>
    %220 = vector.shape_cast %219 : vector<24xf32> to vector<24x1xf32>
    %cst_91 = arith.constant 1.280000e+02 : f32
    %221 = vector.broadcast %cst_91 : f32 to vector<24x1xf32>
    %222 = arith.divf %220, %221 : vector<24x1xf32>
    %223 = vector.broadcast %215 : vector<24x1xf32> to vector<24x128xf32>
    %224 = arith.subf %211, %223 : vector<24x128xf32>
    %cst_92 = arith.constant 9.99999996E-13 : f32
    %225 = vector.broadcast %cst_92 : f32 to vector<24x1xf32>
    %226 = arith.addf %222, %225 : vector<24x1xf32>
    %227 = math.rsqrt %226 : vector<24x1xf32>
    %228 = vector.broadcast %227 : vector<24x1xf32> to vector<24x128xf32>
    %229 = arith.mulf %224, %228 : vector<24x128xf32>
    %230 = vector.broadcast %207 : vector<1x128xf32> to vector<24x128xf32>
    %231 = arith.mulf %229, %230 : vector<24x128xf32>
    %232 = vector.broadcast %208 : vector<1x128xf32> to vector<24x128xf32>
    %233 = arith.addf %231, %232 : vector<24x128xf32>
    %c0_93 = arith.constant 0 : index
    %c0_94 = arith.constant 0 : index
    %c0_95 = arith.constant 0 : index
    %234 = vector.load %arg11[%c0_93, %c0_94, %c0_95] : memref<1x24x128xf32, #tpu.memory_space<vmem>>, vector<1x24x128xf32>
    %235 = vector.shape_cast %234 : vector<1x24x128xf32> to vector<24x128xf32>
    %236 = vector.shape_cast %233 : vector<24x128xf32> to vector<1x24x128xf32>
    tpu.vector_store %arg11[%c0_93, %c0_94, %c0_95], %236 {strides = array<i32>} : memref<1x24x128xf32, #tpu.memory_space<vmem>>, vector<1x24x128xf32>,
    return
  }
  func.func @transform_0(%arg0: i32) -> (i32, i32, i32) {
    %c0_i32 = arith.constant 0 : i32
    %c0_i32_0 = arith.constant 0 : i32
    %c0_i32_1 = arith.constant 0 : i32
    return %arg0, %c0_i32, %c0_i32_0 : i32, i32, i32
  }
  func.func @transform_1(%arg0: i32) -> (i32, i32, i32) {
    %c0_i32 = arith.constant 0 : i32
    %c0_i32_0 = arith.constant 0 : i32
    %c0_i32_1 = arith.constant 0 : i32
    return %arg0, %c0_i32, %c0_i32_0 : i32, i32, i32
  }
  func.func @transform_2(%arg0: i32) -> (i32, i32) {
    %c0_i32 = arith.constant 0 : i32
    %c0_i32_0 = arith.constant 0 : i32
    %c0_i32_1 = arith.constant 0 : i32
    return %c0_i32, %c0_i32_0 : i32, i32
  }
  func.func @transform_3(%arg0: i32) -> (i32, i32) {
    %c0_i32 = arith.constant 0 : i32
    %c0_i32_0 = arith.constant 0 : i32
    %c0_i32_1 = arith.constant 0 : i32
    return %c0_i32, %c0_i32_0 : i32, i32
  }
  func.func @transform_4(%arg0: i32) -> (i32, i32) {
    %c0_i32 = arith.constant 0 : i32
    %c0_i32_0 = arith.constant 0 : i32
    %c0_i32_1 = arith.constant 0 : i32
    return %c0_i32, %c0_i32_0 : i32, i32
  }
  func.func @transform_5(%arg0: i32) -> (i32, i32) {
    %c0_i32 = arith.constant 0 : i32
    %c0_i32_0 = arith.constant 0 : i32
    %c0_i32_1 = arith.constant 0 : i32
    return %c0_i32, %c0_i32_0 : i32, i32
  }
  func.func @transform_6(%arg0: i32) -> (i32, i32) {
    %c0_i32 = arith.constant 0 : i32
    %c0_i32_0 = arith.constant 0 : i32
    %c0_i32_1 = arith.constant 0 : i32
    return %c0_i32, %c0_i32_0 : i32, i32
  }
  func.func @transform_7(%arg0: i32) -> (i32, i32) {
    %c0_i32 = arith.constant 0 : i32
    %c0_i32_0 = arith.constant 0 : i32
    %c0_i32_1 = arith.constant 0 : i32
    return %c0_i32, %c0_i32_0 : i32, i32
  }
  func.func @transform_8(%arg0: i32) -> (i32, i32) {
    %c0_i32 = arith.constant 0 : i32
    %c0_i32_0 = arith.constant 0 : i32
    %c0_i32_1 = arith.constant 0 : i32
    return %c0_i32, %c0_i32_0 : i32, i32
  }
  func.func @transform_9(%arg0: i32) -> (i32, i32) {
    %c0_i32 = arith.constant 0 : i32
    %c0_i32_0 = arith.constant 0 : i32
    %c0_i32_1 = arith.constant 0 : i32
    return %c0_i32, %c0_i32_0 : i32, i32
  }
  func.func @transform_10(%arg0: i32) -> (i32, i32, i32) {
    %c0_i32 = arith.constant 0 : i32
    %c0_i32_0 = arith.constant 0 : i32
    %c0_i32_1 = arith.constant 0 : i32
    return %arg0, %c0_i32, %c0_i32_0 : i32, i32, i32
  }
}

</mosaic_0001>

<bundles_post_ra>
// kernel: tpu_custom_call.1
= control target key start
LH: loop header
LB: loop body
LE: loop exit
PB: predicated region body
PF: predicated region fallthrough
CT: control target
= control target key end

     0   :  { %s3758_s0 = inlined_call_operand.hbm [shape: f32[2,24,128], index: 0, kind: input, shape index: {}]   ;;  %s3759_s1 = inlined_call_operand.hbm [shape: f32[2,1,128], index: 1, kind: input, shape index: {}]   ;;  %s3760_s2 = inlined_call_operand.hbm [shape: bf16[128,256], index: 2, kind: input, shape index: {}]   ;;  %s3761_s3 = inlined_call_operand.hbm [shape: bf16[128,256], index: 3, kind: input, shape index: {}]   ;;  %s3762_s4 = inlined_call_operand.vmem [shape: f32[1,256], index: 4, kind: input, shape index: {}]   ;;  %s3763_s5 = inlined_call_operand.hbm [shape: f32[1,256], index: 5, kind: input, shape index: {}]   ;;  %s3764_s6 = inlined_call_operand.hbm [shape: bf16[128,256], index: 6, kind: input, shape index: {}]   ;;  %s3765_s7 = inlined_call_operand.hbm [shape: f32[1,256], index: 7, kind: input, shape index: {}]   ;;  %s3766_s8 = inlined_call_operand.hbm [shape: bf16[128,128], index: 8, kind: input, shape index: {}]   ;;  %s3767_s9 = inlined_call_operand.vmem [shape: f32[3,128], index: 9, kind: input, shape index: {}]   ;;  %s3768_s10 = inlined_call_operand.hbm [shape: f32[2,24,128], index: 10, kind: output, shape index: {}]  }
   0x1   :  { %3772 = sst [smem:[#allocation28_spill]] %s3758_s0 }
   0x2   :  { %3773 = sst [smem:[#allocation29_spill]] %s3760_s2 }
   0x3   :  { %3774 = sst [smem:[#allocation30_spill]] %s3761_s3 }
   0x4   :  { %3775 = sst [smem:[#allocation31_spill]] %s3763_s5 }
   0x5   :  { %3776 = sst [smem:[#allocation32_spill]] %s3764_s6 }
   0x6   :  { %3777 = sst [smem:[#allocation33_spill]] %s3765_s7 }
   0x7   :  { %3778 = sst [smem:[#allocation34_spill]] %s3766_s8 }
   0x8   :  { %15 = vsyncpa [#allocation5], 0 }
   0x9   :  { %17 = vsyncpa [#allocation5 + $0x1], 0 }
   0xa   :  { %18 = vsyncpa [#allocation8], 0 }
   0xb   :  { %20 = vsyncpa [#allocation8 + $0x1], 0 }
   0xc   :  { %21 = vsyncpa [#allocation11], 0 }
   0xd   :  { %22 = vsyncpa [#allocation14], 0 }
   0xe   :  { %23 = vsyncpa [#allocation17], 0 }
   0xf   :  { %24 = vsyncpa [#allocation6], 0 }
  0x10   :  { %26 = vsyncpa [#allocation6 + $0x1], 0  ;;  %s3149_s13 = smov 0   ;;  %s3151_s14 = smov 0  }
  0x11   :  { %s3153_s15 = smov 0   ;;  %s3155_s16 = smov 0  }
  0x12 LB: > { %3779 = sst [smem:[#allocation26_spill]] %s3071_s15  ;;  %s3173_s20 = sadd.s32 4294967295, %s3075_s16   ;;  %s3075_s16 = sphi %s3155_s16, %s3801_s16   ;;  %s3071_s15 = sphi %s3153_s15, %s3798_s15   ;;  %s3067_s14 = sphi %s3151_s14, %s3800_s14   ;;  %s3063_s13 = sphi %s3149_s13, %s3799_s13  }
  0x13   : > { %s3780_s2 = sld [smem:[#allocation29_spill]]  ;;  %p2203_p0 = scmp.ge.s32.totalorder %s3075_s16, 1 }
  0x14   : > { %p53_p1 = scmp.eq.s32.totalorder %s3173_s20, 0  ;;  %p283_p2 = scmp.lt.s32.totalorder %s3075_s16, 3 }
  0x15   : > { %s3077_s22 = smov [#allocation9]   ;;  %s3782_s3 = sld [smem:[#allocation30_spill]] }
  0x16   : > { %p3178_p3 = pnand %p2203_p0, %p283_p2  ;;  %s296_s23 = sshll.u32 %s3077_s22, 4  ;;  %s297_s23 = int_to_ptr.vmem [resolvable:$true] %s296_s23 }
  0x17   : > { %s3784_s6 = sld [smem:[#allocation32_spill]]  ;;  %s3078_s11 = smov [#allocation10]  }
  0x18   : > { %p2569_p4 = pneg %p3178_p3  ;;  %s310_s12 = sshll.u32 %s3078_s11, 4  ;;  %s311_s12 = int_to_ptr.vmem [resolvable:$true] %s310_s12 }
  0x19   : > { %s294_s19 = sshll.u32 %s3780_s2, 4  ;;  %s3769_s17 = smov 128   ;;  %s295_s19 = int_to_ptr.hbm [resolvable:$true] %s294_s19 }
  0x1a   : > { %p3190_p6 = pnand %p2569_p4, %p53_p1  ;;  %s3770_s18 = smov 8  }
  0x1b   : > { %s308_s26 = sshll.u32 %s3782_s3, 4  ;;  %s3785_s5 = sld [smem:[#allocation31_spill]]  ;;  %s309_s26 = int_to_ptr.hbm [resolvable:$true] %s308_s26 }
  0x1c   : > { %2572 = dma.hbm_to_vmem [thread:$0]  (!%p3190_p6), %s295_s19, 2048, %s297_s23, [#allocation8], %s3769_s17, %s3769_s17, %s3770_s18  }
  0x1d   : > { %s337_s30 = sshll.u32 %s3784_s6, 4  ;;  %s3081_s28 = smov [#allocation13]   ;;  %s338_s30 = int_to_ptr.hbm [resolvable:$true] %s337_s30 }
  0x1e   : > { %2575 = dma.hbm_to_vmem [thread:$0]  (!%p3190_p6), %s309_s26, 2048, %s311_s12, [#allocation11], %s3769_s17, %s3769_s17, %s3770_s18  }
  0x1f   : > { %s339_s29 = sshll.u32 %s3081_s28, 4  ;;  %s3082_s19 = smov [#allocation12]   ;;  %s340_s29 = int_to_ptr.vmem [resolvable:$true] %s339_s29 }
  0x20   : > { %2581 = dma.hbm_to_vmem [thread:$0]  (!%p3190_p6), %s338_s30, 2048, %s340_s29, [#allocation14], %s3769_s17, %s3769_s17, %s3770_s18  }
  0x21   : > { %s326_s25 = sshll.u32 %s3785_s5, 4  ;;  %s328_s23 = sshll.u32 %s3082_s19, 4  ;;  %s327_s25 = int_to_ptr.hbm [resolvable:$true] %s326_s25  ;;  %s329_s23 = int_to_ptr.vmem [resolvable:$true] %s328_s23 }
  0x22   : > { %s3786_s7 = sld [smem:[#allocation33_spill]]  ;;  %s3083_s30 = smov [#allocation15]  }
  0x23   : > { %2578 = dma.hbm_to_vmem [thread:$0]  (!%p3190_p6), %s327_s25, 32, %s329_s23, [#allocation11]  }
  0x24   : > { %s3787_s8 = sld [smem:[#allocation34_spill]]  ;;  %s354_s28 = sshll.u32 %s3083_s30, 4  ;;  %s355_s28 = int_to_ptr.vmem [resolvable:$true] %s354_s28 }
  0x25   : > { %s3084_s2 = smov [#allocation16]   ;;  %s3085_s29 = smov 64  }
  0x26   : > { %s365_s25 = sshll.u32 %s3084_s2, 4  ;;  %s3086_s19 = smov 4   ;;  %s366_s25 = int_to_ptr.vmem [resolvable:$true] %s365_s25 }
  0x27   : > { %s2202_s23 = sadd.s32 4294967294, %s3075_s16   ;;  %s3229_s11 = sadd.s32 1, %s3075_s16  }
  0x28   : > { %s352_s26 = sshll.u32 %s3786_s7, 4  ;;  %s36_s12 = ssub.s32 %s3075_s16, %s3229_s11  ;;  %s353_s26 = int_to_ptr.hbm [resolvable:$true] %s352_s26 }
  0x29   : > { %2584 = dma.hbm_to_vmem [thread:$0]  (!%p3190_p6), %s353_s26, 32, %s355_s28, [#allocation14]  }
  0x2a   : > { %s363_s24 = sshll.u32 %s3787_s8, 4  ;;  %s39_s22 = sadd.s32 1, %s3071_s15  ;;  %s364_s24 = int_to_ptr.hbm [resolvable:$true] %s363_s24 }
  0x2b   : > { %2587 = dma.hbm_to_vmem [thread:$0]  (!%p3190_p6), %s364_s24, 1024, %s366_s25, [#allocation17], %s3085_s29, %s3085_s29, %s3086_s19  }
  0x2c   : > { %p37_p7 = scmp.eq.s32.totalorder %s36_s12, 0  ;;  %p46_p8 = scmp.ne.s32.totalorder %s3071_s15, %s3067_s14 }
  0x2d   : > { %p47_p9 = scmp.eq.s32.totalorder %s3075_s16, 0  ;;  %p52_p10 = scmp.ne.s32.totalorder %s3067_s14, %s3063_s13 }
  0x2e   : > { %s3240_s26 = scalar_select %p37_p7, %s3071_s15, %s39_s22  }
  0x2f   : > { %p48_p11 = por %p47_p9, %p46_p8  ;;  %p3244_p12 = por %p53_p1, %p52_p10 }
  0x30   : > { %3788 = sst [smem:[#allocation27_spill]] %s3240_s26  ;;  %p270_p13 = scmp.eq.s32.totalorder %s3173_s20, 1 }
  0x31   : > { %p276_p0 = scmp.eq.s32.totalorder %s2202_s23, 1  ;;  %p2605_p2 = scmp.lt.s32.totalorder %s3075_s16, 2 }
  0x32   : > { %s3251_s24 = sand.u32 1, %s3071_s15   ;;  %p3253_p4 = por %p270_p13, %p46_p8 }
  0x33   : > { %p3257_p6 = por %p276_p0, %p52_p10  ;;  %s2535_s2 = smul.u32 24, %s3251_s24 }
  0x34   : > { %s2536_s25 = smul.u32 24, %s3075_s16  ;;  %p3263_p7 = pnand %p2605_p2, %p48_p11 }
  0x35   : > { %s404_s19 = sand.u32 1, %s3075_s16   ;;  %s3793_s0 = sld [smem:[#allocation28_spill]] }
  0x36   : > { %s386_s17 = scalar_lea.vmem [#allocation4], %s2535_s2  ;;  %s383_s5 = scalar_lea.sflag [#allocation5], %s3251_s24 }
  0x37   : > { %s394_s18 = sshll.u32 %s386_s17, 4  ;;  %p2933_p9 = pneg %p3263_p7  ;;  %s395_s18 = int_to_ptr.vmem [resolvable:$true] %s394_s18 }
  0x3b   : > { %s391_s22 = scalar_lea.hbm %s3793_s0, %s2536_s25  ;;  %s2936_s25 = scalar_lea.hbm %s3793_s0, 48 }
  0x3c   : > { %s392_s3 = sshll.u32 %s391_s22, 4  ;;  %s393_s3 = int_to_ptr.hbm [resolvable:$true] %s392_s3 }
  0x3d   : > { %s2929_s6 = sshra.s32 %s393_s3, 4  ;;  %s2930_s6 = int_to_ptr.hbm [resolvable:$true] %s2929_s6 }
  0x3e   : > { %s2931_s7 = scalar_lea.hbm %s2930_s6, 24  ;;  %p2937_p13 = scmp.lt.s32.totalorder %s2930_s6, %s3793_s0 }
  0x3f   : > { %p2932_p8 = scmp.ne.s32.totalorder %s2930_s6, %s2931_s7  ;;  %p2938_p0 = scmp.lt.s32.totalorder %s2936_s25, %s2931_s7 }
  0x41   : > { %p2934_p10 = pnand %p2933_p9, %p2932_p8  ;;  %p2939_p2 = por %p2938_p0, %p2937_p13 }
  0x43   : > { %p2935_p11 = pneg %p2934_p10 }
  0x45   : > { %p2940_p5 = pnand %p2939_p2, %p2935_p11 }
  0x47   : > { %2943 = shalt.err (!%p2940_p5)
}
  0x48   : > { %s3794_s23 = smov 8   ;;  %s3795_s12 = smov 128  }
  0x49   : > { %2591 = dma.hbm_to_vmem [thread:$0]  (!%p3263_p7), %s393_s3, 384, %s395_s18, %s383_s5, %s3795_s12, %s3795_s12, %s3794_s23  }
  0x4a   : > { %s410_s26 = scalar_lea.hbm %s3759_s1, %s3075_s16  ;;  %s407_s15 = scalar_lea.vmem [#allocation7], %s3251_s24 }
  0x4b   : > { %s414_s2 = sshll.u32 %s407_s15, 4  ;;  %s412_s6 = sshll.u32 %s410_s26, 4  ;;  %s415_s2 = int_to_ptr.vmem [resolvable:$true] %s414_s2  ;;  %s413_s6 = int_to_ptr.hbm [resolvable:$true] %s412_s6 }
  0x4c   : > { %s405_s7 = scalar_lea.sflag [#allocation8], %s404_s19  ;;  %s2959_s25 = sshra.s32 %s413_s6, 4  ;;  %s2960_s25 = int_to_ptr.hbm [resolvable:$true] %s2959_s25 }
  0x4d   : > { %s2961_s17 = scalar_lea.hbm %s2960_s25, 1  ;;  %s2966_s5 = scalar_lea.hbm %s3759_s1, 2 }
  0x4e   : > { %p2962_p5 = scmp.ne.s32.totalorder %s2960_s25, %s2961_s17  ;;  %p2967_p11 = scmp.lt.s32.totalorder %s2960_s25, %s3759_s1 }
  0x4f   : > { %p2968_p13 = scmp.lt.s32.totalorder %s2966_s5, %s2961_s17 }
  0x50   : > { %p2964_p8 = pnand %p2962_p5, %p2933_p9 }
  0x51   : > { %p2969_p0 = por %p2968_p13, %p2967_p11 }
  0x52   : > { %p2965_p10 = pneg %p2964_p8 }
  0x54   : > { %p2970_p2 = pnand %p2969_p0, %p2965_p10 }
  0x56   : > { %2973 = shalt.err (!%p2970_p2)
}
  0x57   : > { %2594 = dma.hbm_to_vmem [thread:$0]  (!%p3263_p7), %s413_s6, 16, %s415_s2, %s405_s7  }
  0x58   : > { %423 = sbr.rel (%p3178_p3) target bundleno = 1597 (0x63d), region = 60  ;;  %s3307_s15 = sand.u32 (!%p3178_p3), 1, %s3067_s14  }
  0x59   : > { %s2537_s0 = smul.u32 (!%p3178_p3), 24, %s3307_s15  ;;  %s426_s24 = scalar_lea.sflag (!%p3178_p3), [#allocation5], %s3307_s15 }
  0x5b   : > { %s3313_s19 = scalar_lea.vmem (!%p3178_p3), [#allocation4], %s2537_s0 }
  0x5d   : > { %3034 = dma.done.wait (%p3244_p12), %s426_s24, 384  }
  0x5e   : > { %3036 = vsyncadd (%p3244_p12), %s426_s24, 4294966912  ;;  %s435_s21 = sand.u32 1, %s3173_s20   ;;  %s438_s12 = scalar_lea.vmem [#allocation7], %s3307_s15 }
  0x5f   : > { %s436_s29 = scalar_lea.sflag [#allocation8], %s435_s21 }
  0x60   : > { %3038 = dma.done.wait (%p3244_p12), %s436_s29, 16  }
  0x61   : > { %3040 = vsyncadd (%p3244_p12), %s436_s29, 4294967280 }
  0x62   : > { %3042 = dma.done.wait (%p53_p1), [#allocation8], 2048  }
  0x63   : > { %3044 = vsyncadd (%p53_p1), [#allocation8], 4294965248 }
  0x64   : > { %3046 = dma.done.wait (%p53_p1), [#allocation11], 2080  }
  0x65   : > { %3048 = vsyncadd (%p53_p1), [#allocation11], 4294965216 }
  0x66   : > { %3050 = dma.done.wait (%p53_p1), [#allocation14], 2080  }
  0x67   : > { %3052 = vsyncadd (%p53_p1), [#allocation14], 4294965216 }
  0x68   : > { %3054 = dma.done.wait (%p53_p1), [#allocation17], 1024  }
  0x69   : > { %3056 = vsyncadd (%p53_p1), [#allocation17], 4294966272  ;;  %v2277_v0 = vld [vmem:[#allocation9 + $0x70] sm:$0xf]  ;;  %v2493_v1 = vld [vmem:[#allocation9 + $0x74] sm:$0xf0] }
  0x6a   : > { %v2492_v2 = vld [vmem:[#allocation9 + $0x74] sm:$0xf]  ;;  %v2278_v3 = vor.u32 %v2493_v1, %v2277_v0  ;;  %v2279_v4 = vld [vmem:[#allocation9 + $0x78] sm:$0xf0]  ;;  %v2269_v5 = vld [vmem:[#allocation9 + $0x60] sm:$0xf] }
  0x6b   : > { %v2491_v6 = vld [vmem:[#allocation9 + $0x64] sm:$0xf0]  ;;  %v2282_v7 = vor.u32 %v2492_v2, %v2279_v4  ;;  %v2490_v8 = vld [vmem:[#allocation9 + $0x64] sm:$0xf]  ;;  %v2271_v9 = vld [vmem:[#allocation9 + $0x68] sm:$0xf0] }
  0x6c   : > { %625 = vmatpush.bf16.msra.mxu0 %v2278_v3  ;;  %v2270_v10 = vor.u32 %v2491_v6, %v2269_v5  ;;  %v2261_v11 = vld [vmem:[#allocation9 + $0x50] sm:$0xf]  ;;  %v2274_v12 = vor.u32 %v2490_v8, %v2271_v9  ;;  %v2489_v13 = vld [vmem:[#allocation9 + $0x54] sm:$0xf0]  ;;  %v2508_v14 = vld [vmem:[#allocation10 + $0x74] sm:$0xf] }
  0x6d   : > { %639 = vmatpush.bf16.msra.mxu1 %v2282_v7  ;;  %v2343_v15 = vld [vmem:[#allocation10 + $0x78] sm:$0xf0]  ;;  %v2488_v16 = vld [vmem:[#allocation9 + $0x54] sm:$0xf]  ;;  %v2506_v19 = vld [vmem:[#allocation10 + $0x64] sm:$0xf]  ;;  %v2262_v21 = vor.u32 %v2489_v13, %v2261_v11 }
  0x6e   : > { %v2263_v17 = vld [vmem:[#allocation9 + $0x58] sm:$0xf0]  ;;  %v2346_v18 = vor.u32 %v2508_v14, %v2343_v15  ;;  %v2335_v20 = vld [vmem:[#allocation10 + $0x68] sm:$0xf0]  ;;  %v2253_v22 = vld [vmem:[#allocation9 + $0x40] sm:$0xf] }
  0x6f   : > { %v2338_v23 = vor.u32 %v2506_v19, %v2335_v20  ;;  %v2266_v24 = vor.u32 %v2488_v16, %v2263_v17  ;;  %v2487_v25 = vld [vmem:[#allocation9 + $0x44] sm:$0xf0]  ;;  %v2504_v26 = vld [vmem:[#allocation10 + $0x54] sm:$0xf]  ;;  %v2327_v27 = vld [vmem:[#allocation10 + $0x58] sm:$0xf0] }
  0x70   : > { %626 = vmatpush.bf16.msra.mxu0 %v2270_v10  ;;  %772 = vmatpush.bf16.msra.mxu3 %v2346_v18  ;;  %v2486_v28 = vld [vmem:[#allocation9 + $0x44] sm:$0xf]  ;;  %v2255_v29 = vld [vmem:[#allocation9 + $0x48] sm:$0xf0]  ;;  %v2254_v30 = vor.u32 %v2487_v25, %v2253_v22  ;;  %v2245_v31 = vld [vmem:[#allocation9 + $0x30] sm:$0xf]  ;;  %v2330_v32 = vor.u32 %v2504_v26, %v2327_v27 }
  0x71   : > { %640 = vmatpush.bf16.msra.mxu1 %v2274_v12  ;;  %v2258_v33 = vor.u32 %v2486_v28, %v2255_v29  ;;  %v2485_v34 = vld [vmem:[#allocation9 + $0x34] sm:$0xf0]  ;;  %v2502_v35 = vld [vmem:[#allocation10 + $0x44] sm:$0xf]  ;;  %v2319_v36 = vld [vmem:[#allocation10 + $0x48] sm:$0xf0] }
  0x72   : > { %v2484_v37 = vld [vmem:[#allocation9 + $0x34] sm:$0xf]  ;;  %v2247_v38 = vld [vmem:[#allocation9 + $0x38] sm:$0xf0]  ;;  %v2246_v39 = vor.u32 %v2485_v34, %v2245_v31  ;;  %v2237_v40 = vld [vmem:[#allocation9 + $0x20] sm:$0xf]  ;;  %v2322_v41 = vor.u32 %v2502_v35, %v2319_v36 }
  0x73   : > { %v2250_v42 = vor.u32 %v2484_v37, %v2247_v38  ;;  %v2483_v43 = vld [vmem:[#allocation9 + $0x24] sm:$0xf0]  ;;  %v2500_v44 = vld [vmem:[#allocation10 + $0x34] sm:$0xf]  ;;  %v2311_v45 = vld [vmem:[#allocation10 + $0x38] sm:$0xf0] }
  0x74   : > { %627 = vmatpush.bf16.msra.mxu0 %v2262_v21  ;;  %773 = vmatpush.bf16.msra.mxu3 %v2338_v23  ;;  %v2482_v46 = vld [vmem:[#allocation9 + $0x24] sm:$0xf]  ;;  %v2239_v47 = vld [vmem:[#allocation9 + $0x28] sm:$0xf0]  ;;  %v2229_v48 = vld [vmem:[#allocation9 + $0x10] sm:$0xf]  ;;  %v2238_v50 = vor.u32 %v2483_v43, %v2237_v40  ;;  %v2314_v52 = vor.u32 %v2500_v44, %v2311_v45 }
  0x75   : > { %641 = vmatpush.bf16.msra.mxu1 %v2266_v24  ;;  %v2481_v49 = vld [vmem:[#allocation9 + $0x14] sm:$0xf0]  ;;  %v2480_v51 = vld [vmem:[#allocation9 + $0x14] sm:$0xf]  ;;  %v2498_v53 = vld [vmem:[#allocation10 + $0x24] sm:$0xf]  ;;  %v2242_v56 = vor.u32 %v2482_v46, %v2239_v47 }
  0x76   : > { %v2303_v54 = vld [vmem:[#allocation10 + $0x28] sm:$0xf0]  ;;  %v2341_v55 = vld [vmem:[#allocation10 + $0x70] sm:$0xf]  ;;  %v2509_v59 = vld [vmem:[#allocation10 + $0x74] sm:$0xf0]  ;;  %v2230_v0 = vor.u32 %v2481_v49, %v2229_v48 }
  0x77   : > { %v511_v57 = vld [vmem:[%s3313_s19] sm:$0xff]  ;;  %v512_v58 = vld [vmem:[%s3313_s19 + $0x8] sm:$0xff]  ;;  %v2342_v61 = vor.u32 %v2509_v59, %v2341_v55  ;;  %v2333_v62 = vld [vmem:[#allocation10 + $0x60] sm:$0xf]  ;;  %v2306_v5 = vor.u32 %v2498_v53, %v2303_v54  ;;  %s3087_s8 = smov 96   ;;  %s3088_s26 = smov 64  }
  0x78   : > { %628 = vmatpush.bf16.msra.mxu0 %v2254_v30  ;;  %774 = vmatpush.bf16.msra.mxu3 %v2330_v32  ;;  %v2231_v60 = vld [vmem:[#allocation9 + $0x18] sm:$0xf0]  ;;  %v2507_v63 = vld [vmem:[#allocation10 + $0x64] sm:$0xf0]  ;;  %v2221_v1 = vld [vmem:[#allocation9] sm:$0xf]  ;;  %v514_v6 = vpack.c.bf16 %v511_v57, %v511_v57  ;;  %v515_v7 = vpack.c.bf16 %v512_v58, %v512_v58 }
  0x79   : > { %642 = vmatpush.bf16.msra.mxu1 %v2258_v33  ;;  %v2479_v2 = vld [vmem:[#allocation9 + $0x4] sm:$0xf0]  ;;  %v2478_v3 = vld [vmem:[#allocation9 + $0x4] sm:$0xf]  ;;  %v2223_v4 = vld [vmem:[#allocation9 + $0x8] sm:$0xf0]  ;;  %v2234_v8 = vor.u32 %v2480_v51, %v2231_v60  ;;  %759 = vmatpush.bf16.msra.mxu2 %v2342_v61  ;;  %v2334_v12 = vor.u32 %v2507_v63, %v2333_v62 }
  0x7a   : > { %v2405_v9 = vld [vmem:[#allocation13 + $0x70] sm:$0xf]  ;;  %v2295_v11 = vld [vmem:[#allocation10 + $0x18] sm:$0xf0]  ;;  %v2505_v15 = vld [vmem:[#allocation10 + $0x54] sm:$0xf0]  ;;  %v2222_v16 = vor.u32 %v2479_v2, %v2221_v1  ;;  %v541_v17 = vunpack.c.l.b16 %v514_v6  ;;  %v542_v18 = vunpack.c.l.b16 %v515_v7  ;;  %v2226_v20 = vor.u32 %v2478_v3, %v2223_v4 }
  0x7b   : > { %v2496_v10 = vld [vmem:[#allocation10 + $0x14] sm:$0xf]  ;;  %v2525_v13 = vld [vmem:[#allocation13 + $0x74] sm:$0xf0]  ;;  %v2325_v14 = vld [vmem:[#allocation10 + $0x50] sm:$0xf] }
  0x7c   : > { %629 = vmatpush.bf16.msra.mxu0 %v2246_v39  ;;  %775 = vmatpush.bf16.msra.mxu3 %v2322_v41  ;;  %v2298_v19 = vor.u32 %v2496_v10, %v2295_v11  ;;  %v2406_v21 = vor.u32 %v2525_v13, %v2405_v9  ;;  %v2494_v22 = vld [vmem:[#allocation10 + $0x4] sm:$0xf]  ;;  %v2287_v23 = vld [vmem:[#allocation10 + $0x8] sm:$0xf0]  ;;  %v2326_v26 = vor.u32 %v2505_v15, %v2325_v14  ;;  %v2317_v27 = vld [vmem:[#allocation10 + $0x40] sm:$0xf] }
  0x7d   : > { %643 = vmatpush.bf16.msra.mxu1 %v2250_v42  ;;  %760 = vmatpush.bf16.msra.mxu2 %v2334_v12  ;;  %v2397_v24 = vld [vmem:[#allocation13 + $0x60] sm:$0xf]  ;;  %v2523_v25 = vld [vmem:[#allocation13 + $0x64] sm:$0xf0]  ;;  %v3343_v29 = vpack.c.b16 %v542_v18, %v541_v17  ;;  %v2290_v30 = vor.u32 %v2494_v22, %v2287_v23  ;;  %v2389_v33 = vld [vmem:[#allocation13 + $0x50] sm:$0xf] }
  0x7e   : > { %v2503_v28 = vld [vmem:[#allocation10 + $0x44] sm:$0xf0]  ;;  %v513_v31 = vld [vmem:[%s3313_s19 + $0x10] sm:$0xff]  ;;  %v2398_v32 = vor.u32 %v2523_v25, %v2397_v24  ;;  %v2309_v37 = vld [vmem:[#allocation10 + $0x30] sm:$0xf]  ;;  %vm951_vm0 = vcmask 261120  }
  0x7f   : > { %v2521_v34 = vld [vmem:[#allocation13 + $0x54] sm:$0xf0]  ;;  %v2318_v35 = vor.u32 %v2503_v28, %v2317_v27  ;;  %v516_v36 = vpack.c.bf16 %v513_v31, %v513_v31  ;;  %v2381_v40 = vld [vmem:[#allocation13 + $0x40] sm:$0xf]  ;;  %v2519_v41 = vld [vmem:[#allocation13 + $0x44] sm:$0xf0] }
  0x80   : > { %630 = vmatpush.bf16.msra.mxu0 %v2238_v50  ;;  %776 = vmatpush.bf16.msra.mxu3 %v2314_v52  ;;  %v2501_v38 = vld [vmem:[#allocation10 + $0x34] sm:$0xf0]  ;;  %v2390_v39 = vor.u32 %v2521_v34, %v2389_v33  ;;  %v2301_v43 = vld [vmem:[#allocation10 + $0x20] sm:$0xf]  ;;  %v2499_v44 = vld [vmem:[#allocation10 + $0x24] sm:$0xf0]  ;;  %v2382_v45 = vor.u32 %v2519_v41, %v2381_v40 }
  0x81   : > { %644 = vmatpush.bf16.msra.mxu1 %v2242_v56  ;;  %761 = vmatpush.bf16.msra.mxu2 %v2326_v26  ;;  %v2310_v42 = vor.u32 %v2501_v38, %v2309_v37  ;;  %v2373_v46 = vld [vmem:[#allocation13 + $0x30] sm:$0xf]  ;;  %v2517_v47 = vld [vmem:[#allocation13 + $0x34] sm:$0xf0]  ;;  %v2302_v48 = vor.u32 %v2499_v44, %v2301_v43  ;;  %v2365_v52 = vld [vmem:[#allocation13 + $0x20] sm:$0xf]  ;;  %v810_v1 = vunpack.c.l.b16 %v516_v36 }
  0x82   : > { %v2293_v49 = vld [vmem:[#allocation10 + $0x10] sm:$0xf]  ;;  %v2497_v50 = vld [vmem:[#allocation10 + $0x14] sm:$0xf0]  ;;  %v2374_v51 = vor.u32 %v2517_v47, %v2373_v46  ;;  %v2515_v53 = vld [vmem:[#allocation13 + $0x24] sm:$0xf0] }
  0x83   : > { %v2294_v54 = vor.u32 %v2497_v50, %v2293_v49  ;;  %v2285_v55 = vld [vmem:[#allocation10] sm:$0xf]  ;;  %v2495_v56 = vld [vmem:[#allocation10 + $0x4] sm:$0xf0]  ;;  %v2366_v57 = vor.u32 %v2515_v53, %v2365_v52  ;;  %v2357_v58 = vld [vmem:[#allocation13 + $0x10] sm:$0xf]  ;;  %v3349_v2 = vpack.c.b16 %v810_v1, %v810_v1 }
  0x84   : > { %631 = vmatpush.bf16.msra.mxu0 %v2230_v0  ;;  %777 = vmatpush.bf16.msra.mxu3 %v2306_v5  ;;  %v2513_v59 = vld [vmem:[#allocation13 + $0x14] sm:$0xf0]  ;;  %v2286_v60 = vor.u32 %v2495_v56, %v2285_v55  ;;  %v2349_v62 = vld [vmem:[#allocation13] sm:$0xf]  ;;  %v2511_v63 = vld [vmem:[#allocation13 + $0x4] sm:$0xf0] }
  0x85   : > { %645 = vmatpush.bf16.msra.mxu1 %v2234_v8  ;;  %762 = vmatpush.bf16.msra.mxu2 %v2318_v35  ;;  %v2358_v61 = vor.u32 %v2513_v59, %v2357_v58  ;;  %v2350_v0 = vor.u32 %v2511_v63, %v2349_v62  ;;  %v533_v3 = vld [vmem:[%s3762_s4] sm:$0x3]  ;;  %v673_v6 = vld [vmem:[#allocation12] sm:$0x3]  ;;  %s3089_s2 = smov 32   ;;  %s3090_s6 = smov 112  }
  0x86   : > { %v536_v5 = vperm.slane %v533_v3, 1  ;;  %v676_v10 = vperm.slane %v673_v6, 1  ;;  %v535_v17 = vperm.slane %v533_v3, 0  ;;  %v675_v35 = vperm.slane %v673_v6, 0  ;;  %v2524_v47 = vld [vmem:[#allocation13 + $0x74] sm:$0xf] }
  0x87   : > { %v2522_v50 = vld [vmem:[#allocation13 + $0x64] sm:$0xf]  ;;  %v2520_v52 = vld [vmem:[#allocation13 + $0x54] sm:$0xf]  ;;  %v2367_v63 = vld [vmem:[#allocation13 + $0x28] sm:$0xf0] }
  0x88   : > { %632 = vmatpush.bf16.msra.mxu0 %v2222_v16  ;;  %778 = vmatpush.bf16.msra.mxu3 %v2298_v19  ;;  %v2518_v56 = vld [vmem:[#allocation13 + $0x44] sm:$0xf]  ;;  %v2516_v58 = vld [vmem:[#allocation13 + $0x34] sm:$0xf]  ;;  %v2359_v3 = vld [vmem:[#allocation13 + $0x18] sm:$0xf0] }
  0x89   : > { %646 = vmatpush.bf16.msra.mxu1 %v2226_v20  ;;  %763 = vmatpush.bf16.msra.mxu2 %v2310_v42  ;;  %v2514_v62 = vld [vmem:[#allocation13 + $0x24] sm:$0xf]  ;;  %vm1024_vm1 = vcmask 130048   ;;  %vm1034_vm2 = vcmask 64512   ;;  %vm1096_vm3 = vcmask 1043456   ;;  %vm1393_vm4 = vcmask 523520  }
  0x8a   : > { %v2370_v1 = vor.u32 %v2514_v62, %v2367_v63  ;;  %v2510_v6 = vld [vmem:[#allocation13 + $0x4] sm:$0xf]  ;;  %vm1627_vm5 = vcmask 785920   ;;  %vm1861_vm6 = vcmask 1048320   ;;  %s3719_s23 = scalar_lea.vmem [#allocation18], %s2537_s0  ;;  %s2538_s0 = smul.u32 24, %s3173_s20 }
  0x8b   : > { %633 = vmatmul.bf16.vlgmr.msra.gmra.mxu0 %v3343_v29  ;;  %s2050_s29 = sshll.u32 %s3719_s23, 4  ;;  %s2038_s20 = scalar_lea.sflag [#allocation6], %s3307_s15  ;;  %s2051_s29 = int_to_ptr.vmem [resolvable:$true] %s2050_s29 }
  0x8c   : > { %893 = vmatpush.bf16.msrb.mxu0 %v2406_v21  ;;  %647 = vmatmul.bf16.vlgmr.msra.gmra.mxu1 %v3343_v29  ;;  %v3360_v21 = vld [vmem:[#allocation15] sm:$0x3]  ;;  %s2049_s21 = scalar_lea.hbm %s3768_s10, %s2538_s0 }
  0x8d   : > { %779 = vmatpush.bf16.msra.mxu3 %v2290_v30  ;;  %764 = vmatpush.bf16.msra.mxu2 %v2302_v48  ;;  %v805_v25 = vperm.slane %v3360_v21, 0  ;;  %v2407_v48 = vld [vmem:[#allocation13 + $0x78] sm:$0xf0] }
  0x8e   : > { %v2410_v49 = vor.u32 %v2524_v47, %v2407_v48 }
  0x90   : > { %894 = vmatpush.bf16.msrb.mxu0 %v2398_v32  ;;  %780 = vmatmul.bf16.vlgmr.msra.gmra.mxu3 %v516_v36 }
  0x91   : > { %765 = vmatpush.bf16.msra.mxu2 %v2294_v54  ;;  %911 = vmatpush.bf16.msrb.mxu1 %v2410_v49  ;;  %v2391_v54 = vld [vmem:[#allocation13 + $0x58] sm:$0xf0] }
  0x92   : > { %v2394_v55 = vor.u32 %v2520_v52, %v2391_v54 }
  0x94   : > { %895 = vmatpush.bf16.msrb.mxu0 %v2390_v39 }
  0x95   : > { %766 = vmatpush.bf16.msra.mxu2 %v2286_v60  ;;  %v2375_v60 = vld [vmem:[#allocation13 + $0x38] sm:$0xf0] }
  0x98   : > { %896 = vmatpush.bf16.msrb.mxu0 %v2382_v45  ;;  %767 = vmatmul.bf16.vlgmr.msra.gmra.mxu2 %v516_v36 }
  0x9c   : > { %897 = vmatpush.bf16.msrb.mxu0 %v2374_v51  ;;  %v2399_v51 = vld [vmem:[#allocation13 + $0x68] sm:$0xf0] }
  0x9d   : > { %v2402_v53 = vor.u32 %v2522_v50, %v2399_v51 }
  0x9f   : > { %912 = vmatpush.bf16.msrb.mxu1 %v2402_v53 }
  0xa0   : > { %898 = vmatpush.bf16.msrb.mxu0 %v2366_v57  ;;  %v2383_v57 = vld [vmem:[#allocation13 + $0x48] sm:$0xf0] }
  0xa1   : > { %v2386_v59 = vor.u32 %v2518_v56, %v2383_v57 }
  0xa3   : > { %913 = vmatpush.bf16.msrb.mxu1 %v2394_v55 }
  0xa4   : > { %899 = vmatpush.bf16.msrb.mxu0 %v2358_v61  ;;  %v2378_v61 = vor.u32 %v2516_v58, %v2375_v60  ;;  %v806_v58 = vperm.slane %v3360_v21, 1 }
  0xa7   : > { %914 = vmatpush.bf16.msrb.mxu1 %v2386_v59 }
  0xa8   : > { %900 = vmatpush.bf16.msrb.mxu0 %v2350_v0  ;;  %v2512_v0 = vld [vmem:[#allocation13 + $0x14] sm:$0xf] }
  0xab   : > { %901 = vmatmul.bf16.vlgmr.msrb.gmra.mxu0 %v3343_v29  ;;  %915 = vmatpush.bf16.msrb.mxu1 %v2378_v61 }
  0xaf   : > { %916 = vmatpush.bf16.msrb.mxu1 %v2370_v1 }
  0xbb   : > { %906 = vmatmul.bf16.gmra.mxu0 %v3349_v2 }
 0x108   : > { %v634_v12 = vpop.f32.mrf.mxu0 }
 0x109   : > { %v648_v4 = vpop.f32.mrf.mxu1  ;;  %v635_v19 = vadd.f32 %v634_v12, %v535_v17 }
 0x10a   : > { %v649_v7 = vadd.f32 %v648_v4, %v536_v5  ;;  %v3389_v4 = vld [vmem:[%s438_s12] ss:$0 sm:$0xff]  ;;  %s2052_s12 = sshll.u32 %s2049_s21, 4  ;;  %s2053_s12 = int_to_ptr.hbm [resolvable:$true] %s2052_s12 }
 0x10b   : > { %s3003_s27 = sshra.s32 %s2053_s12, 4  ;;  %s3004_s27 = int_to_ptr.hbm [resolvable:$true] %s3003_s27 }
 0x10c   : > { %s3005_s22 = scalar_lea.hbm %s3004_s27, 24  ;;  %p3010_p7 = scmp.lt.s32.totalorder %s3004_s27, %s3768_s10 }
 0x10d   : > { %p3006_p1 = scmp.ne.s32.totalorder %s3004_s27, %s3005_s22 }
 0x10f   : > { %p3007_p3 = pnand %p3006_p1, %p3253_p4 }
 0x110   : > { %v636_v18 = vpop.f32.mrf.mxu0 }
 0x111   : > { %v650_v8 = vpop.f32.mrf.mxu1  ;;  %v637_v20 = vadd.f32 %v636_v18, %v535_v17  ;;  %p3008_p12 = pneg %p3007_p3 }
 0x112   : > { %v651_v9 = vadd.f32 %v650_v8, %v536_v5  ;;  %v2362_v5 = vor.u32 %v2512_v0, %v2359_v3 }
 0x113   : > { %v781_v11 = vpop.f32.mrf.mxu3  ;;  %v939_v22 = vpack.c.bf16 %v637_v20, %v635_v19 }
 0x114   : > { %v3355_v13 = vpack.c.bf16 %v651_v9, %v649_v7  ;;  %v782_v14 = vadd.f32 %v781_v11, %v676_v10  ;;  %917 = vmatpush.bf16.msrb.mxu1 %v2362_v5  ;;  %v2351_v7 = vld [vmem:[#allocation13 + $0x8] sm:$0xf0] }
 0x115   : > { %v2354_v8 = vor.u32 %v2510_v6, %v2351_v7 }
 0x116   : > { %1210 = vrot.lane.b32.xlu2 %v3355_v13, %s3087_s8  ;;  %v945_v15 = vpack.c.bf16 %v782_v14, %v782_v14 }
 0x118   : > { %918 = vmatpush.bf16.msrb.mxu1 %v2354_v8 }
 0x11b   : > { %v783_v16 = vpop.f32.mrf.mxu3  ;;  %v768_v23 = vpop.f32.mrf.mxu2  ;;  %919 = vmatmul.bf16.vlgmr.msrb.gmra.mxu1 %v3343_v29 }
 0x11c   : > { %v769_v40 = vadd.f32 %v768_v23, %v675_v35 }
 0x11e   : > { %1212 = vrot.lane.b32.xlu2 %v945_v15, %s3087_s8  ;;  %v940_v43 = vpack.c.bf16 %v769_v40, %v769_v40 }
 0x123   : > { %v770_v27 = vpop.f32.mrf.mxu2 }
 0x126   : > { %1409 = vrot.lane.b32.xlu2 %v939_v22, %s3088_s26 }
 0x128   : > { %v902_v24 = vpop.f32.mrf.mxu0 }
 0x129   : > { %v903_v26 = vadd.f32 %v902_v24, %v805_v25 }
 0x12b   : > { %v929_v30 = vpack.c.bf16 %v903_v26, %v903_v26  ;;  %924 = vmatmul.bf16.gmra.mxu1 %v3349_v2 }
 0x12d   : > { %v948_v33 = vunpack.c.l.b16 %v929_v30 }
 0x12e   : > { %1452 = vrot.lane.b32.xlu2 %v945_v15, %s3088_s26 }
 0x130   : > { %v904_v28 = vpop.f32.mrf.mxu0 }
 0x131   : > { %v905_v31 = vadd.f32 %v904_v28, %v805_v25 }
 0x133   : > { %v930_v32 = vpack.c.bf16 %v905_v31, %v905_v31 }
 0x135   : > { %v949_v34 = vunpack.c.l.b16 %v930_v32 }
 0x136   : > { %1643 = vrot.lane.b32.xlu2 %v939_v22, %s3089_s2 }
 0x137   : > { %v950_v36 = vpack.c.b16 %v949_v34, %v948_v33 }
 0x138   : > { %v907_v37 = vpop.f32.mrf.mxu0 }
 0x139   : > { %v908_v38 = vadd.f32 %v907_v37, %v805_v25  ;;  %1173 = vrot.lane.b32.xlu0 %v950_v36, %s3087_s8  ;;  %v959_v39 = vsel %vm951_vm0, %v950_v36, 0 }
 0x13a   : > { %968 = vmatpush.bf16.xpose.msrb.mxu2 %v959_v39 }
 0x13b   : > { %v931_v41 = vpack.c.bf16 %v908_v38, %v908_v38 }
 0x13d   : > { %v1215_v42 = vunpack.c.l.b16 %v931_v41  ;;  %v995_v44 = vsel %vm951_vm0, %v931_v41, 0 }
 0x13e   : > { %1004 = vmatpush.bf16.xpose.msrb.mxu3 %v995_v44  ;;  %1686 = vrot.lane.b32.xlu2 %v945_v15, %s3089_s2 }
 0x13f   : > { %v1216_v45 = vpack.c.b16 %v1215_v42, %v1215_v42 }
 0x140   : > { %v909_v46 = vpop.f32.mrf.mxu0 }
 0x141   : > { %1217 = vrot.lane.b32.xlu1 %v1216_v45, %s3087_s8  ;;  %1171 = vrot.lane.b32.xlu0 %v940_v43, %s3087_s8 }
 0x142   : > { %2411 = vmatmul.msk.bf16.vlgmr.msrb.gmra.mxu2 %vm951_vm0, %v939_v22 }
 0x145   : > { %2413 = vmatmul.msk.bf16.vlgmr.msrb.gmra.mxu3 %vm951_vm0, %v3355_v13 }
 0x149   : > { %1413 = vrot.lane.b32.xlu0 %v950_v36, %s3088_s26  ;;  %1169 = vrot.lane.b32.xlu1 %v939_v22, %s3087_s8 }
 0x151   : > { %1450 = vrot.lane.b32.xlu0 %v3355_v13, %s3088_s26  ;;  %1454 = vrot.lane.b32.xlu1 %v1216_v45, %s3088_s26 }
 0x152   : > { %2412 = vmatmul.msk.bf16.gmra.mxu2 %vm951_vm0, %v940_v43 }
 0x155   : > { %2414 = vmatmul.msk.bf16.gmra.mxu3 %vm951_vm0, %v945_v15 }
 0x159   : > { %1647 = vrot.lane.b32.xlu0 %v950_v36, %s3089_s2  ;;  %1411 = vrot.lane.b32.xlu1 %v940_v43, %s3088_s26 }
 0x161   : > { %1684 = vrot.lane.b32.xlu0 %v3355_v13, %s3089_s2  ;;  %1688 = vrot.lane.b32.xlu1 %v1216_v45, %s3089_s2 }
 0x169   : > { %1018 = vrot.lane.b32.xlu0 %v3389_v4, %s3090_s6  ;;  %1645 = vrot.lane.b32.xlu1 %v940_v43, %s3089_s2 }
 0x170   : > { %v1211_v14 = vpop.permute.xlu2 %1210 }
 0x178   : > { %v1213_v29 = vpop.permute.xlu2 %1212 }
 0x180   : > { %v1410_v25 = vpop.permute.xlu2 %1409 }
 0x188   : > { %v1453_v55 = vpop.permute.xlu2 %1452 }
 0x190   : > { %v1644_v57 = vpop.permute.xlu2 %1643 }
 0x198   : > { %v920_v59 = vpop.f32.mrf.mxu1 }
 0x199   : > { %v921_v60 = vadd.f32 %v920_v59, %v806_v58 }
 0x19b   : > { %v932_v61 = vpack.c.bf16 %v921_v60, %v921_v60 }
 0x19d   : > { %v1120_v0 = vunpack.c.l.b16 %v932_v61 }
 0x1a0   : > { %v922_v62 = vpop.f32.mrf.mxu1 }
 0x1a1   : > { %v923_v63 = vadd.f32 %v922_v62, %v806_v58 }
 0x1a3   : > { %v933_v1 = vpack.c.bf16 %v923_v63, %v923_v63 }
 0x1a5   : > { %v1121_v5 = vunpack.c.l.b16 %v933_v1 }
 0x1a7   : > { %v3444_v6 = vpack.c.b16 %v1121_v5, %v1120_v0 }
 0x1a8   : > { %v925_v7 = vpop.f32.mrf.mxu1 }
 0x1a9   : > { %v926_v21 = vadd.f32 %v925_v7, %v806_v58  ;;  %1137 = vmatpush.bf16.msra.mxu3 %v3444_v6 }
 0x1ab   : > { %v1174_v9 = vpop.permute.xlu0 %1173  ;;  %v934_v8 = vpack.c.bf16 %v926_v21, %v926_v21 }
 0x1ac   : > { %v1182_v10 = vsel %vm951_vm0, %v1174_v9, 0 }
 0x1ad   : > { %1191 = vmatpush.bf16.xpose.msra.mxu0 %v1182_v10  ;;  %2534 = vmatpush.bf16.xpose.msra.mxu1 %v1182_v10  ;;  %v1098_v9 = vsel %vm1096_vm3, %v934_v8, 0 }
 0x1ae   : > { %1107 = vmatpush.bf16.msra.mxu2 %v1098_v9 }
 0x1b0   : > { %v927_v10 = vpop.f32.mrf.mxu1 }
 0x1b3   : > { %v1218_v11 = vpop.permute.xlu1 %1217  ;;  %v1172_v12 = vpop.permute.xlu0 %1171 }
 0x1b4   : > { %v1226_v13 = vsel %vm951_vm0, %v1218_v11, 0  ;;  %2420 = vmatmul.msk.bf16.vlgmr.msra.gmra.mxu1 %vm951_vm0, %v1172_v12  ;;  %v1687_v11 = vpop.permute.xlu2 %1686 }
 0x1b5   : > { %1235 = vmatpush.bf16.xpose.msrb.mxu1 %v1226_v13 }
 0x1bb   : > { %v1414_v15 = vpop.permute.xlu0 %1413  ;;  %v1170_v16 = vpop.permute.xlu1 %1169 }
 0x1bc   : > { %v1422_v17 = vsel %vm951_vm0, %v1414_v15, 0  ;;  %2419 = vmatmul.msk.bf16.vlgmr.msra.gmra.mxu0 %vm951_vm0, %v1170_v16 }
 0x1bd   : > { %1431 = vmatpush.bf16.xpose.msrb.mxu0 %v1422_v17 }
 0x1c3   : > { %v1451_v2 = vpop.permute.xlu0 %1450  ;;  %v1455_v18 = vpop.permute.xlu1 %1454 }
 0x1c4   : > { %v1463_v19 = vsel %vm951_vm0, %v1455_v18, 0  ;;  %2421 = vmatmul.msk.bf16.vlgmr.msrb.gmra.mxu1 %vm951_vm0, %v1211_v14 }
 0x1c5   : > { %v970_v20 = vpop.f32.mrf.mxu2  ;;  %1472 = vmatpush.bf16.xpose.msra.mxu1 %v1463_v19 }
 0x1c6   : > { %v979_v22 = vmul.f32 0.17677669, %v970_v20 }
 0x1c8   : > { %v3403_v23 = vadd.f32 %v3389_v4, %v979_v22  ;;  %v1006_v24 = vpop.f32.mrf.mxu3 }
 0x1c9   : > { %v1015_v41 = vmul.f32 0.17677669, %v1006_v24 }
 0x1ca   : > { %v1025_v26 = vsel %vm1024_vm1, %v3403_v23, -inf }
 0x1cb   : > { %1026 = vmax.xlane.f32.xlu1 %v1025_v26  ;;  %v1648_v27 = vpop.permute.xlu0 %1647  ;;  %v1412_v28 = vpop.permute.xlu1 %1411 }
 0x1cc   : > { %v1656_v30 = vsel %vm951_vm0, %v1648_v27, 0  ;;  %2427 = vmatmul.msk.bf16.vlgmr.msrb.gmra.mxu0 %vm951_vm0, %v1410_v25 }
 0x1cd   : > { %v972_v31 = vpop.f32.mrf.mxu2  ;;  %1665 = vmatpush.bf16.xpose.msra.mxu0 %v1656_v30 }
 0x1ce   : > { %v980_v32 = vmul.f32 0.17677669, %v972_v31 }
 0x1d0   : > { %v3410_v33 = vadd.f32 %v3389_v4, %v980_v32  ;;  %v1008_v34 = vpop.f32.mrf.mxu3 }
 0x1d1   : > { %v1016_v42 = vmul.f32 0.17677669, %v1008_v34 }
 0x1d2   : > { %v1028_v35 = vsel %vm1024_vm1, %v3410_v33, -inf }
 0x1d3   : > { %1029 = vmax.xlane.f32.xlu2 %v1028_v35  ;;  %v1685_v36 = vpop.permute.xlu0 %1684  ;;  %v1689_v37 = vpop.permute.xlu1 %1688 }
 0x1d4   : > { %v1697_v38 = vsel %vm951_vm0, %v1689_v37, 0  ;;  %2422 = vmatmul.msk.bf16.gmra.mxu1 %vm951_vm0, %v1213_v29 }
 0x1d5   : > { %1706 = vmatpush.bf16.xpose.msrb.mxu1 %v1697_v38  ;;  %v975_v39 = vpop.f32.mrf.mxu2 }
 0x1d6   : > { %v981_v40 = vmul.f32 0.17677669, %v975_v39 }
 0x1d8   : > { %v1011_v43 = vpop.f32.mrf.mxu3  ;;  %v3417_v44 = vadd.f32 %v3389_v4, %v981_v40 }
 0x1d9   : > { %v1017_v49 = vmul.f32 0.17677669, %v1011_v43 }
 0x1da   : > { %v1031_v45 = vsel %vm1024_vm1, %v3417_v44, -inf }
 0x1db   : > { %v3421_v46 = vpop.permute.xlu0 %1018  ;;  %1032 = vmax.xlane.f32.xlu1 %v1031_v45  ;;  %v1646_v3 = vpop.permute.xlu1 %1645 }
 0x1dc   : > { %2428 = vmatmul.msk.bf16.gmra.mxu0 %vm951_vm0, %v1412_v28  ;;  %v3425_v47 = vadd.f32 %v3421_v46, %v1015_v41  ;;  %v3428_v48 = vadd.f32 %v3421_v46, %v1016_v42  ;;  %v3435_v53 = vadd.f32 %v3421_v46, %v1017_v49  ;;  %v1317_v41 = vunpack.c.l.b16 %v934_v8 }
 0x1dd   : > { %v977_v50 = vpop.f32.mrf.mxu2 }
 0x1de   : > { %v1035_v51 = vsel %vm1034_vm2, %v3425_v47, -inf  ;;  %v1038_v52 = vsel %vm1034_vm2, %v3428_v48, -inf  ;;  %v1041_v56 = vsel %vm1034_vm2, %v3435_v53, -inf }
 0x1df   : > { %1036 = vmax.xlane.f32.xlu0 %v1035_v51  ;;  %1039 = vmax.xlane.f32.xlu2 %v1038_v52 }
 0x1e0   : > { %v1013_v54 = vpop.f32.mrf.mxu3 }
 0x1e4   : > { %2429 = vmatmul.msk.bf16.vlgmr.msra.gmra.mxu1 %vm951_vm0, %v1451_v2 }
 0x1e7   : > { %1042 = vmax.xlane.f32.xlu2 %v1041_v56 }
 0x1ec   : > { %2435 = vmatmul.msk.bf16.vlgmr.msra.gmra.mxu0 %vm951_vm0, %v1644_v57 }
 0x1f4   : > { %2430 = vmatmul.msk.bf16.gmra.mxu1 %vm951_vm0, %v1453_v55  ;;  %v3484_v55 = vpack.c.b16 %v1317_v41, %v1317_v41 }
 0x1fc   : > { %2436 = vmatmul.msk.bf16.gmra.mxu0 %vm951_vm0, %v1646_v3 }
 0x1ff   : > { %1348 = vrot.lane.b32.xlu2 %v3444_v6, %s3087_s8 }
 0x204   : > { %2437 = vmatmul.msk.bf16.vlgmr.msrb.gmra.mxu1 %vm951_vm0, %v1685_v36 }
 0x214   : > { %2438 = vmatmul.msk.bf16.gmra.mxu1 %vm951_vm0, %v1687_v11 }
 0x231   : > { %v1198_v12 = vpop.f32.mrf.mxu1 }
 0x232   : > { %v1204_v16 = vmul.f32 0.17677669, %v1198_v12 }
 0x234   : > { %v3458_v2 = vadd.f32 %v3389_v4, %v1204_v16 }
 0x236   : > { %v1258_v24 = vsel %vm1024_vm1, %v3458_v2, -inf }
 0x239   : > { %v1193_v13 = vpop.f32.mrf.mxu0  ;;  %v1200_v14 = vpop.f32.mrf.mxu1 }
 0x23a   : > { %v1202_v15 = vmul.f32 0.17677669, %v1193_v13 }
 0x23c   : > { %v3453_v17 = vadd.f32 %v3389_v4, %v1202_v15 }
 0x23e   : > { %v1252_v29 = vsel %vm1024_vm1, %v3453_v17, -inf  ;;  %v1027_v34 = vpop.xlane.xlu1 %1026 }
 0x23f   : > { %1253 = vmax.xlane.f32.xlu0 %v1252_v29 }
 0x241   : > { %v1195_v18 = vpop.f32.mrf.mxu0  ;;  %v1237_v19 = vpop.f32.mrf.mxu1 }
 0x242   : > { %v1203_v20 = vmul.f32 0.17677669, %v1195_v18  ;;  %v1246_v22 = vmul.f32 0.17677669, %v1237_v19 }
 0x244   : > { %v3463_v25 = vadd.f32 %v1246_v22, %v3421_v46  ;;  %v3466_v26 = vadd.f32 %v3389_v4, %v1203_v20 }
 0x246   : > { %v1261_v27 = vsel %vm1034_vm2, %v3463_v25, -inf  ;;  %v1255_v28 = vsel %vm1024_vm1, %v3466_v26, -inf  ;;  %v1030_v32 = vpop.xlane.xlu2 %1029 }
 0x247   : > { %1259 = vmax.xlane.f32.xlu0 %v1258_v24  ;;  %1262 = vmax.xlane.f32.xlu2 %v1261_v27 }
 0x248   : > { %1256 = vmax.xlane.f32.xlu1 %v1255_v28 }
 0x249   : > { %v3472_v30 = vpop.f32.mrf.mxu1  ;;  %v3474_v31 = vpop.f32.mrf.mxu0 }
 0x24a   : > { %v1442_v24 = vmul.f32 0.17677669, %v3474_v31 }
 0x24c   : > { %v3530_v27 = vadd.f32 %v3389_v4, %v1442_v24 }
 0x251   : > { %v3476_v35 = vpop.f32.mrf.mxu1  ;;  %v3478_v36 = vpop.f32.mrf.mxu0 }
 0x252   : > { %v1037_v37 = vpop.xlane.xlu0 %1036  ;;  %v1040_v38 = vpop.xlane.xlu2 %1039 }
 0x253   : > { %v1044_v39 = vmax.f32 %v1027_v34, %v1037_v37  ;;  %v1045_v40 = vmax.f32 %v1030_v32, %v1040_v38  ;;  %v1443_v34 = vmul.f32 0.17677669, %v3478_v36  ;;  %v1247_v38 = vmul.f32 0.17677669, %v3472_v30 }
 0x255   : > { %v1047_v42 = vsub.f32 %v3403_v23, %v1044_v39  ;;  %v1056_v43 = vsub.f32 %v3425_v47, %v1044_v39  ;;  %v1048_v45 = vsub.f32 %v3410_v33, %v1045_v40  ;;  %v1057_v49 = vsub.f32 %v3428_v48, %v1045_v40  ;;  %v1033_v23 = vpop.xlane.xlu1 %1032 }
 0x256   : > { %v1489_v39 = vsel %vm1024_vm1, %v3530_v27, -inf  ;;  %v3542_v41 = vadd.f32 %v3389_v4, %v1443_v34 }
 0x257   : > { %v1050_v50 = vmul.f32 1.442695, %v1047_v42  ;;  %v1059_v51 = vmul.f32 1.442695, %v1056_v43  ;;  %v1052_v52 = vmul.f32 1.442695, %v1048_v45  ;;  %v3545_v42 = vadd.f32 %v1247_v38, %v3421_v46 }
 0x258   : > { %v1061_v54 = vmul.f32 1.442695, %v1057_v49  ;;  %v1492_v30 = vsel %vm1024_vm1, %v3542_v41, -inf  ;;  %v1248_v45 = vmul.f32 0.17677669, %v3476_v35 }
 0x259   : > { %2666 = vpow2.f32 %v1050_v50  ;;  %v1244_v56 = vpop.f32.mrf.mxu1  ;;  %v1438_v57 = vpop.f32.mrf.mxu0  ;;  %v1264_v49 = vsel %vm1034_vm2, %v3545_v42, -inf }
 0x25a   : > { %2668 = vpow2.f32 %v1059_v51  ;;  %v1043_v58 = vpop.xlane.xlu2 %1042  ;;  %v1444_v43 = vmul.f32 0.17677669, %v1438_v57  ;;  %v3556_v51 = vadd.f32 %v1248_v45, %v3421_v46 }
 0x25b   : > { %2670 = vpow2.f32 %v1052_v52  ;;  %1553 = vrot.lane.b32.xlu0 %v3484_v55, %s3088_s26  ;;  %v1046_v33 = vmax.f32 %v1033_v23, %v1043_v58 }
 0x25c   : > { %2672 = vpow2.f32 %v1061_v54  ;;  %v3553_v50 = vadd.f32 %v3389_v4, %v1444_v43  ;;  %v1267_v35 = vsel %vm1034_vm2, %v3556_v51, -inf }
 0x25d   : > { %v1049_v60 = vsub.f32 %v3417_v44, %v1046_v33  ;;  %v1058_v1 = vsub.f32 %v3435_v53, %v1046_v33 }
 0x25e   : > { %v1495_v56 = vsel %vm1024_vm1, %v3553_v50, -inf }
 0x25f   : > { %v3488_v47 = vpop.eup %2666  ;;  %v1054_v7 = vmul.f32 1.442695, %v1049_v60  ;;  %v1063_v21 = vmul.f32 1.442695, %v1058_v1 }
 0x260   : > { %v3490_v48 = vpop.eup %2668 }
 0x261   : > { %v3492_v59 = vpop.eup %2670  ;;  %1319 = vrot.lane.b32.xlu1 %v3484_v55, %s3087_s8  ;;  %v1440_v61 = vpop.f32.mrf.mxu0  ;;  %2674 = vpow2.f32 %v1054_v7 }
 0x262   : > { %v1474_v62 = vpop.f32.mrf.mxu1  ;;  %v3497_v63 = vpop.eup %2672  ;;  %v1086_v0 = vpack.c.bf16 %v3492_v59, %v3488_v47  ;;  %2676 = vpow2.f32 %v1063_v21 }
 0x263   : > { %v1483_v3 = vmul.f32 0.17677669, %v1474_v62  ;;  %v1088_v5 = vpack.c.bf16 %v3497_v63, %v3490_v48  ;;  %v1349_v9 = vpop.permute.xlu2 %1348 }
 0x264   : > { %2417 = vmatmul.msk.bf16.vlgmr.msra.gmra.mxu3 %vm1024_vm1, %v1086_v0 }
 0x265   : > { %v3506_v44 = vadd.f32 %v1483_v3, %v3421_v46  ;;  %2415 = vmatmul.msk.bf16.vlgmr.msra.gmra.mxu2 %vm1034_vm2, %v1088_v5  ;;  %1364 = vmatpush.bf16.msrb.mxu3 %v1349_v9  ;;  %v1065_v9 = vsel %vm1024_vm1, %v3488_v47, 0.0 }
 0x267   : > { %v1498_v8 = vsel %vm1034_vm2, %v3506_v44, -inf  ;;  %v3516_v14 = vpop.eup %2674 }
 0x268   : > { %1499 = vmax.xlane.f32.xlu2 %v1498_v8  ;;  %v3518_v15 = vpop.eup %2676  ;;  %v1087_v18 = vpack.c.bf16 %v3516_v14, %v3516_v14 }
 0x269   : > { %v1667_v10 = vpop.f32.mrf.mxu0  ;;  %v1089_v19 = vpack.c.bf16 %v3518_v15, %v3518_v15 }
 0x26a   : > { %v1476_v53 = vpop.f32.mrf.mxu1  ;;  %v1676_v11 = vmul.f32 0.17677669, %v1667_v10 }
 0x26b   : > { %v1484_v57 = vmul.f32 0.17677669, %v1476_v53 }
 0x26c   : > { %v3512_v12 = vadd.f32 %v3389_v4, %v1676_v11 }
 0x26d   : > { %v3566_v23 = vadd.f32 %v1484_v57, %v3421_v46 }
 0x26e   : > { %v1723_v13 = vsel %vm1024_vm1, %v3512_v12, -inf }
 0x26f   : > { %v1501_v62 = vsel %vm1034_vm2, %v3566_v23, -inf }
 0x270   : > { %1724 = vmax.xlane.f32.xlu2 %v1723_v13 }
 0x271   : > { %v1669_v29 = vpop.f32.mrf.mxu0 }
 0x272   : > { %v1479_v16 = vpop.f32.mrf.mxu1  ;;  %v1677_v54 = vmul.f32 0.17677669, %v1669_v29 }
 0x273   : > { %v1485_v53 = vmul.f32 0.17677669, %v1479_v16 }
 0x274   : > { %2418 = vmatmul.msk.bf16.gmra.mxu3 %vm1024_vm1, %v1087_v18  ;;  %v3563_v58 = vadd.f32 %v3389_v4, %v1677_v54 }
 0x275   : > { %2416 = vmatmul.msk.bf16.gmra.mxu2 %vm1034_vm2, %v1089_v19  ;;  %v3595_v18 = vadd.f32 %v1485_v53, %v3421_v46  ;;  %v1077_v19 = vsel %vm1034_vm2, %v3497_v63, 0.0 }
 0x276   : > { %v1726_v61 = vsel %vm1024_vm1, %v3563_v58, -inf }
 0x277   : > { %v1504_v16 = vsel %vm1034_vm2, %v3595_v18, -inf }
 0x279   : > { %v3526_v22 = vpop.f32.mrf.mxu0 }
 0x27a   : > { %v1481_v20 = vpop.f32.mrf.mxu1  ;;  %v1678_v47 = vmul.f32 0.17677669, %v3526_v22  ;;  %v1074_v22 = vsel %vm1034_vm2, %v3490_v48, 0.0 }
 0x281   : > { %v1674_v28 = vpop.f32.mrf.mxu0 }
 0x282   : > { %v1708_v32 = vpop.f32.mrf.mxu1  ;;  %v3604_v28 = vadd.f32 %v3389_v4, %v1678_v47 }
 0x283   : > { %v1717_v37 = vmul.f32 0.17677669, %v1708_v32 }
 0x284   : > { %v1729_v34 = vsel %vm1024_vm1, %v3604_v28, -inf }
 0x285   : > { %v3537_v40 = vadd.f32 %v1717_v37, %v3421_v46  ;;  %1490 = vmax.xlane.f32.xlu0 %v1489_v39  ;;  %v1068_v39 = vsel %vm1024_vm1, %v3492_v59, 0.0 }
 0x287   : > { %v1732_v31 = vsel %vm1034_vm2, %v3537_v40, -inf }
 0x288   : > { %1733 = vmax.xlane.f32.xlu2 %v1732_v31 }
 0x28a   : > { %v1710_v36 = vpop.f32.mrf.mxu1 }
 0x28b   : > { %1493 = vmax.xlane.f32.xlu1 %v1492_v30  ;;  %v1718_v60 = vmul.f32 0.17677669, %v1710_v36 }
 0x28d   : > { %1265 = vmax.xlane.f32.xlu0 %v1264_v49  ;;  %v3573_v0 = vadd.f32 %v1718_v60, %v3421_v46 }
 0x28f   : > { %v1735_v1 = vsel %vm1034_vm2, %v3573_v0, -inf }
 0x292   : > { %v1713_v52 = vpop.f32.mrf.mxu1 }
 0x293   : > { %1496 = vmax.xlane.f32.xlu1 %v1495_v56  ;;  %v1719_v3 = vmul.f32 0.17677669, %v1713_v52 }
 0x295   : > { %1268 = vmax.xlane.f32.xlu0 %v1267_v35  ;;  %v3584_v7 = vadd.f32 %v1719_v3, %v3421_v46 }
 0x297   : > { %v1738_v21 = vsel %vm1034_vm2, %v3584_v7, -inf }
 0x29a   : > { %v1715_v33 = vpop.f32.mrf.mxu1 }
 0x29b   : > { %1727 = vmax.xlane.f32.xlu1 %v1726_v61 }
 0x29d   : > { %1502 = vmax.xlane.f32.xlu0 %v1501_v62 }
 0x2a0   : > { %1787 = vrot.lane.b32.xlu2 %v3484_v55, %s3089_s2 }
 0x2a3   : > { %1736 = vmax.xlane.f32.xlu1 %v1735_v1 }
 0x2b1   : > { %1582 = vrot.lane.b32.xlu0 %v3444_v6, %s3088_s26 }
 0x2b2   : > { %v1254_v5 = vpop.xlane.xlu0 %1253 }
 0x2ba   : > { %v3588_v55 = vpop.xlane.xlu0 %1259  ;;  %v1263_v13 = vpop.xlane.xlu2 %1262 }
 0x2bb   : > { %v1257_v8 = vpop.xlane.xlu1 %1256  ;;  %v1270_v20 = vmax.f32 %v1254_v5, %v1263_v13 }
 0x2bc   : > { %1816 = vrot.lane.b32.xlu1 %v3444_v6, %s3089_s2 }
 0x2bd   : > { %v1273_v24 = vsub.f32 %v3453_v17, %v1270_v20  ;;  %v1282_v46 = vsub.f32 %v3463_v25, %v1270_v20 }
 0x2bf   : > { %v1276_v32 = vmul.f32 1.442695, %v1273_v24  ;;  %v1285_v63 = vmul.f32 1.442695, %v1282_v46 }
 0x2c1   : > { %2678 = vpow2.f32 %v1276_v32 }
 0x2c2   : > { %2680 = vpow2.f32 %v1285_v63 }
 0x2c7   : > { %v2679_v4 = vpop.eup %2678 }
 0x2c8   : > { %v1291_v25 = vsel %vm1024_vm1, %v2679_v4, 0.0  ;;  %v2681_v31 = vpop.eup %2680 }
 0x2c9   : > { %1739 = vmax.xlane.f32.xlu2 %v1738_v21  ;;  %v1300_v45 = vsel %vm1034_vm2, %v2681_v31, 0.0 }
 0x2cd   : > { %v1554_v10 = vpop.permute.xlu0 %1553 }
 0x2ce   : > { %v1562_v29 = vsel %vm1096_vm3, %v1554_v10, 0 }
 0x2d1   : > { %1066 = vadd.xlane.f32.xlu2 %v1065_v9 }
 0x2d3   : > { %v1320_v11 = vpop.permute.xlu1 %1319 }
 0x2d4   : > { %v1328_v6 = vsel %vm1096_vm3, %v1320_v11, 0 }
 0x2d5   : > { %1337 = vmatpush.bf16.msrb.mxu2 %v1328_v6 }
 0x2d9   : > { %1571 = vmatpush.bf16.msra.mxu2 %v1562_v29  ;;  %1078 = vadd.xlane.f32.xlu2 %v1077_v19 }
 0x2db   : > { %1505 = vmax.xlane.f32.xlu0 %v1504_v16  ;;  %v1500_v48 = vpop.xlane.xlu2 %1499 }
 0x2e3   : > { %1730 = vmax.xlane.f32.xlu0 %v1729_v34  ;;  %v3621_v57 = vpop.xlane.xlu2 %1724 }
 0x2e6   : > { %1075 = vadd.xlane.f32.xlu1 %v1074_v22 }
 0x2e7   : > { %v1139_v37 = vpop.f32.mrf.mxu3 }
 0x2e8   : > { %v1109_v38 = vpop.f32.mrf.mxu2 }
 0x2e9   : > { %v3611_v17 = vadd.f32 %v1139_v37, %v1109_v38 }
 0x2eb   : > { %1069 = vadd.xlane.f32.xlu0 %v1068_v39 }
 0x2ee   : > { %1292 = vadd.xlane.f32.xlu1 %v1291_v25 }
 0x2ef   : > { %v1141_v36 = vpop.f32.mrf.mxu3 }
 0x2f0   : > { %v1111_v43 = vpop.f32.mrf.mxu2 }
 0x2f1   : > { %v3616_v30 = vadd.f32 %v1141_v36, %v1111_v43 }
 0x2f3   : > { %1301 = vadd.xlane.f32.xlu0 %v1300_v45 }
 0x2f7   : > { %v1144_v49 = vpop.f32.mrf.mxu3 }
 0x2f8   : > { %v1114_v52 = vpop.f32.mrf.mxu2  ;;  %v1491_v54 = vpop.xlane.xlu0 %1490 }
 0x2f9   : > { %v3619_v56 = vadd.f32 %v1144_v49, %v1114_v52  ;;  %v1507_v21 = vmax.f32 %v1491_v54, %v1500_v48 }
 0x2fb   : > { %v3625_v1 = vpop.xlane.xlu2 %1733  ;;  %v1519_v6 = vsub.f32 %v3506_v44, %v1507_v21  ;;  %v1510_v24 = vsub.f32 %v3530_v27, %v1507_v21 }
 0x2fc   : > { %v1741_v54 = vmax.f32 %v3621_v57, %v3625_v1 }
 0x2fd   : > { %v1522_v16 = vmul.f32 1.442695, %v1519_v6  ;;  %v1513_v63 = vmul.f32 1.442695, %v1510_v24 }
 0x2fe   : > { %v1494_v9 = vpop.xlane.xlu1 %1493 }
 0x2ff   : > { %v1146_v59 = vpop.f32.mrf.mxu3 }
 0x300   : > { %v1116_v35 = vpop.f32.mrf.mxu2  ;;  %v1266_v33 = vpop.xlane.xlu0 %1265 }
 0x301   : > { %v1271_v60 = vmax.f32 %v1257_v8, %v1266_v33  ;;  %v1753_v33 = vsub.f32 %v3537_v40, %v1741_v54 }
 0x303   : > { %v1274_v61 = vsub.f32 %v3466_v26, %v1271_v60  ;;  %v1283_v62 = vsub.f32 %v3545_v42, %v1271_v60  ;;  %v1788_v19 = vpop.permute.xlu2 %1787 }
 0x305   : > { %v1278_v3 = vmul.f32 1.442695, %v1274_v61  ;;  %v1287_v5 = vmul.f32 1.442695, %v1283_v62 }
 0x306   : > { %v1497_v44 = vpop.xlane.xlu1 %1496 }
 0x307   : > { %2682 = vpow2.f32 %v1278_v3 }
 0x308   : > { %2684 = vpow2.f32 %v1287_v5  ;;  %v1269_v53 = vpop.xlane.xlu0 %1268  ;;  %v1756_v5 = vmul.f32 1.442695, %v1753_v33 }
 0x309   : > { %v1272_v10 = vmax.f32 %v3588_v55, %v1269_v53  ;;  %v1796_v55 = vsel %vm1096_vm3, %v1788_v19, 0 }
 0x30b   : > { %v1275_v11 = vsub.f32 %v3458_v2, %v1272_v10  ;;  %v1284_v26 = vsub.f32 %v3556_v51, %v1272_v10 }
 0x30d   : > { %v2683_v8 = vpop.eup %2682  ;;  %v1280_v13 = vmul.f32 1.442695, %v1275_v11  ;;  %v1289_v2 = vmul.f32 1.442695, %v1284_v26 }
 0x30e   : > { %v2685_v42 = vpop.eup %2684  ;;  %v1312_v29 = vpack.c.bf16 %v2683_v8, %v2679_v4  ;;  %v1294_v20 = vsel %vm1024_vm1, %v2683_v8, 0.0  ;;  %v1728_v4 = vpop.xlane.xlu1 %1727  ;;  %v1744_v8 = vsub.f32 %v3512_v12, %v1741_v54 }
 0x30f   : > { %v1314_v47 = vpack.c.bf16 %v2685_v42, %v2681_v31  ;;  %2686 = vpow2.f32 %v1280_v13  ;;  %1295 = vadd.xlane.f32.xlu0 %v1294_v20  ;;  %v1303_v34 = vsel %vm1034_vm2, %v2685_v42, 0.0 }
 0x310   : > { %2425 = vmatmul.msk.bf16.vlgmr.msrb.gmra.mxu3 %vm1024_vm1, %v1312_v29  ;;  %2688 = vpow2.f32 %v1522_v16  ;;  %v1503_v32 = vpop.xlane.xlu0 %1502  ;;  %v1747_v19 = vmul.f32 1.442695, %v1744_v8 }
 0x311   : > { %2423 = vmatmul.msk.bf16.vlgmr.msrb.gmra.mxu2 %vm1034_vm2, %v1314_v47  ;;  %2690 = vpow2.f32 %v1289_v2  ;;  %v1508_v22 = vmax.f32 %v1494_v9, %v1503_v32 }
 0x312   : > { %1805 = vmatpush.bf16.msrb.mxu2 %v1796_v55  ;;  %2692 = vpow2.f32 %v1513_v63 }
 0x313   : > { %v1511_v39 = vsub.f32 %v3542_v41, %v1508_v22  ;;  %v1520_v25 = vsub.f32 %v3566_v23, %v1508_v22 }
 0x315   : > { %v2687_v51 = vpop.eup %2686  ;;  %v1515_v48 = vmul.f32 1.442695, %v1511_v39  ;;  %v1524_v45 = vmul.f32 1.442695, %v1520_v25 }
 0x316   : > { %v1297_v46 = vsel %vm1024_vm1, %v2687_v51, 0.0  ;;  %v2689_v37 = vpop.eup %2688  ;;  %v1313_v36 = vpack.c.bf16 %v2687_v51, %v2687_v51  ;;  %v1737_v41 = vpop.xlane.xlu1 %1736 }
 0x317   : > { %1298 = vadd.xlane.f32.xlu2 %v1297_v46  ;;  %1304 = vadd.xlane.f32.xlu0 %v1303_v34  ;;  %v2691_v38 = vpop.eup %2690  ;;  %v1537_v27 = vsel %vm1034_vm2, %v2689_v37, 0.0  ;;  %2694 = vpow2.f32 %v1515_v48  ;;  %v1742_v53 = vmax.f32 %v1728_v4, %v1737_v41 }
 0x318   : > { %v1306_v31 = vsel %vm1034_vm2, %v2691_v38, 0.0  ;;  %v1315_v43 = vpack.c.bf16 %v2691_v38, %v2691_v38  ;;  %v2693_v49 = vpop.eup %2692  ;;  %2696 = vpow2.f32 %v1524_v45 }
 0x319   : > { %v1528_v23 = vsel %vm1024_vm1, %v2693_v49, 0.0  ;;  %2698 = vpow2.f32 %v1756_v5  ;;  %v1745_v13 = vsub.f32 %v3563_v58, %v1742_v53  ;;  %v1754_v12 = vsub.f32 %v3573_v0, %v1742_v53 }
 0x31b   : > { %v1749_v47 = vmul.f32 1.442695, %v1745_v13  ;;  %v1758_v63 = vmul.f32 1.442695, %v1754_v12 }
 0x31d   : > { %v2695_v59 = vpop.eup %2694 }
 0x31e   : > { %v2697_v35 = vpop.eup %2696  ;;  %v1549_v60 = vpack.c.bf16 %v2695_v59, %v2693_v49  ;;  %v1531_v62 = vsel %vm1024_vm1, %v2695_v59, 0.0 }
 0x31f   : > { %1538 = vadd.xlane.f32.xlu2 %v1537_v27  ;;  %1307 = vadd.xlane.f32.xlu0 %v1306_v31  ;;  %v1551_v3 = vpack.c.bf16 %v2697_v35, %v2689_v37  ;;  %v1540_v21 = vsel %vm1034_vm2, %v2697_v35, 0.0  ;;  %v3652_v57 = vpop.eup %2698 }
 0x320   : > { %2426 = vmatmul.msk.bf16.gmra.mxu3 %vm1024_vm1, %v1313_v36  ;;  %v1771_v40 = vsel %vm1034_vm2, %v3652_v57, 0.0 }
 0x321   : > { %2424 = vmatmul.msk.bf16.gmra.mxu2 %vm1034_vm2, %v1315_v43 }
 0x323   : > { %v1583_v52 = vpop.permute.xlu0 %1582 }
 0x324   : > { %1598 = vmatpush.bf16.msra.mxu3 %v1583_v52 }
 0x327   : > { %1529 = vadd.xlane.f32.xlu0 %v1528_v23 }
 0x32e   : > { %v1817_v61 = vpop.permute.xlu1 %1816 }
 0x32f   : > { %1832 = vmatpush.bf16.msrb.mxu3 %v1817_v61  ;;  %1532 = vadd.xlane.f32.xlu0 %v1531_v62 }
 0x330   : > { %2433 = vmatmul.msk.bf16.vlgmr.msra.gmra.mxu3 %vm1024_vm1, %v1549_v60 }
 0x331   : > { %2431 = vmatmul.msk.bf16.vlgmr.msra.gmra.mxu2 %vm1034_vm2, %v1551_v3 }
 0x337   : > { %1541 = vadd.xlane.f32.xlu0 %v1540_v21 }
 0x33c   : > { %v1740_v1 = vpop.xlane.xlu2 %1739 }
 0x33f   : > { %1772 = vadd.xlane.f32.xlu0 %v1771_v40 }
 0x344   : > { %v1067_v29 = vpop.xlane.xlu2 %1066 }
 0x34c   : > { %v1079_v34 = vpop.xlane.xlu2 %1078 }
 0x34e   : > { %v1506_v9 = vpop.xlane.xlu0 %1505 }
 0x34f   : > { %v1509_v10 = vmax.f32 %v1497_v44, %v1506_v9 }
 0x351   : > { %v1512_v11 = vsub.f32 %v3553_v50, %v1509_v10  ;;  %v1521_v6 = vsub.f32 %v3595_v18, %v1509_v10 }
 0x353   : > { %v1517_v26 = vmul.f32 1.442695, %v1512_v11  ;;  %v1526_v42 = vmul.f32 1.442695, %v1521_v6 }
 0x355   : > { %2700 = vpow2.f32 %v1517_v26 }
 0x356   : > { %2702 = vpow2.f32 %v1526_v42  ;;  %v1731_v20 = vpop.xlane.xlu0 %1730 }
 0x357   : > { %v1743_v16 = vmax.f32 %v1731_v20, %v1740_v1  ;;  %2704 = vpow2.f32 %v1747_v19 }
 0x358   : > { %2706 = vpow2.f32 %v1749_v47 }
 0x359   : > { %v1746_v55 = vsub.f32 %v3604_v28, %v1743_v16  ;;  %v1076_v2 = vpop.xlane.xlu1 %1075  ;;  %v1755_v39 = vsub.f32 %v3584_v7, %v1743_v16 }
 0x35a   : > { %v1083_v50 = vadd.f32 %v1076_v2, %v1067_v29 }
 0x35b   : > { %v2701_v44 = vpop.eup %2700  ;;  %v1751_v18 = vmul.f32 1.442695, %v1746_v55  ;;  %v1760_v48 = vmul.f32 1.442695, %v1755_v39 }
 0x35c   : > { %v2703_v58 = vpop.eup %2702  ;;  %2708 = vrcp.f32 %v1083_v50  ;;  %v1534_v51 = vsel %vm1024_vm1, %v2701_v44, 0.0  ;;  %v1550_v24 = vpack.c.bf16 %v2701_v44, %v2701_v44 }
 0x35d   : > { %2710 = vpow2.f32 %v1751_v18  ;;  %v1543_v32 = vsel %vm1034_vm2, %v2703_v58, 0.0  ;;  %1535 = vadd.xlane.f32.xlu1 %v1534_v51  ;;  %v1552_v46 = vpack.c.bf16 %v2703_v58, %v2703_v58  ;;  %v2705_v0 = vpop.eup %2704 }
 0x35e   : > { %1544 = vadd.xlane.f32.xlu2 %v1543_v32  ;;  %v1070_v28 = vpop.xlane.xlu0 %1069  ;;  %2434 = vmatmul.msk.bf16.gmra.mxu3 %vm1024_vm1, %v1550_v24  ;;  %v2707_v37 = vpop.eup %2706  ;;  %v1762_v31 = vsel %vm1024_vm1, %v2705_v0, 0.0 }
 0x35f   : > { %v1084_v22 = vadd.f32 %v1079_v34, %v1070_v28  ;;  %2432 = vmatmul.msk.bf16.gmra.mxu2 %vm1034_vm2, %v1552_v46  ;;  %v1765_v36 = vsel %vm1024_vm1, %v2707_v37, 0.0  ;;  %v1783_v7 = vpack.c.bf16 %v2707_v37, %v2705_v0 }
 0x361   : > { %2712 = vrcp.f32 %v1084_v22  ;;  %v1293_v60 = vpop.xlane.xlu1 %1292 }
 0x362   : > { %v2709_v38 = vpop.eup %2708  ;;  %2714 = vpow2.f32 %v1758_v63 }
 0x363   : > { %v2711_v4 = vpop.eup %2710  ;;  %v1151_v25 = vmul.f32 %v2709_v38, %v3611_v17  ;;  %2716 = vpow2.f32 %v1760_v48  ;;  %v1071_v48 = vsel %vm1024_vm1, %v3516_v14, 0.0 }
 0x364   : > { %v1768_v27 = vsel %vm1024_vm1, %v2711_v4, 0.0 }
 0x365   : > { %1154 = vst.msk [vmem:[#allocation3] sm:$0xff] %vm951_vm0, %v1151_v25  ;;  %1769 = vadd.xlane.f32.xlu0 %v1768_v27  ;;  %1763 = vadd.xlane.f32.xlu1 %v1762_v31 }
 0x366   : > { %1766 = vadd.xlane.f32.xlu2 %v1765_v36  ;;  %v1302_v54 = vpop.xlane.xlu0 %1301 }
 0x367   : > { %v2713_v43 = vpop.eup %2712  ;;  %v1309_v61 = vadd.f32 %v1302_v54, %v1293_v60 }
 0x368   : > { %v1152_v45 = vmul.f32 %v2713_v43, %v3616_v30  ;;  %v2715_v49 = vpop.eup %2714  ;;  %v1784_v30 = vpack.c.bf16 %v2711_v4, %v2711_v4 }
 0x369   : > { %v1774_v17 = vsel %vm1034_vm2, %v2715_v49, 0.0  ;;  %v1785_v52 = vpack.c.bf16 %v2715_v49, %v3652_v57  ;;  %v2717_v41 = vpop.eup %2716  ;;  %2718 = vrcp.f32 %v1309_v61 }
 0x36a   : > { %1155 = vst.msk [vmem:[#allocation3 + $0x8] sm:$0xff] %vm951_vm0, %v1152_v45  ;;  %v1777_v23 = vsel %vm1034_vm2, %v2717_v41, 0.0  ;;  %v1786_v59 = vpack.c.bf16 %v2717_v41, %v2717_v41 }
 0x36d   : > { %1775 = vadd.xlane.f32.xlu1 %v1774_v17 }
 0x36e   : > { %2441 = vmatmul.msk.bf16.vlgmr.msrb.gmra.mxu3 %vm1024_vm1, %v1783_v7 }
 0x36f   : > { %2439 = vmatmul.msk.bf16.vlgmr.msrb.gmra.mxu2 %vm1034_vm2, %v1785_v52  ;;  %v2719_v40 = vpop.eup %2718 }
 0x375   : > { %1778 = vadd.xlane.f32.xlu1 %v1777_v23 }
 0x37e   : > { %2442 = vmatmul.msk.bf16.gmra.mxu3 %vm1024_vm1, %v1784_v30 }
 0x37f   : > { %2440 = vmatmul.msk.bf16.gmra.mxu2 %vm1034_vm2, %v1786_v59 }
 0x382   : > { %v1296_v35 = vpop.xlane.xlu0 %1295 }
 0x38a   : > { %v1305_v33 = vpop.xlane.xlu0 %1304  ;;  %v1299_v13 = vpop.xlane.xlu2 %1298 }
 0x38b   : > { %v1310_v5 = vadd.f32 %v1305_v33, %v1296_v35 }
 0x38d   : > { %2720 = vrcp.f32 %v1310_v5 }
 0x392   : > { %v1308_v62 = vpop.xlane.xlu0 %1307  ;;  %v1539_v19 = vpop.xlane.xlu2 %1538 }
 0x393   : > { %v1366_v3 = vpop.f32.mrf.mxu3  ;;  %v2721_v6 = vpop.eup %2720  ;;  %v1311_v2 = vadd.f32 %v1308_v62, %v1299_v13 }
 0x394   : > { %v1339_v21 = vpop.f32.mrf.mxu2 }
 0x395   : > { %v1367_v57 = vadd.f32 %v1366_v3, %v1339_v21 }
 0x397   : > { %v1378_v1 = vmul.f32 %v2719_v40, %v1367_v57 }
 0x399   : > { %1384 = vrot.lane.b32.xlu0 %v1378_v1, %s3089_s2 }
 0x39a   : > { %v1530_v10 = vpop.xlane.xlu0 %1529 }
 0x39b   : > { %v1368_v9 = vpop.f32.mrf.mxu3  ;;  %v1546_v47 = vadd.f32 %v1539_v19, %v1530_v10  ;;  %v1080_v19 = vsel %vm1034_vm2, %v3518_v15, 0.0 }
 0x39c   : > { %v1341_v53 = vpop.f32.mrf.mxu2 }
 0x39d   : > { %v1369_v11 = vadd.f32 %v1368_v9, %v1341_v53  ;;  %2722 = vrcp.f32 %v1546_v47  ;;  %v2531_v47 = vld [vmem:[#allocation16 + $0x28] sm:$0xff] }
 0x39e   : > { %2724 = vrcp.f32 %v1311_v2  ;;  %v2528_v2 = vld [vmem:[#allocation16 + $0x10] sm:$0xff] }
 0x39f   : > { %v1379_v8 = vmul.f32 %v2721_v6, %v1369_v11 }
 0x3a1   : > { %1386 = vrot.lane.b32.xlu1 %v1379_v8, %s3089_s2 }
 0x3a2   : > { %v1533_v29 = vpop.xlane.xlu0 %1532 }
 0x3a3   : > { %v1371_v26 = vpop.f32.mrf.mxu3  ;;  %v2723_v58 = vpop.eup %2722 }
 0x3a4   : > { %v1344_v42 = vpop.f32.mrf.mxu2  ;;  %v2725_v34 = vpop.eup %2724 }
 0x3a5   : > { %v1372_v24 = vadd.f32 %v1371_v26, %v1344_v42  ;;  %v2533_v42 = vld [vmem:[#allocation16 + $0x38] sm:$0xff] }
 0x3a6   : > { %1938 = vmatpush.bf16.msrb.mxu0 %v2533_v42 }
 0x3a7   : > { %v1380_v22 = vmul.f32 %v2725_v34, %v1372_v24 }
 0x3aa   : > { %v1542_v55 = vpop.xlane.xlu0 %1541 }
 0x3ab   : > { %v1373_v20 = vpop.f32.mrf.mxu3  ;;  %v1547_v44 = vadd.f32 %v1542_v55, %v1533_v29  ;;  %v2532_v29 = vld [vmem:[#allocation16 + $0x30] sm:$0xff]  ;;  %v2529_v55 = vld [vmem:[#allocation16 + $0x18] sm:$0xff] }
 0x3ac   : > { %v1346_v16 = vpop.f32.mrf.mxu2  ;;  %1939 = vmatpush.bf16.msrb.mxu0 %v2532_v29 }
 0x3ad   : > { %2726 = vrcp.f32 %v1547_v44  ;;  %v2530_v16 = vld [vmem:[#allocation16 + $0x20] sm:$0xff] }
 0x3ae   : > { %v2526_v44 = vld [vmem:[#allocation16] sm:$0xff] }
 0x3b0   : > { %1940 = vmatpush.bf16.msrb.mxu0 %v2531_v47 }
 0x3b2   : > { %v1773_v27 = vpop.xlane.xlu0 %1772 }
 0x3b3   : > { %v1600_v50 = vpop.f32.mrf.mxu3  ;;  %v2727_v63 = vpop.eup %2726 }
 0x3b4   : > { %v1573_v12 = vpop.f32.mrf.mxu2  ;;  %1941 = vmatpush.bf16.msrb.mxu0 %v2530_v16 }
 0x3b5   : > { %v1601_v18 = vadd.f32 %v1600_v50, %v1573_v12  ;;  %v2527_v50 = vld [vmem:[#allocation16 + $0x8] sm:$0xff] }
 0x3b7   : > { %v1612_v51 = vmul.f32 %v2723_v58, %v1601_v18 }
 0x3b8   : > { %1942 = vmatpush.bf16.msrb.mxu0 %v2529_v55 }
 0x3b9   : > { %1618 = vrot.lane.b32.xlu2 %v1612_v51, %s3088_s26 }
 0x3bb   : > { %v1602_v32 = vpop.f32.mrf.mxu3 }
 0x3bc   : > { %v1575_v46 = vpop.f32.mrf.mxu2  ;;  %1943 = vmatpush.bf16.msrb.mxu0 %v2528_v2 }
 0x3bd   : > { %v1603_v28 = vadd.f32 %v1602_v32, %v1575_v46 }
 0x3bf   : > { %v1613_v0 = vmul.f32 %v2727_v63, %v1603_v28 }
 0x3c0   : > { %1944 = vmatpush.bf16.msrb.mxu0 %v2527_v50  ;;  %v2664_v50 = vld [vmem:[%s3767_s9 + $0x1] ss:$0 sm:$0xff] }
 0x3c1   : > { %1388 = vrot.lane.b32.xlu2 %v1380_v22, %s3089_s2  ;;  %1620 = vrot.lane.b32.xlu0 %v1613_v0, %s3088_s26  ;;  %s3009_s2 = scalar_lea.hbm %s3768_s10, 48 }
 0x3c2   : > { %p3011_p9 = scmp.lt.s32.totalorder %s3009_s2, %s3005_s22 }
 0x3c4   : > { %1945 = vmatpush.bf16.msrb.mxu0 %v2526_v44  ;;  %p3012_p5 = por %p3011_p9, %p3010_p7 }
 0x3c6   : > { %p3013_p8 = pnand %p3012_p5, %p3008_p12 }
 0x3d0   : > { %v1536_v37 = vpop.xlane.xlu1 %1535 }
 0x3d1   : > { %v1545_v25 = vpop.xlane.xlu2 %1544 }
 0x3d2   : > { %v1548_v59 = vadd.f32 %v1545_v25, %v1536_v37  ;;  %v2746_v25 = vld [vmem:[%s3313_s19] sm:$0xff] }
 0x3d8   : > { %v1764_v39 = vpop.xlane.xlu1 %1763  ;;  %v1770_v62 = vpop.xlane.xlu0 %1769 }
 0x3d9   : > { %v1780_v36 = vadd.f32 %v1773_v27, %v1764_v39  ;;  %v1767_v49 = vpop.xlane.xlu2 %1766 }
 0x3db   : > { %2728 = vrcp.f32 %v1780_v36 }
 0x3e0   : > { %v1776_v45 = vpop.xlane.xlu1 %1775 }
 0x3e1   : > { %v1605_v38 = vpop.f32.mrf.mxu3  ;;  %v1781_v17 = vadd.f32 %v1776_v45, %v1767_v49  ;;  %v2729_v23 = vpop.eup %2728 }
 0x3e2   : > { %v1578_v4 = vpop.f32.mrf.mxu2 }
 0x3e3   : > { %2730 = vrcp.f32 %v1781_v17  ;;  %v1606_v3 = vadd.f32 %v1605_v38, %v1578_v4  ;;  %v2663_v4 = vld [vmem:[%s3767_s9] ss:$0 sm:$0xff] }
 0x3e4   : > { %2732 = vrcp.f32 %v1548_v59 }
 0x3e8   : > { %v1779_v14 = vpop.xlane.xlu1 %1778 }
 0x3e9   : > { %v1607_v31 = vpop.f32.mrf.mxu3  ;;  %v2731_v60 = vpop.eup %2730  ;;  %v1782_v21 = vadd.f32 %v1779_v14, %v1770_v62 }
 0x3ea   : > { %v1580_v43 = vpop.f32.mrf.mxu2  ;;  %v2733_v40 = vpop.eup %2732 }
 0x3eb   : > { %1072 = vadd.xlane.f32.xlu0 %v1071_v48  ;;  %v1614_v1 = vmul.f32 %v2733_v40, %v1606_v3  ;;  %2734 = vrcp.f32 %v1782_v21  ;;  %v2747_v43 = vld [vmem:[%s3313_s19 + $0x8] sm:$0xff] }
 0x3f1   : > { %v1834_v7 = vpop.f32.mrf.mxu3  ;;  %v2735_v6 = vpop.eup %2734 }
 0x3f2   : > { %v1807_v52 = vpop.f32.mrf.mxu2 }
 0x3f3   : > { %v1835_v41 = vadd.f32 %v1834_v7, %v1807_v52  ;;  %v2748_v7 = vld [vmem:[%s3313_s19 + $0x10] sm:$0xff] }
 0x3f5   : > { %v1846_v54 = vmul.f32 %v2729_v23, %v1835_v41  ;;  %v3091_v41 = vmov 128.0  }
 0x3f7   : > { %1852 = vrot.lane.b32.xlu1 %v1846_v54, %s3087_s8 }
 0x3f9   : > { %v1836_v30 = vpop.f32.mrf.mxu3 }
 0x3fa   : > { %v1809_v35 = vpop.f32.mrf.mxu2 }
 0x3fb   : > { %v1837_v33 = vadd.f32 %v1836_v30, %v1809_v35 }
 0x3fd   : > { %v1847_v61 = vmul.f32 %v2731_v60, %v1837_v33 }
 0x3ff   : > { %1854 = vrot.lane.b32.xlu2 %v1847_v61, %s3087_s8 }
 0x401   : > { %v1839_v5 = vpop.f32.mrf.mxu3 }
 0x402   : > { %v1812_v57 = vpop.f32.mrf.mxu2 }
 0x403   : > { %v1840_v9 = vadd.f32 %v1839_v5, %v1812_v57 }
 0x405   : > { %v1848_v8 = vmul.f32 %v2735_v6, %v1840_v9 }
 0x407   : > { %1622 = vrot.lane.b32.xlu2 %v1614_v1, %s3088_s26 }
 0x409   : > { %v1841_v53 = vpop.f32.mrf.mxu3 }
 0x40a   : > { %v1814_v10 = vpop.f32.mrf.mxu2 }
 0x40b   : > { %v1385_v11 = vpop.permute.xlu0 %1384 }
 0x40c   : > { %1394 = vst.msk [vmem:[#allocation3] sm:$0xff] %vm1393_vm4, %v1385_v11 }
 0x40f   : > { %1856 = vrot.lane.b32.xlu2 %v1848_v8, %s3087_s8 }
 0x413   : > { %v1387_v13 = vpop.permute.xlu1 %1386  ;;  %v1619_v26 = vpop.permute.xlu2 %1618 }
 0x414   : > { %1395 = vst.msk [vmem:[#allocation3 + $0x8] sm:$0xff] %vm1393_vm4, %v1387_v13 }
 0x415   : > { %1628 = vst.msk [vmem:[#allocation3] sm:$0xff] %vm1627_vm5, %v1619_v26 }
 0x41b   : > { %v1389_v12 = vpop.permute.xlu2 %1388 }
 0x421   : > { %1081 = vadd.xlane.f32.xlu1 %v1080_v19 }
 0x433   : > { %v1621_v20 = vpop.permute.xlu0 %1620 }
 0x434   : > { %1629 = vst.msk [vmem:[#allocation3 + $0x8] sm:$0xff] %vm1627_vm5, %v1621_v20 }
 0x459   : > { %v1855_v18 = vpop.permute.xlu2 %1854 }
 0x45a   : > { %1863 = vst.msk [vmem:[#allocation3 + $0x8] sm:$0xff] %vm1861_vm6, %v1855_v18  ;;  %v2665_v18 = vld [vmem:[%s3767_s9 + $0x2] ss:$0 sm:$0xff] }
 0x45e   : > { %v1073_v32 = vpop.xlane.xlu0 %1072 }
 0x461   : > { %v1866_v51 = vld [vmem:[#allocation3 + $0x8] sm:$0xff]  ;;  %v1623_v28 = vpop.permute.xlu2 %1622 }
 0x469   : > { %v1853_v15 = vpop.permute.xlu1 %1852  ;;  %v1857_v0 = vpop.permute.xlu2 %1856 }
 0x46a   : > { %1862 = vst.msk [vmem:[#allocation3] sm:$0xff] %vm1861_vm6, %v1853_v15 }
 0x471   : > { %v1865_v58 = vld [vmem:[#allocation3] sm:$0xff] }
 0x472   : > { %v1868_v24 = vpack.c.bf16 %v1866_v51, %v1865_v58 }
 0x474   : > { %1946 = vmatmul.bf16.vlgmr.msrb.gmra.mxu0 %v1868_v24 }
 0x494   : > { %v1082_v46 = vpop.xlane.xlu1 %1081 }
 0x495   : > { %v1085_v34 = vadd.f32 %v1082_v46, %v1073_v32 }
 0x497   : > { %2736 = vrcp.f32 %v1085_v34 }
 0x498   : > { %2738 = vrcp.f32 %v3091_v41 }
 0x49d   : > { %v2737_v63 = vpop.eup %2736 }
 0x49e   : > { %v1153_v22 = vmul.f32 %v2737_v63, %v3619_v56  ;;  %v2739_v23 = vpop.eup %2738 }
 0x49f   : > { %v1966_v54 = vmul.f32 128.0, %v2739_v23  ;;  %vm1970_vm7 = vweird.f32 %v2739_v23 }
 0x4a0   : > { %1156 = vst.msk [vmem:[#allocation3 + $0x10] sm:$0xff] %vm951_vm0, %v1153_v22 }
 0x4a1   : > { %1396 = vst.msk [vmem:[#allocation3 + $0x10] sm:$0xff] %vm1393_vm4, %v1389_v12  ;;  %v1967_v30 = vsub.f32 1.0, %v1966_v54 }
 0x4a2   : > { %1630 = vst.msk [vmem:[#allocation3 + $0x10] sm:$0xff] %vm1627_vm5, %v1623_v28 }
 0x4a3   : > { %1864 = vst.msk [vmem:[#allocation3 + $0x10] sm:$0xff] %vm1861_vm6, %v1857_v0  ;;  %v1968_v59 = vmul.f32 %v2739_v23, %v1967_v30 }
 0x4a5   : > { %v1969_v35 = vadd.f32 %v2739_v23, %v1968_v59 }
 0x4a7   : > { %v1971_v33 = vsel %vm1970_vm7, %v2739_v23, %v1969_v35 }
 0x4aa   : > { %v1867_v37 = vld [vmem:[#allocation3 + $0x10] sm:$0xff] }
 0x4ab   : > { %v1869_v38 = vpack.c.bf16 %v1867_v37, %v1867_v37 }
 0x4ad   : > { %1951 = vmatmul.bf16.gmra.mxu0 %v1869_v38 }
 0x4f1   : > { %v1947_v39 = vpop.f32.mrf.mxu0 }
 0x4f2   : > { %v1948_v56 = vadd.f32 %v2663_v4, %v1947_v39 }
 0x4f4   : > { %v1956_v27 = vadd.f32 %v2746_v25, %v1948_v56 }
 0x4f6   : > { %1959 = vadd.xlane.f32.xlu2 %v1956_v27 }
 0x4f9   : > { %v1949_v31 = vpop.f32.mrf.mxu0 }
 0x4fa   : > { %v1950_v36 = vadd.f32 %v2663_v4, %v1949_v31 }
 0x4fc   : > { %v1957_v48 = vadd.f32 %v2747_v43, %v1950_v36 }
 0x4fe   : > { %1961 = vadd.xlane.f32.xlu0 %v1957_v48 }
 0x52a   : > { %v1952_v45 = vpop.f32.mrf.mxu0 }
 0x52b   : > { %v1953_v49 = vadd.f32 %v2663_v4, %v1952_v45 }
 0x52d   : > { %v1958_v17 = vadd.f32 %v2748_v7, %v1953_v49 }
 0x52f   : > { %1963 = vadd.xlane.f32.xlu1 %v1958_v17 }
 0x532   : > { %v1954_v52 = vpop.f32.mrf.mxu0 }
 0x569   : > { %v1960_v60 = vpop.xlane.xlu2 %1959 }
 0x56a   : > { %v1972_v61 = vmul.f32 %v1971_v33, %v1960_v60 }
 0x56c   : > { %v1975_v14 = vsub.f32 %v1956_v27, %v1972_v61 }
 0x56e   : > { %v1978_v62 = vmul.f32 %v1975_v14, %v1975_v14 }
 0x570   : > { %1981 = vadd.xlane.f32.xlu0 %v1978_v62 }
 0x571   : > { %v1962_v3 = vpop.xlane.xlu0 %1961 }
 0x572   : > { %v1973_v5 = vmul.f32 %v1971_v33, %v1962_v3 }
 0x574   : > { %v1976_v21 = vsub.f32 %v1957_v48, %v1973_v5 }
 0x576   : > { %v1979_v57 = vmul.f32 %v1976_v21, %v1976_v21 }
 0x578   : > { %1983 = vadd.xlane.f32.xlu1 %v1979_v57 }
 0x5a2   : > { %v1964_v40 = vpop.xlane.xlu1 %1963 }
 0x5a3   : > { %v1974_v1 = vmul.f32 %v1971_v33, %v1964_v40 }
 0x5a5   : > { %v1977_v9 = vsub.f32 %v1958_v17, %v1974_v1 }
 0x5a7   : > { %v1980_v53 = vmul.f32 %v1977_v9, %v1977_v9 }
 0x5a9   : > { %1985 = vadd.xlane.f32.xlu0 %v1980_v53 }
 0x5e3   : > { %v1982_v10 = vpop.xlane.xlu0 %1981 }
 0x5e4   : > { %v1987_v11 = vmul.f32 %v1982_v10, %v1971_v33 }
 0x5e6   : > { %v1990_v6 = vadd.f32 1e-12, %v1987_v11 }
 0x5e8   : > { %2740 = vrsqrt.f32 %v1990_v6  ;;  %vm1999_vm9 = vweird.f32 %v1990_v6 }
 0x5eb   : > { %v1984_v8 = vpop.xlane.xlu1 %1983 }
 0x5ec   : > { %v1988_v13 = vmul.f32 %v1984_v8, %v1971_v33 }
 0x5ee   : > { %v2741_v26 = vpop.eup %2740  ;;  %v1991_v42 = vadd.f32 1e-12, %v1988_v13 }
 0x5ef   : > { %v1994_v29 = vmul.f32 %v2741_v26, %v1990_v6  ;;  %vm2000_vm8 = vweird.f32 %v2741_v26 }
 0x5f0   : > { %2742 = vrsqrt.f32 %v1991_v42  ;;  %vm2001_vm10 = vmor %vm1999_vm9, %vm2000_vm8  ;;  %vm2009_vm12 = vweird.f32 %v1991_v42 }
 0x5f1   : > { %v1995_v19 = vmul.f32 %v2741_v26, %v1994_v29 }
 0x5f3   : > { %v1996_v20 = vmul.f32 0.5, %v1995_v19 }
 0x5f5   : > { %v1997_v47 = vsub.f32 1.5, %v1996_v20 }
 0x5f6   : > { %v2743_v16 = vpop.eup %2742 }
 0x5f7   : > { %v1998_v55 = vmul.f32 %v2741_v26, %v1997_v47  ;;  %v2004_v2 = vmul.f32 %v2743_v16, %v1991_v42  ;;  %vm2010_vm11 = vweird.f32 %v2743_v16 }
 0x5f8   : > { %vm2011_vm13 = vmor %vm2009_vm12, %vm2010_vm11 }
 0x5f9   : > { %v2002_v44 = vsel %vm2001_vm10, %v2741_v26, %v1998_v55  ;;  %v2005_v12 = vmul.f32 %v2743_v16, %v2004_v2 }
 0x5fa   : > { %v2023_v15 = vmul.f32 %v2002_v44, %v1975_v14 }
 0x5fb   : > { %v2006_v58 = vmul.f32 0.5, %v2005_v12 }
 0x5fc   : > { %v2027_v51 = vmul.f32 %v2664_v50, %v2023_v15 }
 0x5fd   : > { %v2007_v24 = vsub.f32 1.5, %v2006_v58 }
 0x5fe   : > { %v2031_v32 = vadd.f32 %v2665_v18, %v2027_v51 }
 0x5ff   : > { %v2008_v46 = vmul.f32 %v2743_v16, %v2007_v24 }
 0x600   : > { %2034 = vst [vmem:[%s3719_s23] sm:$0xff] %v2031_v32 }
 0x601   : > { %v2012_v34 = vsel %vm2011_vm13, %v2743_v16, %v2008_v46 }
 0x602   : > { %v2024_v28 = vmul.f32 %v2012_v34, %v1976_v21 }
 0x604   : > { %v2028_v63 = vmul.f32 %v2664_v50, %v2024_v28 }
 0x606   : > { %v2032_v22 = vadd.f32 %v2665_v18, %v2028_v63 }
 0x608   : > { %2035 = vst [vmem:[%s3719_s23 + $0x8] sm:$0xff] %v2032_v22 }
 0x61c   : > { %v1986_v0 = vpop.xlane.xlu0 %1985 }
 0x61d   : > { %v1989_v37 = vmul.f32 %v1986_v0, %v1971_v33 }
 0x61f   : > { %v1992_v38 = vadd.f32 1e-12, %v1989_v37 }
 0x621   : > { %2744 = vrsqrt.f32 %v1992_v38  ;;  %vm2019_vm15 = vweird.f32 %v1992_v38 }
 0x627   : > { %v2745_v4 = vpop.eup %2744 }
 0x628   : > { %v2014_v39 = vmul.f32 %v2745_v4, %v1992_v38  ;;  %vm2020_vm14 = vweird.f32 %v2745_v4 }
 0x629   : > { %vm2021_vm0 = vmor %vm2019_vm15, %vm2020_vm14 }
 0x62a   : > { %v2015_v56 = vmul.f32 %v2745_v4, %v2014_v39 }
 0x62c   : > { %v2016_v25 = vmul.f32 0.5, %v2015_v56 }
 0x62e   : > { %v2017_v27 = vsub.f32 1.5, %v2016_v25 }
 0x630   : > { %v2018_v31 = vmul.f32 %v2745_v4, %v2017_v27 }
 0x632   : > { %v2022_v36 = vsel %vm2021_vm0, %v2745_v4, %v2018_v31 }
 0x633   : > { %v2025_v43 = vmul.f32 %v2022_v36, %v1977_v9 }
 0x635   : > { %v2029_v48 = vmul.f32 %v2664_v50, %v2025_v43 }
 0x637   : > { %v2033_v45 = vadd.f32 %v2665_v18, %v2029_v48 }
 0x639   : > { %2036 = vst [vmem:[%s3719_s23 + $0x10] sm:$0xff] %v2033_v45 }
 0x63a   : > { %3016 = shalt.err (!%p3013_p8)
}
 0x63b   : > { %s3092_s15 = smov 128   ;;  %s3093_s25 = smov 8  }
 0x63c   : > { %2567 = dma.vmem_to_hbm [thread:$0]  (%p3253_p4), %s2051_s29, 384, %s2053_s12, %s2038_s20, %s3092_s15, %s3092_s15, %s3093_s25  }
 0x63d PF: > { %s2067_s17 = sand.u32 1, %s3063_s13   ;;  %p3796_p10 = scmp.ge.s32.totalorder %s3075_s16, 2 }
 0x63e   : > { %s2068_s3 = scalar_lea.sflag [#allocation6], %s2067_s17 }
 0x63f   : > { %p2596_p11 = pnand %p3796_p10, %p3257_p6 }
 0x641   : > { %p2597_p13 = pneg %p2596_p11 }
 0x643   : > { %3058 = dma.done.wait (%p2597_p13), %s2068_s3, 384  }
 0x644   : > { %3060 = vsyncadd (%p2597_p13), %s2068_s3, 4294966912  ;;  %s3797_s5 = sld [smem:[#allocation26_spill]]  ;;  %p29_p0 = scmp.ge.s32.totalorder %s3229_s11, 4  }
 0x645   : > { %s3798_s15 = sld [smem:[#allocation27_spill]]  ;;  %s3799_s13 = smov %s3067_s14 }
 0x646   : > { %s3801_s16 = smov %s3229_s11  ;;  %31 = sbr.rel (!%p29_p0) target bundleno = 18 (0x12), region = 142 }
 0x64a   : > { %s3800_s14 = smov %s3797_s5 }
 0x64b   :  { %2074 = vsyncpa [#allocation5], 1 }
 0x64c   :  { %2076 = vsyncpa [#allocation5 + $0x1], 1 }
 0x64d   :  { %2077 = vsyncpa [#allocation8], 1 }
 0x64e   :  { %2079 = vsyncpa [#allocation8 + $0x1], 1 }
 0x64f   :  { %2080 = vsyncpa [#allocation11], 1 }
 0x650   :  { %2081 = vsyncpa [#allocation14], 1 }
 0x651   :  { %2082 = vsyncpa [#allocation17], 1 }
 0x652   :  { %2083 = vsyncpa [#allocation6], 1 }
 0x653   :  { %2085 = vsyncpa [#allocation6 + $0x1], 1 }

// kernel: tpu_custom_call.1
= control target key start
LH: loop header
LB: loop body
LE: loop exit
PB: predicated region body
PF: predicated region fallthrough
CT: control target
= control target key end

     0   :  { %s3758_s0 = inlined_call_operand.hbm [shape: f32[2,24,128], index: 0, kind: input, shape index: {}]   ;;  %s3759_s1 = inlined_call_operand.hbm [shape: f32[2,1,128], index: 1, kind: input, shape index: {}]   ;;  %s3760_s2 = inlined_call_operand.hbm [shape: bf16[128,256], index: 2, kind: input, shape index: {}]   ;;  %s3761_s3 = inlined_call_operand.hbm [shape: bf16[128,256], index: 3, kind: input, shape index: {}]   ;;  %s3762_s4 = inlined_call_operand.vmem [shape: f32[1,256], index: 4, kind: input, shape index: {}]   ;;  %s3763_s5 = inlined_call_operand.hbm [shape: f32[1,256], index: 5, kind: input, shape index: {}]   ;;  %s3764_s6 = inlined_call_operand.hbm [shape: bf16[128,256], index: 6, kind: input, shape index: {}]   ;;  %s3765_s7 = inlined_call_operand.hbm [shape: f32[1,256], index: 7, kind: input, shape index: {}]   ;;  %s3766_s8 = inlined_call_operand.hbm [shape: bf16[128,128], index: 8, kind: input, shape index: {}]   ;;  %s3767_s9 = inlined_call_operand.vmem [shape: f32[3,128], index: 9, kind: input, shape index: {}]   ;;  %s3768_s10 = inlined_call_operand.hbm [shape: f32[2,24,128], index: 10, kind: output, shape index: {}]  }
   0x1   :  { %3772 = sst [smem:[#allocation28_spill]] %s3758_s0 }
   0x2   :  { %3773 = sst [smem:[#allocation29_spill]] %s3760_s2 }
   0x3   :  { %3774 = sst [smem:[#allocation30_spill]] %s3761_s3 }
   0x4   :  { %3775 = sst [smem:[#allocation31_spill]] %s3763_s5 }
   0x5   :  { %3776 = sst [smem:[#allocation32_spill]] %s3764_s6 }
   0x6   :  { %3777 = sst [smem:[#allocation33_spill]] %s3765_s7 }
   0x7   :  { %3778 = sst [smem:[#allocation34_spill]] %s3766_s8 }
   0x8   :  { %15 = vsyncpa [#allocation5], 0 }
   0x9   :  { %17 = vsyncpa [#allocation5 + $0x1], 0 }
   0xa   :  { %18 = vsyncpa [#allocation8], 0 }
   0xb   :  { %20 = vsyncpa [#allocation8 + $0x1], 0 }
   0xc   :  { %21 = vsyncpa [#allocation11], 0 }
   0xd   :  { %22 = vsyncpa [#allocation14], 0 }
   0xe   :  { %23 = vsyncpa [#allocation17], 0 }
   0xf   :  { %24 = vsyncpa [#allocation6], 0 }
  0x10   :  { %26 = vsyncpa [#allocation6 + $0x1], 0  ;;  %s3149_s13 = smov 0   ;;  %s3151_s14 = smov 0  }
  0x11   :  { %s3153_s15 = smov 0   ;;  %s3155_s16 = smov 0  }
  0x12 LB: > { %3779 = sst [smem:[#allocation26_spill]] %s3071_s15  ;;  %s3173_s20 = sadd.s32 4294967295, %s3075_s16   ;;  %s3075_s16 = sphi %s3155_s16, %s3801_s16   ;;  %s3071_s15 = sphi %s3153_s15, %s3798_s15   ;;  %s3067_s14 = sphi %s3151_s14, %s3800_s14   ;;  %s3063_s13 = sphi %s3149_s13, %s3799_s13  }
  0x13   : > { %s3780_s2 = sld [smem:[#allocation29_spill]]  ;;  %p2203_p0 = scmp.ge.s32.totalorder %s3075_s16, 1 }
  0x14   : > { %p53_p1 = scmp.eq.s32.totalorder %s3173_s20, 0  ;;  %p283_p2 = scmp.lt.s32.totalorder %s3075_s16, 3 }
  0x15   : > { %s3077_s22 = smov [#allocation9]   ;;  %s3782_s3 = sld [smem:[#allocation30_spill]] }
  0x16   : > { %p3178_p3 = pnand %p2203_p0, %p283_p2  ;;  %s296_s23 = sshll.u32 %s3077_s22, 4  ;;  %s297_s23 = int_to_ptr.vmem [resolvable:$true] %s296_s23 }
  0x17   : > { %s3784_s6 = sld [smem:[#allocation32_spill]]  ;;  %s3078_s11 = smov [#allocation10]  }
  0x18   : > { %p2569_p4 = pneg %p3178_p3  ;;  %s310_s12 = sshll.u32 %s3078_s11, 4  ;;  %s311_s12 = int_to_ptr.vmem [resolvable:$true] %s310_s12 }
  0x19   : > { %s294_s19 = sshll.u32 %s3780_s2, 4  ;;  %s3769_s17 = smov 128   ;;  %s295_s19 = int_to_ptr.hbm [resolvable:$true] %s294_s19 }
  0x1a   : > { %p3190_p6 = pnand %p2569_p4, %p53_p1  ;;  %s3770_s18 = smov 8  }
  0x1b   : > { %s308_s26 = sshll.u32 %s3782_s3, 4  ;;  %s3785_s5 = sld [smem:[#allocation31_spill]]  ;;  %s309_s26 = int_to_ptr.hbm [resolvable:$true] %s308_s26 }
  0x1c   : > { %2572 = dma.hbm_to_vmem [thread:$0]  (!%p3190_p6), %s295_s19, 2048, %s297_s23, [#allocation8], %s3769_s17, %s3769_s17, %s3770_s18  }
  0x1d   : > { %s337_s30 = sshll.u32 %s3784_s6, 4  ;;  %s3081_s28 = smov [#allocation13]   ;;  %s338_s30 = int_to_ptr.hbm [resolvable:$true] %s337_s30 }
  0x1e   : > { %2575 = dma.hbm_to_vmem [thread:$0]  (!%p3190_p6), %s309_s26, 2048, %s311_s12, [#allocation11], %s3769_s17, %s3769_s17, %s3770_s18  }
  0x1f   : > { %s339_s29 = sshll.u32 %s3081_s28, 4  ;;  %s3082_s19 = smov [#allocation12]   ;;  %s340_s29 = int_to_ptr.vmem [resolvable:$true] %s339_s29 }
  0x20   : > { %2581 = dma.hbm_to_vmem [thread:$0]  (!%p3190_p6), %s338_s30, 2048, %s340_s29, [#allocation14], %s3769_s17, %s3769_s17, %s3770_s18  }
  0x21   : > { %s326_s25 = sshll.u32 %s3785_s5, 4  ;;  %s328_s23 = sshll.u32 %s3082_s19, 4  ;;  %s327_s25 = int_to_ptr.hbm [resolvable:$true] %s326_s25  ;;  %s329_s23 = int_to_ptr.vmem [resolvable:$true] %s328_s23 }
  0x22   : > { %s3786_s7 = sld [smem:[#allocation33_spill]]  ;;  %s3083_s30 = smov [#allocation15]  }
  0x23   : > { %2578 = dma.hbm_to_vmem [thread:$0]  (!%p3190_p6), %s327_s25, 32, %s329_s23, [#allocation11]  }
  0x24   : > { %s3787_s8 = sld [smem:[#allocation34_spill]]  ;;  %s354_s28 = sshll.u32 %s3083_s30, 4  ;;  %s355_s28 = int_to_ptr.vmem [resolvable:$true] %s354_s28 }
  0x25   : > { %s3084_s2 = smov [#allocation16]   ;;  %s3085_s29 = smov 64  }
  0x26   : > { %s365_s25 = sshll.u32 %s3084_s2, 4  ;;  %s3086_s19 = smov 4   ;;  %s366_s25 = int_to_ptr.vmem [resolvable:$true] %s365_s25 }
  0x27   : > { %s2202_s23 = sadd.s32 4294967294, %s3075_s16   ;;  %s3229_s11 = sadd.s32 1, %s3075_s16  }
  0x28   : > { %s352_s26 = sshll.u32 %s3786_s7, 4  ;;  %s36_s12 = ssub.s32 %s3075_s16, %s3229_s11  ;;  %s353_s26 = int_to_ptr.hbm [resolvable:$true] %s352_s26 }
  0x29   : > { %2584 = dma.hbm_to_vmem [thread:$0]  (!%p3190_p6), %s353_s26, 32, %s355_s28, [#allocation14]  }
  0x2a   : > { %s363_s24 = sshll.u32 %s3787_s8, 4  ;;  %s39_s22 = sadd.s32 1, %s3071_s15  ;;  %s364_s24 = int_to_ptr.hbm [resolvable:$true] %s363_s24 }
  0x2b   : > { %2587 = dma.hbm_to_vmem [thread:$0]  (!%p3190_p6), %s364_s24, 1024, %s366_s25, [#allocation17], %s3085_s29, %s3085_s29, %s3086_s19  }
  0x2c   : > { %p37_p7 = scmp.eq.s32.totalorder %s36_s12, 0  ;;  %p46_p8 = scmp.ne.s32.totalorder %s3071_s15, %s3067_s14 }
  0x2d   : > { %p47_p9 = scmp.eq.s32.totalorder %s3075_s16, 0  ;;  %p52_p10 = scmp.ne.s32.totalorder %s3067_s14, %s3063_s13 }
  0x2e   : > { %s3240_s26 = scalar_select %p37_p7, %s3071_s15, %s39_s22  }
  0x2f   : > { %p48_p11 = por %p47_p9, %p46_p8  ;;  %p3244_p12 = por %p53_p1, %p52_p10 }
  0x30   : > { %3788 = sst [smem:[#allocation27_spill]] %s3240_s26  ;;  %p270_p13 = scmp.eq.s32.totalorder %s3173_s20, 1 }
  0x31   : > { %p276_p0 = scmp.eq.s32.totalorder %s2202_s23, 1  ;;  %p2605_p2 = scmp.lt.s32.totalorder %s3075_s16, 2 }
  0x32   : > { %s3251_s24 = sand.u32 1, %s3071_s15   ;;  %p3253_p4 = por %p270_p13, %p46_p8 }
  0x33   : > { %p3257_p6 = por %p276_p0, %p52_p10  ;;  %s2535_s2 = smul.u32 24, %s3251_s24 }
  0x34   : > { %s2536_s25 = smul.u32 24, %s3075_s16  ;;  %p3263_p7 = pnand %p2605_p2, %p48_p11 }
  0x35   : > { %s404_s19 = sand.u32 1, %s3075_s16   ;;  %s3793_s0 = sld [smem:[#allocation28_spill]] }
  0x36   : > { %s386_s17 = scalar_lea.vmem [#allocation4], %s2535_s2  ;;  %s383_s5 = scalar_lea.sflag [#allocation5], %s3251_s24 }
  0x37   : > { %s394_s18 = sshll.u32 %s386_s17, 4  ;;  %p2933_p9 = pneg %p3263_p7  ;;  %s395_s18 = int_to_ptr.vmem [resolvable:$true] %s394_s18 }
  0x3b   : > { %s391_s22 = scalar_lea.hbm %s3793_s0, %s2536_s25  ;;  %s2936_s25 = scalar_lea.hbm %s3793_s0, 48 }
  0x3c   : > { %s392_s3 = sshll.u32 %s391_s22, 4  ;;  %s393_s3 = int_to_ptr.hbm [resolvable:$true] %s392_s3 }
  0x3d   : > { %s2929_s6 = sshra.s32 %s393_s3, 4  ;;  %s2930_s6 = int_to_ptr.hbm [resolvable:$true] %s2929_s6 }
  0x3e   : > { %s2931_s7 = scalar_lea.hbm %s2930_s6, 24  ;;  %p2937_p13 = scmp.lt.s32.totalorder %s2930_s6, %s3793_s0 }
  0x3f   : > { %p2932_p8 = scmp.ne.s32.totalorder %s2930_s6, %s2931_s7  ;;  %p2938_p0 = scmp.lt.s32.totalorder %s2936_s25, %s2931_s7 }
  0x41   : > { %p2934_p10 = pnand %p2933_p9, %p2932_p8  ;;  %p2939_p2 = por %p2938_p0, %p2937_p13 }
  0x43   : > { %p2935_p11 = pneg %p2934_p10 }
  0x45   : > { %p2940_p5 = pnand %p2939_p2, %p2935_p11 }
  0x47   : > { %2943 = shalt.err (!%p2940_p5)
}
  0x48   : > { %s3794_s23 = smov 8   ;;  %s3795_s12 = smov 128  }
  0x49   : > { %2591 = dma.hbm_to_vmem [thread:$0]  (!%p3263_p7), %s393_s3, 384, %s395_s18, %s383_s5, %s3795_s12, %s3795_s12, %s3794_s23  }
  0x4a   : > { %s410_s26 = scalar_lea.hbm %s3759_s1, %s3075_s16  ;;  %s407_s15 = scalar_lea.vmem [#allocation7], %s3251_s24 }
  0x4b   : > { %s414_s2 = sshll.u32 %s407_s15, 4  ;;  %s412_s6 = sshll.u32 %s410_s26, 4  ;;  %s415_s2 = int_to_ptr.vmem [resolvable:$true] %s414_s2  ;;  %s413_s6 = int_to_ptr.hbm [resolvable:$true] %s412_s6 }
  0x4c   : > { %s405_s7 = scalar_lea.sflag [#allocation8], %s404_s19  ;;  %s2959_s25 = sshra.s32 %s413_s6, 4  ;;  %s2960_s25 = int_to_ptr.hbm [resolvable:$true] %s2959_s25 }
  0x4d   : > { %s2961_s17 = scalar_lea.hbm %s2960_s25, 1  ;;  %s2966_s5 = scalar_lea.hbm %s3759_s1, 2 }
  0x4e   : > { %p2962_p5 = scmp.ne.s32.totalorder %s2960_s25, %s2961_s17  ;;  %p2967_p11 = scmp.lt.s32.totalorder %s2960_s25, %s3759_s1 }
  0x4f   : > { %p2968_p13 = scmp.lt.s32.totalorder %s2966_s5, %s2961_s17 }
  0x50   : > { %p2964_p8 = pnand %p2962_p5, %p2933_p9 }
  0x51   : > { %p2969_p0 = por %p2968_p13, %p2967_p11 }
  0x52   : > { %p2965_p10 = pneg %p2964_p8 }
  0x54   : > { %p2970_p2 = pnand %p2969_p0, %p2965_p10 }
  0x56   : > { %2973 = shalt.err (!%p2970_p2)
}
  0x57   : > { %2594 = dma.hbm_to_vmem [thread:$0]  (!%p3263_p7), %s413_s6, 16, %s415_s2, %s405_s7  }
  0x58   : > { %423 = sbr.rel (%p3178_p3) target bundleno = 1597 (0x63d), region = 60  ;;  %s3307_s15 = sand.u32 (!%p3178_p3), 1, %s3067_s14  }
  0x59   : > { %s2537_s0 = smul.u32 (!%p3178_p3), 24, %s3307_s15  ;;  %s426_s24 = scalar_lea.sflag (!%p3178_p3), [#allocation5], %s3307_s15 }
  0x5b   : > { %s3313_s19 = scalar_lea.vmem (!%p3178_p3), [#allocation4], %s2537_s0 }
  0x5d   : > { %3034 = dma.done.wait (%p3244_p12), %s426_s24, 384  }
  0x5e   : > { %3036 = vsyncadd (%p3244_p12), %s426_s24, 4294966912  ;;  %s435_s21 = sand.u32 1, %s3173_s20   ;;  %s438_s12 = scalar_lea.vmem [#allocation7], %s3307_s15 }
  0x5f   : > { %s436_s29 = scalar_lea.sflag [#allocation8], %s435_s21 }
  0x60   : > { %3038 = dma.done.wait (%p3244_p12), %s436_s29, 16  }
  0x61   : > { %3040 = vsyncadd (%p3244_p12), %s436_s29, 4294967280 }
  0x62   : > { %3042 = dma.done.wait (%p53_p1), [#allocation8], 2048  }
  0x63   : > { %3044 = vsyncadd (%p53_p1), [#allocation8], 4294965248 }
  0x64   : > { %3046 = dma.done.wait (%p53_p1), [#allocation11], 2080  }
  0x65   : > { %3048 = vsyncadd (%p53_p1), [#allocation11], 4294965216 }
  0x66   : > { %3050 = dma.done.wait (%p53_p1), [#allocation14], 2080  }
  0x67   : > { %3052 = vsyncadd (%p53_p1), [#allocation14], 4294965216 }
  0x68   : > { %3054 = dma.done.wait (%p53_p1), [#allocation17], 1024  }
  0x69   : > { %3056 = vsyncadd (%p53_p1), [#allocation17], 4294966272  ;;  %v2277_v0 = vld [vmem:[#allocation9 + $0x70] sm:$0xf]  ;;  %v2493_v1 = vld [vmem:[#allocation9 + $0x74] sm:$0xf0] }
  0x6a   : > { %v2492_v2 = vld [vmem:[#allocation9 + $0x74] sm:$0xf]  ;;  %v2278_v3 = vor.u32 %v2493_v1, %v2277_v0  ;;  %v2279_v4 = vld [vmem:[#allocation9 + $0x78] sm:$0xf0]  ;;  %v2269_v5 = vld [vmem:[#allocation9 + $0x60] sm:$0xf] }
  0x6b   : > { %v2491_v6 = vld [vmem:[#allocation9 + $0x64] sm:$0xf0]  ;;  %v2282_v7 = vor.u32 %v2492_v2, %v2279_v4  ;;  %v2490_v8 = vld [vmem:[#allocation9 + $0x64] sm:$0xf]  ;;  %v2271_v9 = vld [vmem:[#allocation9 + $0x68] sm:$0xf0] }
  0x6c   : > { %625 = vmatpush.bf16.msra.mxu0 %v2278_v3  ;;  %v2270_v10 = vor.u32 %v2491_v6, %v2269_v5  ;;  %v2261_v11 = vld [vmem:[#allocation9 + $0x50] sm:$0xf]  ;;  %v2274_v12 = vor.u32 %v2490_v8, %v2271_v9  ;;  %v2489_v13 = vld [vmem:[#allocation9 + $0x54] sm:$0xf0]  ;;  %v2508_v14 = vld [vmem:[#allocation10 + $0x74] sm:$0xf] }
  0x6d   : > { %639 = vmatpush.bf16.msra.mxu1 %v2282_v7  ;;  %v2343_v15 = vld [vmem:[#allocation10 + $0x78] sm:$0xf0]  ;;  %v2488_v16 = vld [vmem:[#allocation9 + $0x54] sm:$0xf]  ;;  %v2506_v19 = vld [vmem:[#allocation10 + $0x64] sm:$0xf]  ;;  %v2262_v21 = vor.u32 %v2489_v13, %v2261_v11 }
  0x6e   : > { %v2263_v17 = vld [vmem:[#allocation9 + $0x58] sm:$0xf0]  ;;  %v2346_v18 = vor.u32 %v2508_v14, %v2343_v15  ;;  %v2335_v20 = vld [vmem:[#allocation10 + $0x68] sm:$0xf0]  ;;  %v2253_v22 = vld [vmem:[#allocation9 + $0x40] sm:$0xf] }
  0x6f   : > { %v2338_v23 = vor.u32 %v2506_v19, %v2335_v20  ;;  %v2266_v24 = vor.u32 %v2488_v16, %v2263_v17  ;;  %v2487_v25 = vld [vmem:[#allocation9 + $0x44] sm:$0xf0]  ;;  %v2504_v26 = vld [vmem:[#allocation10 + $0x54] sm:$0xf]  ;;  %v2327_v27 = vld [vmem:[#allocation10 + $0x58] sm:$0xf0] }
  0x70   : > { %626 = vmatpush.bf16.msra.mxu0 %v2270_v10  ;;  %772 = vmatpush.bf16.msra.mxu3 %v2346_v18  ;;  %v2486_v28 = vld [vmem:[#allocation9 + $0x44] sm:$0xf]  ;;  %v2255_v29 = vld [vmem:[#allocation9 + $0x48] sm:$0xf0]  ;;  %v2254_v30 = vor.u32 %v2487_v25, %v2253_v22  ;;  %v2245_v31 = vld [vmem:[#allocation9 + $0x30] sm:$0xf]  ;;  %v2330_v32 = vor.u32 %v2504_v26, %v2327_v27 }
  0x71   : > { %640 = vmatpush.bf16.msra.mxu1 %v2274_v12  ;;  %v2258_v33 = vor.u32 %v2486_v28, %v2255_v29  ;;  %v2485_v34 = vld [vmem:[#allocation9 + $0x34] sm:$0xf0]  ;;  %v2502_v35 = vld [vmem:[#allocation10 + $0x44] sm:$0xf]  ;;  %v2319_v36 = vld [vmem:[#allocation10 + $0x48] sm:$0xf0] }
  0x72   : > { %v2484_v37 = vld [vmem:[#allocation9 + $0x34] sm:$0xf]  ;;  %v2247_v38 = vld [vmem:[#allocation9 + $0x38] sm:$0xf0]  ;;  %v2246_v39 = vor.u32 %v2485_v34, %v2245_v31  ;;  %v2237_v40 = vld [vmem:[#allocation9 + $0x20] sm:$0xf]  ;;  %v2322_v41 = vor.u32 %v2502_v35, %v2319_v36 }
  0x73   : > { %v2250_v42 = vor.u32 %v2484_v37, %v2247_v38  ;;  %v2483_v43 = vld [vmem:[#allocation9 + $0x24] sm:$0xf0]  ;;  %v2500_v44 = vld [vmem:[#allocation10 + $0x34] sm:$0xf]  ;;  %v2311_v45 = vld [vmem:[#allocation10 + $0x38] sm:$0xf0] }
  0x74   : > { %627 = vmatpush.bf16.msra.mxu0 %v2262_v21  ;;  %773 = vmatpush.bf16.msra.mxu3 %v2338_v23  ;;  %v2482_v46 = vld [vmem:[#allocation9 + $0x24] sm:$0xf]  ;;  %v2239_v47 = vld [vmem:[#allocation9 + $0x28] sm:$0xf0]  ;;  %v2229_v48 = vld [vmem:[#allocation9 + $0x10] sm:$0xf]  ;;  %v2238_v50 = vor.u32 %v2483_v43, %v2237_v40  ;;  %v2314_v52 = vor.u32 %v2500_v44, %v2311_v45 }
  0x75   : > { %641 = vmatpush.bf16.msra.mxu1 %v2266_v24  ;;  %v2481_v49 = vld [vmem:[#allocation9 + $0x14] sm:$0xf0]  ;;  %v2480_v51 = vld [vmem:[#allocation9 + $0x14] sm:$0xf]  ;;  %v2498_v53 = vld [vmem:[#allocation10 + $0x24] sm:$0xf]  ;;  %v2242_v56 = vor.u32 %v2482_v46, %v2239_v47 }
  0x76   : > { %v2303_v54 = vld [vmem:[#allocation10 + $0x28] sm:$0xf0]  ;;  %v2341_v55 = vld [vmem:[#allocation10 + $0x70] sm:$0xf]  ;;  %v2509_v59 = vld [vmem:[#allocation10 + $0x74] sm:$0xf0]  ;;  %v2230_v0 = vor.u32 %v2481_v49, %v2229_v48 }
  0x77   : > { %v511_v57 = vld [vmem:[%s3313_s19] sm:$0xff]  ;;  %v512_v58 = vld [vmem:[%s3313_s19 + $0x8] sm:$0xff]  ;;  %v2342_v61 = vor.u32 %v2509_v59, %v2341_v55  ;;  %v2333_v62 = vld [vmem:[#allocation10 + $0x60] sm:$0xf]  ;;  %v2306_v5 = vor.u32 %v2498_v53, %v2303_v54  ;;  %s3087_s8 = smov 96   ;;  %s3088_s26 = smov 64  }
  0x78   : > { %628 = vmatpush.bf16.msra.mxu0 %v2254_v30  ;;  %774 = vmatpush.bf16.msra.mxu3 %v2330_v32  ;;  %v2231_v60 = vld [vmem:[#allocation9 + $0x18] sm:$0xf0]  ;;  %v2507_v63 = vld [vmem:[#allocation10 + $0x64] sm:$0xf0]  ;;  %v2221_v1 = vld [vmem:[#allocation9] sm:$0xf]  ;;  %v514_v6 = vpack.c.bf16 %v511_v57, %v511_v57  ;;  %v515_v7 = vpack.c.bf16 %v512_v58, %v512_v58 }
  0x79   : > { %642 = vmatpush.bf16.msra.mxu1 %v2258_v33  ;;  %v2479_v2 = vld [vmem:[#allocation9 + $0x4] sm:$0xf0]  ;;  %v2478_v3 = vld [vmem:[#allocation9 + $0x4] sm:$0xf]  ;;  %v2223_v4 = vld [vmem:[#allocation9 + $0x8] sm:$0xf0]  ;;  %v2234_v8 = vor.u32 %v2480_v51, %v2231_v60  ;;  %759 = vmatpush.bf16.msra.mxu2 %v2342_v61  ;;  %v2334_v12 = vor.u32 %v2507_v63, %v2333_v62 }
  0x7a   : > { %v2405_v9 = vld [vmem:[#allocation13 + $0x70] sm:$0xf]  ;;  %v2295_v11 = vld [vmem:[#allocation10 + $0x18] sm:$0xf0]  ;;  %v2505_v15 = vld [vmem:[#allocation10 + $0x54] sm:$0xf0]  ;;  %v2222_v16 = vor.u32 %v2479_v2, %v2221_v1  ;;  %v541_v17 = vunpack.c.l.b16 %v514_v6  ;;  %v542_v18 = vunpack.c.l.b16 %v515_v7  ;;  %v2226_v20 = vor.u32 %v2478_v3, %v2223_v4 }
  0x7b   : > { %v2496_v10 = vld [vmem:[#allocation10 + $0x14] sm:$0xf]  ;;  %v2525_v13 = vld [vmem:[#allocation13 + $0x74] sm:$0xf0]  ;;  %v2325_v14 = vld [vmem:[#allocation10 + $0x50] sm:$0xf] }
  0x7c   : > { %629 = vmatpush.bf16.msra.mxu0 %v2246_v39  ;;  %775 = vmatpush.bf16.msra.mxu3 %v2322_v41  ;;  %v2298_v19 = vor.u32 %v2496_v10, %v2295_v11  ;;  %v2406_v21 = vor.u32 %v2525_v13, %v2405_v9  ;;  %v2494_v22 = vld [vmem:[#allocation10 + $0x4] sm:$0xf]  ;;  %v2287_v23 = vld [vmem:[#allocation10 + $0x8] sm:$0xf0]  ;;  %v2326_v26 = vor.u32 %v2505_v15, %v2325_v14  ;;  %v2317_v27 = vld [vmem:[#allocation10 + $0x40] sm:$0xf] }
  0x7d   : > { %643 = vmatpush.bf16.msra.mxu1 %v2250_v42  ;;  %760 = vmatpush.bf16.msra.mxu2 %v2334_v12  ;;  %v2397_v24 = vld [vmem:[#allocation13 + $0x60] sm:$0xf]  ;;  %v2523_v25 = vld [vmem:[#allocation13 + $0x64] sm:$0xf0]  ;;  %v3343_v29 = vpack.c.b16 %v542_v18, %v541_v17  ;;  %v2290_v30 = vor.u32 %v2494_v22, %v2287_v23  ;;  %v2389_v33 = vld [vmem:[#allocation13 + $0x50] sm:$0xf] }
  0x7e   : > { %v2503_v28 = vld [vmem:[#allocation10 + $0x44] sm:$0xf0]  ;;  %v513_v31 = vld [vmem:[%s3313_s19 + $0x10] sm:$0xff]  ;;  %v2398_v32 = vor.u32 %v2523_v25, %v2397_v24  ;;  %v2309_v37 = vld [vmem:[#allocation10 + $0x30] sm:$0xf]  ;;  %vm951_vm0 = vcmask 261120  }
  0x7f   : > { %v2521_v34 = vld [vmem:[#allocation13 + $0x54] sm:$0xf0]  ;;  %v2318_v35 = vor.u32 %v2503_v28, %v2317_v27  ;;  %v516_v36 = vpack.c.bf16 %v513_v31, %v513_v31  ;;  %v2381_v40 = vld [vmem:[#allocation13 + $0x40] sm:$0xf]  ;;  %v2519_v41 = vld [vmem:[#allocation13 + $0x44] sm:$0xf0] }
  0x80   : > { %630 = vmatpush.bf16.msra.mxu0 %v2238_v50  ;;  %776 = vmatpush.bf16.msra.mxu3 %v2314_v52  ;;  %v2501_v38 = vld [vmem:[#allocation10 + $0x34] sm:$0xf0]  ;;  %v2390_v39 = vor.u32 %v2521_v34, %v2389_v33  ;;  %v2301_v43 = vld [vmem:[#allocation10 + $0x20] sm:$0xf]  ;;  %v2499_v44 = vld [vmem:[#allocation10 + $0x24] sm:$0xf0]  ;;  %v2382_v45 = vor.u32 %v2519_v41, %v2381_v40 }
  0x81   : > { %644 = vmatpush.bf16.msra.mxu1 %v2242_v56  ;;  %761 = vmatpush.bf16.msra.mxu2 %v2326_v26  ;;  %v2310_v42 = vor.u32 %v2501_v38, %v2309_v37  ;;  %v2373_v46 = vld [vmem:[#allocation13 + $0x30] sm:$0xf]  ;;  %v2517_v47 = vld [vmem:[#allocation13 + $0x34] sm:$0xf0]  ;;  %v2302_v48 = vor.u32 %v2499_v44, %v2301_v43  ;;  %v2365_v52 = vld [vmem:[#allocation13 + $0x20] sm:$0xf]  ;;  %v810_v1 = vunpack.c.l.b16 %v516_v36 }
  0x82   : > { %v2293_v49 = vld [vmem:[#allocation10 + $0x10] sm:$0xf]  ;;  %v2497_v50 = vld [vmem:[#allocation10 + $0x14] sm:$0xf0]  ;;  %v2374_v51 = vor.u32 %v2517_v47, %v2373_v46  ;;  %v2515_v53 = vld [vmem:[#allocation13 + $0x24] sm:$0xf0] }
  0x83   : > { %v2294_v54 = vor.u32 %v2497_v50, %v2293_v49  ;;  %v2285_v55 = vld [vmem:[#allocation10] sm:$0xf]  ;;  %v2495_v56 = vld [vmem:[#allocation10 + $0x4] sm:$0xf0]  ;;  %v2366_v57 = vor.u32 %v2515_v53, %v2365_v52  ;;  %v2357_v58 = vld [vmem:[#allocation13 + $0x10] sm:$0xf]  ;;  %v3349_v2 = vpack.c.b16 %v810_v1, %v810_v1 }
  0x84   : > { %631 = vmatpush.bf16.msra.mxu0 %v2230_v0  ;;  %777 = vmatpush.bf16.msra.mxu3 %v2306_v5  ;;  %v2513_v59 = vld [vmem:[#allocation13 + $0x14] sm:$0xf0]  ;;  %v2286_v60 = vor.u32 %v2495_v56, %v2285_v55  ;;  %v2349_v62 = vld [vmem:[#allocation13] sm:$0xf]  ;;  %v2511_v63 = vld [vmem:[#allocation13 + $0x4] sm:$0xf0] }
  0x85   : > { %645 = vmatpush.bf16.msra.mxu1 %v2234_v8  ;;  %762 = vmatpush.bf16.msra.mxu2 %v2318_v35  ;;  %v2358_v61 = vor.u32 %v2513_v59, %v2357_v58  ;;  %v2350_v0 = vor.u32 %v2511_v63, %v2349_v62  ;;  %v533_v3 = vld [vmem:[%s3762_s4] sm:$0x3]  ;;  %v673_v6 = vld [vmem:[#allocation12] sm:$0x3]  ;;  %s3089_s2 = smov 32   ;;  %s3090_s6 = smov 112  }
  0x86   : > { %v536_v5 = vperm.slane %v533_v3, 1  ;;  %v676_v10 = vperm.slane %v673_v6, 1  ;;  %v535_v17 = vperm.slane %v533_v3, 0  ;;  %v675_v35 = vperm.slane %v673_v6, 0  ;;  %v2524_v47 = vld [vmem:[#allocation13 + $0x74] sm:$0xf] }
  0x87   : > { %v2522_v50 = vld [vmem:[#allocation13 + $0x64] sm:$0xf]  ;;  %v2520_v52 = vld [vmem:[#allocation13 + $0x54] sm:$0xf]  ;;  %v2367_v63 = vld [vmem:[#allocation13 + $0x28] sm:$0xf0] }
  0x88   : > { %632 = vmatpush.bf16.msra.mxu0 %v2222_v16  ;;  %778 = vmatpush.bf16.msra.mxu3 %v2298_v19  ;;  %v2518_v56 = vld [vmem:[#allocation13 + $0x44] sm:$0xf]  ;;  %v2516_v58 = vld [vmem:[#allocation13 + $0x34] sm:$0xf]  ;;  %v2359_v3 = vld [vmem:[#allocation13 + $0x18] sm:$0xf0] }
  0x89   : > { %646 = vmatpush.bf16.msra.mxu1 %v2226_v20  ;;  %763 = vmatpush.bf16.msra.mxu2 %v2310_v42  ;;  %v2514_v62 = vld [vmem:[#allocation13 + $0x24] sm:$0xf]  ;;  %vm1024_vm1 = vcmask 130048   ;;  %vm1034_vm2 = vcmask 64512   ;;  %vm1096_vm3 = vcmask 1043456   ;;  %vm1393_vm4 = vcmask 523520  }
  0x8a   : > { %v2370_v1 = vor.u32 %v2514_v62, %v2367_v63  ;;  %v2510_v6 = vld [vmem:[#allocation13 + $0x4] sm:$0xf]  ;;  %vm1627_vm5 = vcmask 785920   ;;  %vm1861_vm6 = vcmask 1048320   ;;  %s3719_s23 = scalar_lea.vmem [#allocation18], %s2537_s0  ;;  %s2538_s0 = smul.u32 24, %s3173_s20 }
  0x8b   : > { %633 = vmatmul.bf16.vlgmr.msra.gmra.mxu0 %v3343_v29  ;;  %s2050_s29 = sshll.u32 %s3719_s23, 4  ;;  %s2038_s20 = scalar_lea.sflag [#allocation6], %s3307_s15  ;;  %s2051_s29 = int_to_ptr.vmem [resolvable:$true] %s2050_s29 }
  0x8c   : > { %893 = vmatpush.bf16.msrb.mxu0 %v2406_v21  ;;  %647 = vmatmul.bf16.vlgmr.msra.gmra.mxu1 %v3343_v29  ;;  %v3360_v21 = vld [vmem:[#allocation15] sm:$0x3]  ;;  %s2049_s21 = scalar_lea.hbm %s3768_s10, %s2538_s0 }
  0x8d   : > { %779 = vmatpush.bf16.msra.mxu3 %v2290_v30  ;;  %764 = vmatpush.bf16.msra.mxu2 %v2302_v48  ;;  %v805_v25 = vperm.slane %v3360_v21, 0  ;;  %v2407_v48 = vld [vmem:[#allocation13 + $0x78] sm:$0xf0] }
  0x8e   : > { %v2410_v49 = vor.u32 %v2524_v47, %v2407_v48 }
  0x90   : > { %894 = vmatpush.bf16.msrb.mxu0 %v2398_v32  ;;  %780 = vmatmul.bf16.vlgmr.msra.gmra.mxu3 %v516_v36 }
  0x91   : > { %765 = vmatpush.bf16.msra.mxu2 %v2294_v54  ;;  %911 = vmatpush.bf16.msrb.mxu1 %v2410_v49  ;;  %v2391_v54 = vld [vmem:[#allocation13 + $0x58] sm:$0xf0] }
  0x92   : > { %v2394_v55 = vor.u32 %v2520_v52, %v2391_v54 }
  0x94   : > { %895 = vmatpush.bf16.msrb.mxu0 %v2390_v39 }
  0x95   : > { %766 = vmatpush.bf16.msra.mxu2 %v2286_v60  ;;  %v2375_v60 = vld [vmem:[#allocation13 + $0x38] sm:$0xf0] }
  0x98   : > { %896 = vmatpush.bf16.msrb.mxu0 %v2382_v45  ;;  %767 = vmatmul.bf16.vlgmr.msra.gmra.mxu2 %v516_v36 }
  0x9c   : > { %897 = vmatpush.bf16.msrb.mxu0 %v2374_v51  ;;  %v2399_v51 = vld [vmem:[#allocation13 + $0x68] sm:$0xf0] }
  0x9d   : > { %v2402_v53 = vor.u32 %v2522_v50, %v2399_v51 }
  0x9f   : > { %912 = vmatpush.bf16.msrb.mxu1 %v2402_v53 }
  0xa0   : > { %898 = vmatpush.bf16.msrb.mxu0 %v2366_v57  ;;  %v2383_v57 = vld [vmem:[#allocation13 + $0x48] sm:$0xf0] }
  0xa1   : > { %v2386_v59 = vor.u32 %v2518_v56, %v2383_v57 }
  0xa3   : > { %913 = vmatpush.bf16.msrb.mxu1 %v2394_v55 }
  0xa4   : > { %899 = vmatpush.bf16.msrb.mxu0 %v2358_v61  ;;  %v2378_v61 = vor.u32 %v2516_v58, %v2375_v60  ;;  %v806_v58 = vperm.slane %v3360_v21, 1 }
  0xa7   : > { %914 = vmatpush.bf16.msrb.mxu1 %v2386_v59 }
  0xa8   : > { %900 = vmatpush.bf16.msrb.mxu0 %v2350_v0  ;;  %v2512_v0 = vld [vmem:[#allocation13 + $0x14] sm:$0xf] }
  0xab   : > { %901 = vmatmul.bf16.vlgmr.msrb.gmra.mxu0 %v3343_v29  ;;  %915 = vmatpush.bf16.msrb.mxu1 %v2378_v61 }
  0xaf   : > { %916 = vmatpush.bf16.msrb.mxu1 %v2370_v1 }
  0xbb   : > { %906 = vmatmul.bf16.gmra.mxu0 %v3349_v2 }
 0x108   : > { %v634_v12 = vpop.f32.mrf.mxu0 }
 0x109   : > { %v648_v4 = vpop.f32.mrf.mxu1  ;;  %v635_v19 = vadd.f32 %v634_v12, %v535_v17 }
 0x10a   : > { %v649_v7 = vadd.f32 %v648_v4, %v536_v5  ;;  %v3389_v4 = vld [vmem:[%s438_s12] ss:$0 sm:$0xff]  ;;  %s2052_s12 = sshll.u32 %s2049_s21, 4  ;;  %s2053_s12 = int_to_ptr.hbm [resolvable:$true] %s2052_s12 }
 0x10b   : > { %s3003_s27 = sshra.s32 %s2053_s12, 4  ;;  %s3004_s27 = int_to_ptr.hbm [resolvable:$true] %s3003_s27 }
 0x10c   : > { %s3005_s22 = scalar_lea.hbm %s3004_s27, 24  ;;  %p3010_p7 = scmp.lt.s32.totalorder %s3004_s27, %s3768_s10 }
 0x10d   : > { %p3006_p1 = scmp.ne.s32.totalorder %s3004_s27, %s3005_s22 }
 0x10f   : > { %p3007_p3 = pnand %p3006_p1, %p3253_p4 }
 0x110   : > { %v636_v18 = vpop.f32.mrf.mxu0 }
 0x111   : > { %v650_v8 = vpop.f32.mrf.mxu1  ;;  %v637_v20 = vadd.f32 %v636_v18, %v535_v17  ;;  %p3008_p12 = pneg %p3007_p3 }
 0x112   : > { %v651_v9 = vadd.f32 %v650_v8, %v536_v5  ;;  %v2362_v5 = vor.u32 %v2512_v0, %v2359_v3 }
 0x113   : > { %v781_v11 = vpop.f32.mrf.mxu3  ;;  %v939_v22 = vpack.c.bf16 %v637_v20, %v635_v19 }
 0x114   : > { %v3355_v13 = vpack.c.bf16 %v651_v9, %v649_v7  ;;  %v782_v14 = vadd.f32 %v781_v11, %v676_v10  ;;  %917 = vmatpush.bf16.msrb.mxu1 %v2362_v5  ;;  %v2351_v7 = vld [vmem:[#allocation13 + $0x8] sm:$0xf0] }
 0x115   : > { %v2354_v8 = vor.u32 %v2510_v6, %v2351_v7 }
 0x116   : > { %1210 = vrot.lane.b32.xlu2 %v3355_v13, %s3087_s8  ;;  %v945_v15 = vpack.c.bf16 %v782_v14, %v782_v14 }
 0x118   : > { %918 = vmatpush.bf16.msrb.mxu1 %v2354_v8 }
 0x11b   : > { %v783_v16 = vpop.f32.mrf.mxu3  ;;  %v768_v23 = vpop.f32.mrf.mxu2  ;;  %919 = vmatmul.bf16.vlgmr.msrb.gmra.mxu1 %v3343_v29 }
 0x11c   : > { %v769_v40 = vadd.f32 %v768_v23, %v675_v35 }
 0x11e   : > { %1212 = vrot.lane.b32.xlu2 %v945_v15, %s3087_s8  ;;  %v940_v43 = vpack.c.bf16 %v769_v40, %v769_v40 }
 0x123   : > { %v770_v27 = vpop.f32.mrf.mxu2 }
 0x126   : > { %1409 = vrot.lane.b32.xlu2 %v939_v22, %s3088_s26 }
 0x128   : > { %v902_v24 = vpop.f32.mrf.mxu0 }
 0x129   : > { %v903_v26 = vadd.f32 %v902_v24, %v805_v25 }
 0x12b   : > { %v929_v30 = vpack.c.bf16 %v903_v26, %v903_v26  ;;  %924 = vmatmul.bf16.gmra.mxu1 %v3349_v2 }
 0x12d   : > { %v948_v33 = vunpack.c.l.b16 %v929_v30 }
 0x12e   : > { %1452 = vrot.lane.b32.xlu2 %v945_v15, %s3088_s26 }
 0x130   : > { %v904_v28 = vpop.f32.mrf.mxu0 }
 0x131   : > { %v905_v31 = vadd.f32 %v904_v28, %v805_v25 }
 0x133   : > { %v930_v32 = vpack.c.bf16 %v905_v31, %v905_v31 }
 0x135   : > { %v949_v34 = vunpack.c.l.b16 %v930_v32 }
 0x136   : > { %1643 = vrot.lane.b32.xlu2 %v939_v22, %s3089_s2 }
 0x137   : > { %v950_v36 = vpack.c.b16 %v949_v34, %v948_v33 }
 0x138   : > { %v907_v37 = vpop.f32.mrf.mxu0 }
 0x139   : > { %v908_v38 = vadd.f32 %v907_v37, %v805_v25  ;;  %1173 = vrot.lane.b32.xlu0 %v950_v36, %s3087_s8  ;;  %v959_v39 = vsel %vm951_vm0, %v950_v36, 0 }
 0x13a   : > { %968 = vmatpush.bf16.xpose.msrb.mxu2 %v959_v39 }
 0x13b   : > { %v931_v41 = vpack.c.bf16 %v908_v38, %v908_v38 }
 0x13d   : > { %v1215_v42 = vunpack.c.l.b16 %v931_v41  ;;  %v995_v44 = vsel %vm951_vm0, %v931_v41, 0 }
 0x13e   : > { %1004 = vmatpush.bf16.xpose.msrb.mxu3 %v995_v44  ;;  %1686 = vrot.lane.b32.xlu2 %v945_v15, %s3089_s2 }
 0x13f   : > { %v1216_v45 = vpack.c.b16 %v1215_v42, %v1215_v42 }
 0x140   : > { %v909_v46 = vpop.f32.mrf.mxu0 }
 0x141   : > { %1217 = vrot.lane.b32.xlu1 %v1216_v45, %s3087_s8  ;;  %1171 = vrot.lane.b32.xlu0 %v940_v43, %s3087_s8 }
 0x142   : > { %2411 = vmatmul.msk.bf16.vlgmr.msrb.gmra.mxu2 %vm951_vm0, %v939_v22 }
 0x145   : > { %2413 = vmatmul.msk.bf16.vlgmr.msrb.gmra.mxu3 %vm951_vm0, %v3355_v13 }
 0x149   : > { %1413 = vrot.lane.b32.xlu0 %v950_v36, %s3088_s26  ;;  %1169 = vrot.lane.b32.xlu1 %v939_v22, %s3087_s8 }
 0x151   : > { %1450 = vrot.lane.b32.xlu0 %v3355_v13, %s3088_s26  ;;  %1454 = vrot.lane.b32.xlu1 %v1216_v45, %s3088_s26 }
 0x152   : > { %2412 = vmatmul.msk.bf16.gmra.mxu2 %vm951_vm0, %v940_v43 }
 0x155   : > { %2414 = vmatmul.msk.bf16.gmra.mxu3 %vm951_vm0, %v945_v15 }
 0x159   : > { %1647 = vrot.lane.b32.xlu0 %v950_v36, %s3089_s2  ;;  %1411 = vrot.lane.b32.xlu1 %v940_v43, %s3088_s26 }
 0x161   : > { %1684 = vrot.lane.b32.xlu0 %v3355_v13, %s3089_s2  ;;  %1688 = vrot.lane.b32.xlu1 %v1216_v45, %s3089_s2 }
 0x169   : > { %1018 = vrot.lane.b32.xlu0 %v3389_v4, %s3090_s6  ;;  %1645 = vrot.lane.b32.xlu1 %v940_v43, %s3089_s2 }
 0x170   : > { %v1211_v14 = vpop.permute.xlu2 %1210 }
 0x178   : > { %v1213_v29 = vpop.permute.xlu2 %1212 }
 0x180   : > { %v1410_v25 = vpop.permute.xlu2 %1409 }
 0x188   : > { %v1453_v55 = vpop.permute.xlu2 %1452 }
 0x190   : > { %v1644_v57 = vpop.permute.xlu2 %1643 }
 0x198   : > { %v920_v59 = vpop.f32.mrf.mxu1 }
 0x199   : > { %v921_v60 = vadd.f32 %v920_v59, %v806_v58 }
 0x19b   : > { %v932_v61 = vpack.c.bf16 %v921_v60, %v921_v60 }
 0x19d   : > { %v1120_v0 = vunpack.c.l.b16 %v932_v61 }
 0x1a0   : > { %v922_v62 = vpop.f32.mrf.mxu1 }
 0x1a1   : > { %v923_v63 = vadd.f32 %v922_v62, %v806_v58 }
 0x1a3   : > { %v933_v1 = vpack.c.bf16 %v923_v63, %v923_v63 }
 0x1a5   : > { %v1121_v5 = vunpack.c.l.b16 %v933_v1 }
 0x1a7   : > { %v3444_v6 = vpack.c.b16 %v1121_v5, %v1120_v0 }
 0x1a8   : > { %v925_v7 = vpop.f32.mrf.mxu1 }
 0x1a9   : > { %v926_v21 = vadd.f32 %v925_v7, %v806_v58  ;;  %1137 = vmatpush.bf16.msra.mxu3 %v3444_v6 }
 0x1ab   : > { %v1174_v9 = vpop.permute.xlu0 %1173  ;;  %v934_v8 = vpack.c.bf16 %v926_v21, %v926_v21 }
 0x1ac   : > { %v1182_v10 = vsel %vm951_vm0, %v1174_v9, 0 }
 0x1ad   : > { %1191 = vmatpush.bf16.xpose.msra.mxu0 %v1182_v10  ;;  %2534 = vmatpush.bf16.xpose.msra.mxu1 %v1182_v10  ;;  %v1098_v9 = vsel %vm1096_vm3, %v934_v8, 0 }
 0x1ae   : > { %1107 = vmatpush.bf16.msra.mxu2 %v1098_v9 }
 0x1b0   : > { %v927_v10 = vpop.f32.mrf.mxu1 }
 0x1b3   : > { %v1218_v11 = vpop.permute.xlu1 %1217  ;;  %v1172_v12 = vpop.permute.xlu0 %1171 }
 0x1b4   : > { %v1226_v13 = vsel %vm951_vm0, %v1218_v11, 0  ;;  %2420 = vmatmul.msk.bf16.vlgmr.msra.gmra.mxu1 %vm951_vm0, %v1172_v12  ;;  %v1687_v11 = vpop.permute.xlu2 %1686 }
 0x1b5   : > { %1235 = vmatpush.bf16.xpose.msrb.mxu1 %v1226_v13 }
 0x1bb   : > { %v1414_v15 = vpop.permute.xlu0 %1413  ;;  %v1170_v16 = vpop.permute.xlu1 %1169 }
 0x1bc   : > { %v1422_v17 = vsel %vm951_vm0, %v1414_v15, 0  ;;  %2419 = vmatmul.msk.bf16.vlgmr.msra.gmra.mxu0 %vm951_vm0, %v1170_v16 }
 0x1bd   : > { %1431 = vmatpush.bf16.xpose.msrb.mxu0 %v1422_v17 }
 0x1c3   : > { %v1451_v2 = vpop.permute.xlu0 %1450  ;;  %v1455_v18 = vpop.permute.xlu1 %1454 }
 0x1c4   : > { %v1463_v19 = vsel %vm951_vm0, %v1455_v18, 0  ;;  %2421 = vmatmul.msk.bf16.vlgmr.msrb.gmra.mxu1 %vm951_vm0, %v1211_v14 }
 0x1c5   : > { %v970_v20 = vpop.f32.mrf.mxu2  ;;  %1472 = vmatpush.bf16.xpose.msra.mxu1 %v1463_v19 }
 0x1c6   : > { %v979_v22 = vmul.f32 0.17677669, %v970_v20 }
 0x1c8   : > { %v3403_v23 = vadd.f32 %v3389_v4, %v979_v22  ;;  %v1006_v24 = vpop.f32.mrf.mxu3 }
 0x1c9   : > { %v1015_v41 = vmul.f32 0.17677669, %v1006_v24 }
 0x1ca   : > { %v1025_v26 = vsel %vm1024_vm1, %v3403_v23, -inf }
 0x1cb   : > { %1026 = vmax.xlane.f32.xlu1 %v1025_v26  ;;  %v1648_v27 = vpop.permute.xlu0 %1647  ;;  %v1412_v28 = vpop.permute.xlu1 %1411 }
 0x1cc   : > { %v1656_v30 = vsel %vm951_vm0, %v1648_v27, 0  ;;  %2427 = vmatmul.msk.bf16.vlgmr.msrb.gmra.mxu0 %vm951_vm0, %v1410_v25 }
 0x1cd   : > { %v972_v31 = vpop.f32.mrf.mxu2  ;;  %1665 = vmatpush.bf16.xpose.msra.mxu0 %v1656_v30 }
 0x1ce   : > { %v980_v32 = vmul.f32 0.17677669, %v972_v31 }
 0x1d0   : > { %v3410_v33 = vadd.f32 %v3389_v4, %v980_v32  ;;  %v1008_v34 = vpop.f32.mrf.mxu3 }
 0x1d1   : > { %v1016_v42 = vmul.f32 0.17677669, %v1008_v34 }
 0x1d2   : > { %v1028_v35 = vsel %vm1024_vm1, %v3410_v33, -inf }
 0x1d3   : > { %1029 = vmax.xlane.f32.xlu2 %v1028_v35  ;;  %v1685_v36 = vpop.permute.xlu0 %1684  ;;  %v1689_v37 = vpop.permute.xlu1 %1688 }
 0x1d4   : > { %v1697_v38 = vsel %vm951_vm0, %v1689_v37, 0  ;;  %2422 = vmatmul.msk.bf16.gmra.mxu1 %vm951_vm0, %v1213_v29 }
 0x1d5   : > { %1706 = vmatpush.bf16.xpose.msrb.mxu1 %v1697_v38  ;;  %v975_v39 = vpop.f32.mrf.mxu2 }
 0x1d6   : > { %v981_v40 = vmul.f32 0.17677669, %v975_v39 }
 0x1d8   : > { %v1011_v43 = vpop.f32.mrf.mxu3  ;;  %v3417_v44 = vadd.f32 %v3389_v4, %v981_v40 }
 0x1d9   : > { %v1017_v49 = vmul.f32 0.17677669, %v1011_v43 }
 0x1da   : > { %v1031_v45 = vsel %vm1024_vm1, %v3417_v44, -inf }
 0x1db   : > { %v3421_v46 = vpop.permute.xlu0 %1018  ;;  %1032 = vmax.xlane.f32.xlu1 %v1031_v45  ;;  %v1646_v3 = vpop.permute.xlu1 %1645 }
 0x1dc   : > { %2428 = vmatmul.msk.bf16.gmra.mxu0 %vm951_vm0, %v1412_v28  ;;  %v3425_v47 = vadd.f32 %v3421_v46, %v1015_v41  ;;  %v3428_v48 = vadd.f32 %v3421_v46, %v1016_v42  ;;  %v3435_v53 = vadd.f32 %v3421_v46, %v1017_v49  ;;  %v1317_v41 = vunpack.c.l.b16 %v934_v8 }
 0x1dd   : > { %v977_v50 = vpop.f32.mrf.mxu2 }
 0x1de   : > { %v1035_v51 = vsel %vm1034_vm2, %v3425_v47, -inf  ;;  %v1038_v52 = vsel %vm1034_vm2, %v3428_v48, -inf  ;;  %v1041_v56 = vsel %vm1034_vm2, %v3435_v53, -inf }
 0x1df   : > { %1036 = vmax.xlane.f32.xlu0 %v1035_v51  ;;  %1039 = vmax.xlane.f32.xlu2 %v1038_v52 }
 0x1e0   : > { %v1013_v54 = vpop.f32.mrf.mxu3 }
 0x1e4   : > { %2429 = vmatmul.msk.bf16.vlgmr.msra.gmra.mxu1 %vm951_vm0, %v1451_v2 }
 0x1e7   : > { %1042 = vmax.xlane.f32.xlu2 %v1041_v56 }
 0x1ec   : > { %2435 = vmatmul.msk.bf16.vlgmr.msra.gmra.mxu0 %vm951_vm0, %v1644_v57 }
 0x1f4   : > { %2430 = vmatmul.msk.bf16.gmra.mxu1 %vm951_vm0, %v1453_v55  ;;  %v3484_v55 = vpack.c.b16 %v1317_v41, %v1317_v41 }
 0x1fc   : > { %2436 = vmatmul.msk.bf16.gmra.mxu0 %vm951_vm0, %v1646_v3 }
 0x1ff   : > { %1348 = vrot.lane.b32.xlu2 %v3444_v6, %s3087_s8 }
 0x204   : > { %2437 = vmatmul.msk.bf16.vlgmr.msrb.gmra.mxu1 %vm951_vm0, %v1685_v36 }
 0x214   : > { %2438 = vmatmul.msk.bf16.gmra.mxu1 %vm951_vm0, %v1687_v11 }
 0x231   : > { %v1198_v12 = vpop.f32.mrf.mxu1 }
 0x232   : > { %v1204_v16 = vmul.f32 0.17677669, %v1198_v12 }
 0x234   : > { %v3458_v2 = vadd.f32 %v3389_v4, %v1204_v16 }
 0x236   : > { %v1258_v24 = vsel %vm1024_vm1, %v3458_v2, -inf }
 0x239   : > { %v1193_v13 = vpop.f32.mrf.mxu0  ;;  %v1200_v14 = vpop.f32.mrf.mxu1 }
 0x23a   : > { %v1202_v15 = vmul.f32 0.17677669, %v1193_v13 }
 0x23c   : > { %v3453_v17 = vadd.f32 %v3389_v4, %v1202_v15 }
 0x23e   : > { %v1252_v29 = vsel %vm1024_vm1, %v3453_v17, -inf  ;;  %v1027_v34 = vpop.xlane.xlu1 %1026 }
 0x23f   : > { %1253 = vmax.xlane.f32.xlu0 %v1252_v29 }
 0x241   : > { %v1195_v18 = vpop.f32.mrf.mxu0  ;;  %v1237_v19 = vpop.f32.mrf.mxu1 }
 0x242   : > { %v1203_v20 = vmul.f32 0.17677669, %v1195_v18  ;;  %v1246_v22 = vmul.f32 0.17677669, %v1237_v19 }
 0x244   : > { %v3463_v25 = vadd.f32 %v1246_v22, %v3421_v46  ;;  %v3466_v26 = vadd.f32 %v3389_v4, %v1203_v20 }
 0x246   : > { %v1261_v27 = vsel %vm1034_vm2, %v3463_v25, -inf  ;;  %v1255_v28 = vsel %vm1024_vm1, %v3466_v26, -inf  ;;  %v1030_v32 = vpop.xlane.xlu2 %1029 }
 0x247   : > { %1259 = vmax.xlane.f32.xlu0 %v1258_v24  ;;  %1262 = vmax.xlane.f32.xlu2 %v1261_v27 }
 0x248   : > { %1256 = vmax.xlane.f32.xlu1 %v1255_v28 }
 0x249   : > { %v3472_v30 = vpop.f32.mrf.mxu1  ;;  %v3474_v31 = vpop.f32.mrf.mxu0 }
 0x24a   : > { %v1442_v24 = vmul.f32 0.17677669, %v3474_v31 }
 0x24c   : > { %v3530_v27 = vadd.f32 %v3389_v4, %v1442_v24 }
 0x251   : > { %v3476_v35 = vpop.f32.mrf.mxu1  ;;  %v3478_v36 = vpop.f32.mrf.mxu0 }
 0x252   : > { %v1037_v37 = vpop.xlane.xlu0 %1036  ;;  %v1040_v38 = vpop.xlane.xlu2 %1039 }
 0x253   : > { %v1044_v39 = vmax.f32 %v1027_v34, %v1037_v37  ;;  %v1045_v40 = vmax.f32 %v1030_v32, %v1040_v38  ;;  %v1443_v34 = vmul.f32 0.17677669, %v3478_v36  ;;  %v1247_v38 = vmul.f32 0.17677669, %v3472_v30 }
 0x255   : > { %v1047_v42 = vsub.f32 %v3403_v23, %v1044_v39  ;;  %v1056_v43 = vsub.f32 %v3425_v47, %v1044_v39  ;;  %v1048_v45 = vsub.f32 %v3410_v33, %v1045_v40  ;;  %v1057_v49 = vsub.f32 %v3428_v48, %v1045_v40  ;;  %v1033_v23 = vpop.xlane.xlu1 %1032 }
 0x256   : > { %v1489_v39 = vsel %vm1024_vm1, %v3530_v27, -inf  ;;  %v3542_v41 = vadd.f32 %v3389_v4, %v1443_v34 }
 0x257   : > { %v1050_v50 = vmul.f32 1.442695, %v1047_v42  ;;  %v1059_v51 = vmul.f32 1.442695, %v1056_v43  ;;  %v1052_v52 = vmul.f32 1.442695, %v1048_v45  ;;  %v3545_v42 = vadd.f32 %v1247_v38, %v3421_v46 }
 0x258   : > { %v1061_v54 = vmul.f32 1.442695, %v1057_v49  ;;  %v1492_v30 = vsel %vm1024_vm1, %v3542_v41, -inf  ;;  %v1248_v45 = vmul.f32 0.17677669, %v3476_v35 }
 0x259   : > { %2666 = vpow2.f32 %v1050_v50  ;;  %v1244_v56 = vpop.f32.mrf.mxu1  ;;  %v1438_v57 = vpop.f32.mrf.mxu0  ;;  %v1264_v49 = vsel %vm1034_vm2, %v3545_v42, -inf }
 0x25a   : > { %2668 = vpow2.f32 %v1059_v51  ;;  %v1043_v58 = vpop.xlane.xlu2 %1042  ;;  %v1444_v43 = vmul.f32 0.17677669, %v1438_v57  ;;  %v3556_v51 = vadd.f32 %v1248_v45, %v3421_v46 }
 0x25b   : > { %2670 = vpow2.f32 %v1052_v52  ;;  %1553 = vrot.lane.b32.xlu0 %v3484_v55, %s3088_s26  ;;  %v1046_v33 = vmax.f32 %v1033_v23, %v1043_v58 }
 0x25c   : > { %2672 = vpow2.f32 %v1061_v54  ;;  %v3553_v50 = vadd.f32 %v3389_v4, %v1444_v43  ;;  %v1267_v35 = vsel %vm1034_vm2, %v3556_v51, -inf }
 0x25d   : > { %v1049_v60 = vsub.f32 %v3417_v44, %v1046_v33  ;;  %v1058_v1 = vsub.f32 %v3435_v53, %v1046_v33 }
 0x25e   : > { %v1495_v56 = vsel %vm1024_vm1, %v3553_v50, -inf }
 0x25f   : > { %v3488_v47 = vpop.eup %2666  ;;  %v1054_v7 = vmul.f32 1.442695, %v1049_v60  ;;  %v1063_v21 = vmul.f32 1.442695, %v1058_v1 }
 0x260   : > { %v3490_v48 = vpop.eup %2668 }
 0x261   : > { %v3492_v59 = vpop.eup %2670  ;;  %1319 = vrot.lane.b32.xlu1 %v3484_v55, %s3087_s8  ;;  %v1440_v61 = vpop.f32.mrf.mxu0  ;;  %2674 = vpow2.f32 %v1054_v7 }
 0x262   : > { %v1474_v62 = vpop.f32.mrf.mxu1  ;;  %v3497_v63 = vpop.eup %2672  ;;  %v1086_v0 = vpack.c.bf16 %v3492_v59, %v3488_v47  ;;  %2676 = vpow2.f32 %v1063_v21 }
 0x263   : > { %v1483_v3 = vmul.f32 0.17677669, %v1474_v62  ;;  %v1088_v5 = vpack.c.bf16 %v3497_v63, %v3490_v48  ;;  %v1349_v9 = vpop.permute.xlu2 %1348 }
 0x264   : > { %2417 = vmatmul.msk.bf16.vlgmr.msra.gmra.mxu3 %vm1024_vm1, %v1086_v0 }
 0x265   : > { %v3506_v44 = vadd.f32 %v1483_v3, %v3421_v46  ;;  %2415 = vmatmul.msk.bf16.vlgmr.msra.gmra.mxu2 %vm1034_vm2, %v1088_v5  ;;  %1364 = vmatpush.bf16.msrb.mxu3 %v1349_v9  ;;  %v1065_v9 = vsel %vm1024_vm1, %v3488_v47, 0.0 }
 0x267   : > { %v1498_v8 = vsel %vm1034_vm2, %v3506_v44, -inf  ;;  %v3516_v14 = vpop.eup %2674 }
 0x268   : > { %1499 = vmax.xlane.f32.xlu2 %v1498_v8  ;;  %v3518_v15 = vpop.eup %2676  ;;  %v1087_v18 = vpack.c.bf16 %v3516_v14, %v3516_v14 }
 0x269   : > { %v1667_v10 = vpop.f32.mrf.mxu0  ;;  %v1089_v19 = vpack.c.bf16 %v3518_v15, %v3518_v15 }
 0x26a   : > { %v1476_v53 = vpop.f32.mrf.mxu1  ;;  %v1676_v11 = vmul.f32 0.17677669, %v1667_v10 }
 0x26b   : > { %v1484_v57 = vmul.f32 0.17677669, %v1476_v53 }
 0x26c   : > { %v3512_v12 = vadd.f32 %v3389_v4, %v1676_v11 }
 0x26d   : > { %v3566_v23 = vadd.f32 %v1484_v57, %v3421_v46 }
 0x26e   : > { %v1723_v13 = vsel %vm1024_vm1, %v3512_v12, -inf }
 0x26f   : > { %v1501_v62 = vsel %vm1034_vm2, %v3566_v23, -inf }
 0x270   : > { %1724 = vmax.xlane.f32.xlu2 %v1723_v13 }
 0x271   : > { %v1669_v29 = vpop.f32.mrf.mxu0 }
 0x272   : > { %v1479_v16 = vpop.f32.mrf.mxu1  ;;  %v1677_v54 = vmul.f32 0.17677669, %v1669_v29 }
 0x273   : > { %v1485_v53 = vmul.f32 0.17677669, %v1479_v16 }
 0x274   : > { %2418 = vmatmul.msk.bf16.gmra.mxu3 %vm1024_vm1, %v1087_v18  ;;  %v3563_v58 = vadd.f32 %v3389_v4, %v1677_v54 }
 0x275   : > { %2416 = vmatmul.msk.bf16.gmra.mxu2 %vm1034_vm2, %v1089_v19  ;;  %v3595_v18 = vadd.f32 %v1485_v53, %v3421_v46  ;;  %v1077_v19 = vsel %vm1034_vm2, %v3497_v63, 0.0 }
 0x276   : > { %v1726_v61 = vsel %vm1024_vm1, %v3563_v58, -inf }
 0x277   : > { %v1504_v16 = vsel %vm1034_vm2, %v3595_v18, -inf }
 0x279   : > { %v3526_v22 = vpop.f32.mrf.mxu0 }
 0x27a   : > { %v1481_v20 = vpop.f32.mrf.mxu1  ;;  %v1678_v47 = vmul.f32 0.17677669, %v3526_v22  ;;  %v1074_v22 = vsel %vm1034_vm2, %v3490_v48, 0.0 }
 0x281   : > { %v1674_v28 = vpop.f32.mrf.mxu0 }
 0x282   : > { %v1708_v32 = vpop.f32.mrf.mxu1  ;;  %v3604_v28 = vadd.f32 %v3389_v4, %v1678_v47 }
 0x283   : > { %v1717_v37 = vmul.f32 0.17677669, %v1708_v32 }
 0x284   : > { %v1729_v34 = vsel %vm1024_vm1, %v3604_v28, -inf }
 0x285   : > { %v3537_v40 = vadd.f32 %v1717_v37, %v3421_v46  ;;  %1490 = vmax.xlane.f32.xlu0 %v1489_v39  ;;  %v1068_v39 = vsel %vm1024_vm1, %v3492_v59, 0.0 }
 0x287   : > { %v1732_v31 = vsel %vm1034_vm2, %v3537_v40, -inf }
 0x288   : > { %1733 = vmax.xlane.f32.xlu2 %v1732_v31 }
 0x28a   : > { %v1710_v36 = vpop.f32.mrf.mxu1 }
 0x28b   : > { %1493 = vmax.xlane.f32.xlu1 %v1492_v30  ;;  %v1718_v60 = vmul.f32 0.17677669, %v1710_v36 }
 0x28d   : > { %1265 = vmax.xlane.f32.xlu0 %v1264_v49  ;;  %v3573_v0 = vadd.f32 %v1718_v60, %v3421_v46 }
 0x28f   : > { %v1735_v1 = vsel %vm1034_vm2, %v3573_v0, -inf }
 0x292   : > { %v1713_v52 = vpop.f32.mrf.mxu1 }
 0x293   : > { %1496 = vmax.xlane.f32.xlu1 %v1495_v56  ;;  %v1719_v3 = vmul.f32 0.17677669, %v1713_v52 }
 0x295   : > { %1268 = vmax.xlane.f32.xlu0 %v1267_v35  ;;  %v3584_v7 = vadd.f32 %v1719_v3, %v3421_v46 }
 0x297   : > { %v1738_v21 = vsel %vm1034_vm2, %v3584_v7, -inf }
 0x29a   : > { %v1715_v33 = vpop.f32.mrf.mxu1 }
 0x29b   : > { %1727 = vmax.xlane.f32.xlu1 %v1726_v61 }
 0x29d   : > { %1502 = vmax.xlane.f32.xlu0 %v1501_v62 }
 0x2a0   : > { %1787 = vrot.lane.b32.xlu2 %v3484_v55, %s3089_s2 }
 0x2a3   : > { %1736 = vmax.xlane.f32.xlu1 %v1735_v1 }
 0x2b1   : > { %1582 = vrot.lane.b32.xlu0 %v3444_v6, %s3088_s26 }
 0x2b2   : > { %v1254_v5 = vpop.xlane.xlu0 %1253 }
 0x2ba   : > { %v3588_v55 = vpop.xlane.xlu0 %1259  ;;  %v1263_v13 = vpop.xlane.xlu2 %1262 }
 0x2bb   : > { %v1257_v8 = vpop.xlane.xlu1 %1256  ;;  %v1270_v20 = vmax.f32 %v1254_v5, %v1263_v13 }
 0x2bc   : > { %1816 = vrot.lane.b32.xlu1 %v3444_v6, %s3089_s2 }
 0x2bd   : > { %v1273_v24 = vsub.f32 %v3453_v17, %v1270_v20  ;;  %v1282_v46 = vsub.f32 %v3463_v25, %v1270_v20 }
 0x2bf   : > { %v1276_v32 = vmul.f32 1.442695, %v1273_v24  ;;  %v1285_v63 = vmul.f32 1.442695, %v1282_v46 }
 0x2c1   : > { %2678 = vpow2.f32 %v1276_v32 }
 0x2c2   : > { %2680 = vpow2.f32 %v1285_v63 }
 0x2c7   : > { %v2679_v4 = vpop.eup %2678 }
 0x2c8   : > { %v1291_v25 = vsel %vm1024_vm1, %v2679_v4, 0.0  ;;  %v2681_v31 = vpop.eup %2680 }
 0x2c9   : > { %1739 = vmax.xlane.f32.xlu2 %v1738_v21  ;;  %v1300_v45 = vsel %vm1034_vm2, %v2681_v31, 0.0 }
 0x2cd   : > { %v1554_v10 = vpop.permute.xlu0 %1553 }
 0x2ce   : > { %v1562_v29 = vsel %vm1096_vm3, %v1554_v10, 0 }
 0x2d1   : > { %1066 = vadd.xlane.f32.xlu2 %v1065_v9 }
 0x2d3   : > { %v1320_v11 = vpop.permute.xlu1 %1319 }
 0x2d4   : > { %v1328_v6 = vsel %vm1096_vm3, %v1320_v11, 0 }
 0x2d5   : > { %1337 = vmatpush.bf16.msrb.mxu2 %v1328_v6 }
 0x2d9   : > { %1571 = vmatpush.bf16.msra.mxu2 %v1562_v29  ;;  %1078 = vadd.xlane.f32.xlu2 %v1077_v19 }
 0x2db   : > { %1505 = vmax.xlane.f32.xlu0 %v1504_v16  ;;  %v1500_v48 = vpop.xlane.xlu2 %1499 }
 0x2e3   : > { %1730 = vmax.xlane.f32.xlu0 %v1729_v34  ;;  %v3621_v57 = vpop.xlane.xlu2 %1724 }
 0x2e6   : > { %1075 = vadd.xlane.f32.xlu1 %v1074_v22 }
 0x2e7   : > { %v1139_v37 = vpop.f32.mrf.mxu3 }
 0x2e8   : > { %v1109_v38 = vpop.f32.mrf.mxu2 }
 0x2e9   : > { %v3611_v17 = vadd.f32 %v1139_v37, %v1109_v38 }
 0x2eb   : > { %1069 = vadd.xlane.f32.xlu0 %v1068_v39 }
 0x2ee   : > { %1292 = vadd.xlane.f32.xlu1 %v1291_v25 }
 0x2ef   : > { %v1141_v36 = vpop.f32.mrf.mxu3 }
 0x2f0   : > { %v1111_v43 = vpop.f32.mrf.mxu2 }
 0x2f1   : > { %v3616_v30 = vadd.f32 %v1141_v36, %v1111_v43 }
 0x2f3   : > { %1301 = vadd.xlane.f32.xlu0 %v1300_v45 }
 0x2f7   : > { %v1144_v49 = vpop.f32.mrf.mxu3 }
 0x2f8   : > { %v1114_v52 = vpop.f32.mrf.mxu2  ;;  %v1491_v54 = vpop.xlane.xlu0 %1490 }
 0x2f9   : > { %v3619_v56 = vadd.f32 %v1144_v49, %v1114_v52  ;;  %v1507_v21 = vmax.f32 %v1491_v54, %v1500_v48 }
 0x2fb   : > { %v3625_v1 = vpop.xlane.xlu2 %1733  ;;  %v1519_v6 = vsub.f32 %v3506_v44, %v1507_v21  ;;  %v1510_v24 = vsub.f32 %v3530_v27, %v1507_v21 }
 0x2fc   : > { %v1741_v54 = vmax.f32 %v3621_v57, %v3625_v1 }
 0x2fd   : > { %v1522_v16 = vmul.f32 1.442695, %v1519_v6  ;;  %v1513_v63 = vmul.f32 1.442695, %v1510_v24 }
 0x2fe   : > { %v1494_v9 = vpop.xlane.xlu1 %1493 }
 0x2ff   : > { %v1146_v59 = vpop.f32.mrf.mxu3 }
 0x300   : > { %v1116_v35 = vpop.f32.mrf.mxu2  ;;  %v1266_v33 = vpop.xlane.xlu0 %1265 }
 0x301   : > { %v1271_v60 = vmax.f32 %v1257_v8, %v1266_v33  ;;  %v1753_v33 = vsub.f32 %v3537_v40, %v1741_v54 }
 0x303   : > { %v1274_v61 = vsub.f32 %v3466_v26, %v1271_v60  ;;  %v1283_v62 = vsub.f32 %v3545_v42, %v1271_v60  ;;  %v1788_v19 = vpop.permute.xlu2 %1787 }
 0x305   : > { %v1278_v3 = vmul.f32 1.442695, %v1274_v61  ;;  %v1287_v5 = vmul.f32 1.442695, %v1283_v62 }
 0x306   : > { %v1497_v44 = vpop.xlane.xlu1 %1496 }
 0x307   : > { %2682 = vpow2.f32 %v1278_v3 }
 0x308   : > { %2684 = vpow2.f32 %v1287_v5  ;;  %v1269_v53 = vpop.xlane.xlu0 %1268  ;;  %v1756_v5 = vmul.f32 1.442695, %v1753_v33 }
 0x309   : > { %v1272_v10 = vmax.f32 %v3588_v55, %v1269_v53  ;;  %v1796_v55 = vsel %vm1096_vm3, %v1788_v19, 0 }
 0x30b   : > { %v1275_v11 = vsub.f32 %v3458_v2, %v1272_v10  ;;  %v1284_v26 = vsub.f32 %v3556_v51, %v1272_v10 }
 0x30d   : > { %v2683_v8 = vpop.eup %2682  ;;  %v1280_v13 = vmul.f32 1.442695, %v1275_v11  ;;  %v1289_v2 = vmul.f32 1.442695, %v1284_v26 }
 0x30e   : > { %v2685_v42 = vpop.eup %2684  ;;  %v1312_v29 = vpack.c.bf16 %v2683_v8, %v2679_v4  ;;  %v1294_v20 = vsel %vm1024_vm1, %v2683_v8, 0.0  ;;  %v1728_v4 = vpop.xlane.xlu1 %1727  ;;  %v1744_v8 = vsub.f32 %v3512_v12, %v1741_v54 }
 0x30f   : > { %v1314_v47 = vpack.c.bf16 %v2685_v42, %v2681_v31  ;;  %2686 = vpow2.f32 %v1280_v13  ;;  %1295 = vadd.xlane.f32.xlu0 %v1294_v20  ;;  %v1303_v34 = vsel %vm1034_vm2, %v2685_v42, 0.0 }
 0x310   : > { %2425 = vmatmul.msk.bf16.vlgmr.msrb.gmra.mxu3 %vm1024_vm1, %v1312_v29  ;;  %2688 = vpow2.f32 %v1522_v16  ;;  %v1503_v32 = vpop.xlane.xlu0 %1502  ;;  %v1747_v19 = vmul.f32 1.442695, %v1744_v8 }
 0x311   : > { %2423 = vmatmul.msk.bf16.vlgmr.msrb.gmra.mxu2 %vm1034_vm2, %v1314_v47  ;;  %2690 = vpow2.f32 %v1289_v2  ;;  %v1508_v22 = vmax.f32 %v1494_v9, %v1503_v32 }
 0x312   : > { %1805 = vmatpush.bf16.msrb.mxu2 %v1796_v55  ;;  %2692 = vpow2.f32 %v1513_v63 }
 0x313   : > { %v1511_v39 = vsub.f32 %v3542_v41, %v1508_v22  ;;  %v1520_v25 = vsub.f32 %v3566_v23, %v1508_v22 }
 0x315   : > { %v2687_v51 = vpop.eup %2686  ;;  %v1515_v48 = vmul.f32 1.442695, %v1511_v39  ;;  %v1524_v45 = vmul.f32 1.442695, %v1520_v25 }
 0x316   : > { %v1297_v46 = vsel %vm1024_vm1, %v2687_v51, 0.0  ;;  %v2689_v37 = vpop.eup %2688  ;;  %v1313_v36 = vpack.c.bf16 %v2687_v51, %v2687_v51  ;;  %v1737_v41 = vpop.xlane.xlu1 %1736 }
 0x317   : > { %1298 = vadd.xlane.f32.xlu2 %v1297_v46  ;;  %1304 = vadd.xlane.f32.xlu0 %v1303_v34  ;;  %v2691_v38 = vpop.eup %2690  ;;  %v1537_v27 = vsel %vm1034_vm2, %v2689_v37, 0.0  ;;  %2694 = vpow2.f32 %v1515_v48  ;;  %v1742_v53 = vmax.f32 %v1728_v4, %v1737_v41 }
 0x318   : > { %v1306_v31 = vsel %vm1034_vm2, %v2691_v38, 0.0  ;;  %v1315_v43 = vpack.c.bf16 %v2691_v38, %v2691_v38  ;;  %v2693_v49 = vpop.eup %2692  ;;  %2696 = vpow2.f32 %v1524_v45 }
 0x319   : > { %v1528_v23 = vsel %vm1024_vm1, %v2693_v49, 0.0  ;;  %2698 = vpow2.f32 %v1756_v5  ;;  %v1745_v13 = vsub.f32 %v3563_v58, %v1742_v53  ;;  %v1754_v12 = vsub.f32 %v3573_v0, %v1742_v53 }
 0x31b   : > { %v1749_v47 = vmul.f32 1.442695, %v1745_v13  ;;  %v1758_v63 = vmul.f32 1.442695, %v1754_v12 }
 0x31d   : > { %v2695_v59 = vpop.eup %2694 }
 0x31e   : > { %v2697_v35 = vpop.eup %2696  ;;  %v1549_v60 = vpack.c.bf16 %v2695_v59, %v2693_v49  ;;  %v1531_v62 = vsel %vm1024_vm1, %v2695_v59, 0.0 }
 0x31f   : > { %1538 = vadd.xlane.f32.xlu2 %v1537_v27  ;;  %1307 = vadd.xlane.f32.xlu0 %v1306_v31  ;;  %v1551_v3 = vpack.c.bf16 %v2697_v35, %v2689_v37  ;;  %v1540_v21 = vsel %vm1034_vm2, %v2697_v35, 0.0  ;;  %v3652_v57 = vpop.eup %2698 }
 0x320   : > { %2426 = vmatmul.msk.bf16.gmra.mxu3 %vm1024_vm1, %v1313_v36  ;;  %v1771_v40 = vsel %vm1034_vm2, %v3652_v57, 0.0 }
 0x321   : > { %2424 = vmatmul.msk.bf16.gmra.mxu2 %vm1034_vm2, %v1315_v43 }
 0x323   : > { %v1583_v52 = vpop.permute.xlu0 %1582 }
 0x324   : > { %1598 = vmatpush.bf16.msra.mxu3 %v1583_v52 }
 0x327   : > { %1529 = vadd.xlane.f32.xlu0 %v1528_v23 }
 0x32e   : > { %v1817_v61 = vpop.permute.xlu1 %1816 }
 0x32f   : > { %1832 = vmatpush.bf16.msrb.mxu3 %v1817_v61  ;;  %1532 = vadd.xlane.f32.xlu0 %v1531_v62 }
 0x330   : > { %2433 = vmatmul.msk.bf16.vlgmr.msra.gmra.mxu3 %vm1024_vm1, %v1549_v60 }
 0x331   : > { %2431 = vmatmul.msk.bf16.vlgmr.msra.gmra.mxu2 %vm1034_vm2, %v1551_v3 }
 0x337   : > { %1541 = vadd.xlane.f32.xlu0 %v1540_v21 }
 0x33c   : > { %v1740_v1 = vpop.xlane.xlu2 %1739 }
 0x33f   : > { %1772 = vadd.xlane.f32.xlu0 %v1771_v40 }
 0x344   : > { %v1067_v29 = vpop.xlane.xlu2 %1066 }
 0x34c   : > { %v1079_v34 = vpop.xlane.xlu2 %1078 }
 0x34e   : > { %v1506_v9 = vpop.xlane.xlu0 %1505 }
 0x34f   : > { %v1509_v10 = vmax.f32 %v1497_v44, %v1506_v9 }
 0x351   : > { %v1512_v11 = vsub.f32 %v3553_v50, %v1509_v10  ;;  %v1521_v6 = vsub.f32 %v3595_v18, %v1509_v10 }
 0x353   : > { %v1517_v26 = vmul.f32 1.442695, %v1512_v11  ;;  %v1526_v42 = vmul.f32 1.442695, %v1521_v6 }
 0x355   : > { %2700 = vpow2.f32 %v1517_v26 }
 0x356   : > { %2702 = vpow2.f32 %v1526_v42  ;;  %v1731_v20 = vpop.xlane.xlu0 %1730 }
 0x357   : > { %v1743_v16 = vmax.f32 %v1731_v20, %v1740_v1  ;;  %2704 = vpow2.f32 %v1747_v19 }
 0x358   : > { %2706 = vpow2.f32 %v1749_v47 }
 0x359   : > { %v1746_v55 = vsub.f32 %v3604_v28, %v1743_v16  ;;  %v1076_v2 = vpop.xlane.xlu1 %1075  ;;  %v1755_v39 = vsub.f32 %v3584_v7, %v1743_v16 }
 0x35a   : > { %v1083_v50 = vadd.f32 %v1076_v2, %v1067_v29 }
 0x35b   : > { %v2701_v44 = vpop.eup %2700  ;;  %v1751_v18 = vmul.f32 1.442695, %v1746_v55  ;;  %v1760_v48 = vmul.f32 1.442695, %v1755_v39 }
 0x35c   : > { %v2703_v58 = vpop.eup %2702  ;;  %2708 = vrcp.f32 %v1083_v50  ;;  %v1534_v51 = vsel %vm1024_vm1, %v2701_v44, 0.0  ;;  %v1550_v24 = vpack.c.bf16 %v2701_v44, %v2701_v44 }
 0x35d   : > { %2710 = vpow2.f32 %v1751_v18  ;;  %v1543_v32 = vsel %vm1034_vm2, %v2703_v58, 0.0  ;;  %1535 = vadd.xlane.f32.xlu1 %v1534_v51  ;;  %v1552_v46 = vpack.c.bf16 %v2703_v58, %v2703_v58  ;;  %v2705_v0 = vpop.eup %2704 }
 0x35e   : > { %1544 = vadd.xlane.f32.xlu2 %v1543_v32  ;;  %v1070_v28 = vpop.xlane.xlu0 %1069  ;;  %2434 = vmatmul.msk.bf16.gmra.mxu3 %vm1024_vm1, %v1550_v24  ;;  %v2707_v37 = vpop.eup %2706  ;;  %v1762_v31 = vsel %vm1024_vm1, %v2705_v0, 0.0 }
 0x35f   : > { %v1084_v22 = vadd.f32 %v1079_v34, %v1070_v28  ;;  %2432 = vmatmul.msk.bf16.gmra.mxu2 %vm1034_vm2, %v1552_v46  ;;  %v1765_v36 = vsel %vm1024_vm1, %v2707_v37, 0.0  ;;  %v1783_v7 = vpack.c.bf16 %v2707_v37, %v2705_v0 }
 0x361   : > { %2712 = vrcp.f32 %v1084_v22  ;;  %v1293_v60 = vpop.xlane.xlu1 %1292 }
 0x362   : > { %v2709_v38 = vpop.eup %2708  ;;  %2714 = vpow2.f32 %v1758_v63 }
 0x363   : > { %v2711_v4 = vpop.eup %2710  ;;  %v1151_v25 = vmul.f32 %v2709_v38, %v3611_v17  ;;  %2716 = vpow2.f32 %v1760_v48  ;;  %v1071_v48 = vsel %vm1024_vm1, %v3516_v14, 0.0 }
 0x364   : > { %v1768_v27 = vsel %vm1024_vm1, %v2711_v4, 0.0 }
 0x365   : > { %1154 = vst.msk [vmem:[#allocation3] sm:$0xff] %vm951_vm0, %v1151_v25  ;;  %1769 = vadd.xlane.f32.xlu0 %v1768_v27  ;;  %1763 = vadd.xlane.f32.xlu1 %v1762_v31 }
 0x366   : > { %1766 = vadd.xlane.f32.xlu2 %v1765_v36  ;;  %v1302_v54 = vpop.xlane.xlu0 %1301 }
 0x367   : > { %v2713_v43 = vpop.eup %2712  ;;  %v1309_v61 = vadd.f32 %v1302_v54, %v1293_v60 }
 0x368   : > { %v1152_v45 = vmul.f32 %v2713_v43, %v3616_v30  ;;  %v2715_v49 = vpop.eup %2714  ;;  %v1784_v30 = vpack.c.bf16 %v2711_v4, %v2711_v4 }
 0x369   : > { %v1774_v17 = vsel %vm1034_vm2, %v2715_v49, 0.0  ;;  %v1785_v52 = vpack.c.bf16 %v2715_v49, %v3652_v57  ;;  %v2717_v41 = vpop.eup %2716  ;;  %2718 = vrcp.f32 %v1309_v61 }
 0x36a   : > { %1155 = vst.msk [vmem:[#allocation3 + $0x8] sm:$0xff] %vm951_vm0, %v1152_v45  ;;  %v1777_v23 = vsel %vm1034_vm2, %v2717_v41, 0.0  ;;  %v1786_v59 = vpack.c.bf16 %v2717_v41, %v2717_v41 }
 0x36d   : > { %1775 = vadd.xlane.f32.xlu1 %v1774_v17 }
 0x36e   : > { %2441 = vmatmul.msk.bf16.vlgmr.msrb.gmra.mxu3 %vm1024_vm1, %v1783_v7 }
 0x36f   : > { %2439 = vmatmul.msk.bf16.vlgmr.msrb.gmra.mxu2 %vm1034_vm2, %v1785_v52  ;;  %v2719_v40 = vpop.eup %2718 }
 0x375   : > { %1778 = vadd.xlane.f32.xlu1 %v1777_v23 }
 0x37e   : > { %2442 = vmatmul.msk.bf16.gmra.mxu3 %vm1024_vm1, %v1784_v30 }
 0x37f   : > { %2440 = vmatmul.msk.bf16.gmra.mxu2 %vm1034_vm2, %v1786_v59 }
 0x382   : > { %v1296_v35 = vpop.xlane.xlu0 %1295 }
 0x38a   : > { %v1305_v33 = vpop.xlane.xlu0 %1304  ;;  %v1299_v13 = vpop.xlane.xlu2 %1298 }
 0x38b   : > { %v1310_v5 = vadd.f32 %v1305_v33, %v1296_v35 }
 0x38d   : > { %2720 = vrcp.f32 %v1310_v5 }
 0x392   : > { %v1308_v62 = vpop.xlane.xlu0 %1307  ;;  %v1539_v19 = vpop.xlane.xlu2 %1538 }
 0x393   : > { %v1366_v3 = vpop.f32.mrf.mxu3  ;;  %v2721_v6 = vpop.eup %2720  ;;  %v1311_v2 = vadd.f32 %v1308_v62, %v1299_v13 }
 0x394   : > { %v1339_v21 = vpop.f32.mrf.mxu2 }
 0x395   : > { %v1367_v57 = vadd.f32 %v1366_v3, %v1339_v21 }
 0x397   : > { %v1378_v1 = vmul.f32 %v2719_v40, %v1367_v57 }
 0x399   : > { %1384 = vrot.lane.b32.xlu0 %v1378_v1, %s3089_s2 }
 0x39a   : > { %v1530_v10 = vpop.xlane.xlu0 %1529 }
 0x39b   : > { %v1368_v9 = vpop.f32.mrf.mxu3  ;;  %v1546_v47 = vadd.f32 %v1539_v19, %v1530_v10  ;;  %v1080_v19 = vsel %vm1034_vm2, %v3518_v15, 0.0 }
 0x39c   : > { %v1341_v53 = vpop.f32.mrf.mxu2 }
 0x39d   : > { %v1369_v11 = vadd.f32 %v1368_v9, %v1341_v53  ;;  %2722 = vrcp.f32 %v1546_v47  ;;  %v2531_v47 = vld [vmem:[#allocation16 + $0x28] sm:$0xff] }
 0x39e   : > { %2724 = vrcp.f32 %v1311_v2  ;;  %v2528_v2 = vld [vmem:[#allocation16 + $0x10] sm:$0xff] }
 0x39f   : > { %v1379_v8 = vmul.f32 %v2721_v6, %v1369_v11 }
 0x3a1   : > { %1386 = vrot.lane.b32.xlu1 %v1379_v8, %s3089_s2 }
 0x3a2   : > { %v1533_v29 = vpop.xlane.xlu0 %1532 }
 0x3a3   : > { %v1371_v26 = vpop.f32.mrf.mxu3  ;;  %v2723_v58 = vpop.eup %2722 }
 0x3a4   : > { %v1344_v42 = vpop.f32.mrf.mxu2  ;;  %v2725_v34 = vpop.eup %2724 }
 0x3a5   : > { %v1372_v24 = vadd.f32 %v1371_v26, %v1344_v42  ;;  %v2533_v42 = vld [vmem:[#allocation16 + $0x38] sm:$0xff] }
 0x3a6   : > { %1938 = vmatpush.bf16.msrb.mxu0 %v2533_v42 }
 0x3a7   : > { %v1380_v22 = vmul.f32 %v2725_v34, %v1372_v24 }
 0x3aa   : > { %v1542_v55 = vpop.xlane.xlu0 %1541 }
 0x3ab   : > { %v1373_v20 = vpop.f32.mrf.mxu3  ;;  %v1547_v44 = vadd.f32 %v1542_v55, %v1533_v29  ;;  %v2532_v29 = vld [vmem:[#allocation16 + $0x30] sm:$0xff]  ;;  %v2529_v55 = vld [vmem:[#allocation16 + $0x18] sm:$0xff] }
 0x3ac   : > { %v1346_v16 = vpop.f32.mrf.mxu2  ;;  %1939 = vmatpush.bf16.msrb.mxu0 %v2532_v29 }
 0x3ad   : > { %2726 = vrcp.f32 %v1547_v44  ;;  %v2530_v16 = vld [vmem:[#allocation16 + $0x20] sm:$0xff] }
 0x3ae   : > { %v2526_v44 = vld [vmem:[#allocation16] sm:$0xff] }
 0x3b0   : > { %1940 = vmatpush.bf16.msrb.mxu0 %v2531_v47 }
 0x3b2   : > { %v1773_v27 = vpop.xlane.xlu0 %1772 }
 0x3b3   : > { %v1600_v50 = vpop.f32.mrf.mxu3  ;;  %v2727_v63 = vpop.eup %2726 }
 0x3b4   : > { %v1573_v12 = vpop.f32.mrf.mxu2  ;;  %1941 = vmatpush.bf16.msrb.mxu0 %v2530_v16 }
 0x3b5   : > { %v1601_v18 = vadd.f32 %v1600_v50, %v1573_v12  ;;  %v2527_v50 = vld [vmem:[#allocation16 + $0x8] sm:$0xff] }
 0x3b7   : > { %v1612_v51 = vmul.f32 %v2723_v58, %v1601_v18 }
 0x3b8   : > { %1942 = vmatpush.bf16.msrb.mxu0 %v2529_v55 }
 0x3b9   : > { %1618 = vrot.lane.b32.xlu2 %v1612_v51, %s3088_s26 }
 0x3bb   : > { %v1602_v32 = vpop.f32.mrf.mxu3 }
 0x3bc   : > { %v1575_v46 = vpop.f32.mrf.mxu2  ;;  %1943 = vmatpush.bf16.msrb.mxu0 %v2528_v2 }
 0x3bd   : > { %v1603_v28 = vadd.f32 %v1602_v32, %v1575_v46 }
 0x3bf   : > { %v1613_v0 = vmul.f32 %v2727_v63, %v1603_v28 }
 0x3c0   : > { %1944 = vmatpush.bf16.msrb.mxu0 %v2527_v50  ;;  %v2664_v50 = vld [vmem:[%s3767_s9 + $0x1] ss:$0 sm:$0xff] }
 0x3c1   : > { %1388 = vrot.lane.b32.xlu2 %v1380_v22, %s3089_s2  ;;  %1620 = vrot.lane.b32.xlu0 %v1613_v0, %s3088_s26  ;;  %s3009_s2 = scalar_lea.hbm %s3768_s10, 48 }
 0x3c2   : > { %p3011_p9 = scmp.lt.s32.totalorder %s3009_s2, %s3005_s22 }
 0x3c4   : > { %1945 = vmatpush.bf16.msrb.mxu0 %v2526_v44  ;;  %p3012_p5 = por %p3011_p9, %p3010_p7 }
 0x3c6   : > { %p3013_p8 = pnand %p3012_p5, %p3008_p12 }
 0x3d0   : > { %v1536_v37 = vpop.xlane.xlu1 %1535 }
 0x3d1   : > { %v1545_v25 = vpop.xlane.xlu2 %1544 }
 0x3d2   : > { %v1548_v59 = vadd.f32 %v1545_v25, %v1536_v37  ;;  %v2746_v25 = vld [vmem:[%s3313_s19] sm:$0xff] }
 0x3d8   : > { %v1764_v39 = vpop.xlane.xlu1 %1763  ;;  %v1770_v62 = vpop.xlane.xlu0 %1769 }
 0x3d9   : > { %v1780_v36 = vadd.f32 %v1773_v27, %v1764_v39  ;;  %v1767_v49 = vpop.xlane.xlu2 %1766 }
 0x3db   : > { %2728 = vrcp.f32 %v1780_v36 }
 0x3e0   : > { %v1776_v45 = vpop.xlane.xlu1 %1775 }
 0x3e1   : > { %v1605_v38 = vpop.f32.mrf.mxu3  ;;  %v1781_v17 = vadd.f32 %v1776_v45, %v1767_v49  ;;  %v2729_v23 = vpop.eup %2728 }
 0x3e2   : > { %v1578_v4 = vpop.f32.mrf.mxu2 }
 0x3e3   : > { %2730 = vrcp.f32 %v1781_v17  ;;  %v1606_v3 = vadd.f32 %v1605_v38, %v1578_v4  ;;  %v2663_v4 = vld [vmem:[%s3767_s9] ss:$0 sm:$0xff] }
 0x3e4   : > { %2732 = vrcp.f32 %v1548_v59 }
 0x3e8   : > { %v1779_v14 = vpop.xlane.xlu1 %1778 }
 0x3e9   : > { %v1607_v31 = vpop.f32.mrf.mxu3  ;;  %v2731_v60 = vpop.eup %2730  ;;  %v1782_v21 = vadd.f32 %v1779_v14, %v1770_v62 }
 0x3ea   : > { %v1580_v43 = vpop.f32.mrf.mxu2  ;;  %v2733_v40 = vpop.eup %2732 }
 0x3eb   : > { %1072 = vadd.xlane.f32.xlu0 %v1071_v48  ;;  %v1614_v1 = vmul.f32 %v2733_v40, %v1606_v3  ;;  %2734 = vrcp.f32 %v1782_v21  ;;  %v2747_v43 = vld [vmem:[%s3313_s19 + $0x8] sm:$0xff] }
 0x3f1   : > { %v1834_v7 = vpop.f32.mrf.mxu3  ;;  %v2735_v6 = vpop.eup %2734 }
 0x3f2   : > { %v1807_v52 = vpop.f32.mrf.mxu2 }
 0x3f3   : > { %v1835_v41 = vadd.f32 %v1834_v7, %v1807_v52  ;;  %v2748_v7 = vld [vmem:[%s3313_s19 + $0x10] sm:$0xff] }
 0x3f5   : > { %v1846_v54 = vmul.f32 %v2729_v23, %v1835_v41  ;;  %v3091_v41 = vmov 128.0  }
 0x3f7   : > { %1852 = vrot.lane.b32.xlu1 %v1846_v54, %s3087_s8 }
 0x3f9   : > { %v1836_v30 = vpop.f32.mrf.mxu3 }
 0x3fa   : > { %v1809_v35 = vpop.f32.mrf.mxu2 }
 0x3fb   : > { %v1837_v33 = vadd.f32 %v1836_v30, %v1809_v35 }
 0x3fd   : > { %v1847_v61 = vmul.f32 %v2731_v60, %v1837_v33 }
 0x3ff   : > { %1854 = vrot.lane.b32.xlu2 %v1847_v61, %s3087_s8 }
 0x401   : > { %v1839_v5 = vpop.f32.mrf.mxu3 }
 0x402   : > { %v1812_v57 = vpop.f32.mrf.mxu2 }
 0x403   : > { %v1840_v9 = vadd.f32 %v1839_v5, %v1812_v57 }
 0x405   : > { %v1848_v8 = vmul.f32 %v2735_v6, %v1840_v9 }
 0x407   : > { %1622 = vrot.lane.b32.xlu2 %v1614_v1, %s3088_s26 }
 0x409   : > { %v1841_v53 = vpop.f32.mrf.mxu3 }
 0x40a   : > { %v1814_v10 = vpop.f32.mrf.mxu2 }
 0x40b   : > { %v1385_v11 = vpop.permute.xlu0 %1384 }
 0x40c   : > { %1394 = vst.msk [vmem:[#allocation3] sm:$0xff] %vm1393_vm4, %v1385_v11 }
 0x40f   : > { %1856 = vrot.lane.b32.xlu2 %v1848_v8, %s3087_s8 }
 0x413   : > { %v1387_v13 = vpop.permute.xlu1 %1386  ;;  %v1619_v26 = vpop.permute.xlu2 %1618 }
 0x414   : > { %1395 = vst.msk [vmem:[#allocation3 + $0x8] sm:$0xff] %vm1393_vm4, %v1387_v13 }
 0x415   : > { %1628 = vst.msk [vmem:[#allocation3] sm:$0xff] %vm1627_vm5, %v1619_v26 }
 0x41b   : > { %v1389_v12 = vpop.permute.xlu2 %1388 }
 0x421   : > { %1081 = vadd.xlane.f32.xlu1 %v1080_v19 }
 0x433   : > { %v1621_v20 = vpop.permute.xlu0 %1620 }
 0x434   : > { %1629 = vst.msk [vmem:[#allocation3 + $0x8] sm:$0xff] %vm1627_vm5, %v1621_v20 }
 0x459   : > { %v1855_v18 = vpop.permute.xlu2 %1854 }
 0x45a   : > { %1863 = vst.msk [vmem:[#allocation3 + $0x8] sm:$0xff] %vm1861_vm6, %v1855_v18  ;;  %v2665_v18 = vld [vmem:[%s3767_s9 + $0x2] ss:$0 sm:$0xff] }
 0x45e   : > { %v1073_v32 = vpop.xlane.xlu0 %1072 }
 0x461   : > { %v1866_v51 = vld [vmem:[#allocation3 + $0x8] sm:$0xff]  ;;  %v1623_v28 = vpop.permute.xlu2 %1622 }
 0x469   : > { %v1853_v15 = vpop.permute.xlu1 %1852  ;;  %v1857_v0 = vpop.permute.xlu2 %1856 }
 0x46a   : > { %1862 = vst.msk [vmem:[#allocation3] sm:$0xff] %vm1861_vm6, %v1853_v15 }
 0x471   : > { %v1865_v58 = vld [vmem:[#allocation3] sm:$0xff] }
 0x472   : > { %v1868_v24 = vpack.c.bf16 %v1866_v51, %v1865_v58 }
 0x474   : > { %1946 = vmatmul.bf16.vlgmr.msrb.gmra.mxu0 %v1868_v24 }
 0x494   : > { %v1082_v46 = vpop.xlane.xlu1 %1081 }
 0x495   : > { %v1085_v34 = vadd.f32 %v1082_v46, %v1073_v32 }
 0x497   : > { %2736 = vrcp.f32 %v1085_v34 }
 0x498   : > { %2738 = vrcp.f32 %v3091_v41 }
 0x49d   : > { %v2737_v63 = vpop.eup %2736 }
 0x49e   : > { %v1153_v22 = vmul.f32 %v2737_v63, %v3619_v56  ;;  %v2739_v23 = vpop.eup %2738 }
 0x49f   : > { %v1966_v54 = vmul.f32 128.0, %v2739_v23  ;;  %vm1970_vm7 = vweird.f32 %v2739_v23 }
 0x4a0   : > { %1156 = vst.msk [vmem:[#allocation3 + $0x10] sm:$0xff] %vm951_vm0, %v1153_v22 }
 0x4a1   : > { %1396 = vst.msk [vmem:[#allocation3 + $0x10] sm:$0xff] %vm1393_vm4, %v1389_v12  ;;  %v1967_v30 = vsub.f32 1.0, %v1966_v54 }
 0x4a2   : > { %1630 = vst.msk [vmem:[#allocation3 + $0x10] sm:$0xff] %vm1627_vm5, %v1623_v28 }
 0x4a3   : > { %1864 = vst.msk [vmem:[#allocation3 + $0x10] sm:$0xff] %vm1861_vm6, %v1857_v0  ;;  %v1968_v59 = vmul.f32 %v2739_v23, %v1967_v30 }
 0x4a5   : > { %v1969_v35 = vadd.f32 %v2739_v23, %v1968_v59 }
 0x4a7   : > { %v1971_v33 = vsel %vm1970_vm7, %v2739_v23, %v1969_v35 }
 0x4aa   : > { %v1867_v37 = vld [vmem:[#allocation3 + $0x10] sm:$0xff] }
 0x4ab   : > { %v1869_v38 = vpack.c.bf16 %v1867_v37, %v1867_v37 }
 0x4ad   : > { %1951 = vmatmul.bf16.gmra.mxu0 %v1869_v38 }
 0x4f1   : > { %v1947_v39 = vpop.f32.mrf.mxu0 }
 0x4f2   : > { %v1948_v56 = vadd.f32 %v2663_v4, %v1947_v39 }
 0x4f4   : > { %v1956_v27 = vadd.f32 %v2746_v25, %v1948_v56 }
 0x4f6   : > { %1959 = vadd.xlane.f32.xlu2 %v1956_v27 }
 0x4f9   : > { %v1949_v31 = vpop.f32.mrf.mxu0 }
 0x4fa   : > { %v1950_v36 = vadd.f32 %v2663_v4, %v1949_v31 }
 0x4fc   : > { %v1957_v48 = vadd.f32 %v2747_v43, %v1950_v36 }
 0x4fe   : > { %1961 = vadd.xlane.f32.xlu0 %v1957_v48 }
 0x52a   : > { %v1952_v45 = vpop.f32.mrf.mxu0 }
 0x52b   : > { %v1953_v49 = vadd.f32 %v2663_v4, %v1952_v45 }
 0x52d   : > { %v1958_v17 = vadd.f32 %v2748_v7, %v1953_v49 }
 0x52f   : > { %1963 = vadd.xlane.f32.xlu1 %v1958_v17 }
 0x532   : > { %v1954_v52 = vpop.f32.mrf.mxu0 }
 0x569   : > { %v1960_v60 = vpop.xlane.xlu2 %1959 }
 0x56a   : > { %v1972_v61 = vmul.f32 %v1971_v33, %v1960_v60 }
 0x56c   : > { %v1975_v14 = vsub.f32 %v1956_v27, %v1972_v61 }
 0x56e   : > { %v1978_v62 = vmul.f32 %v1975_v14, %v1975_v14 }
 0x570   : > { %1981 = vadd.xlane.f32.xlu0 %v1978_v62 }
 0x571   : > { %v1962_v3 = vpop.xlane.xlu0 %1961 }
 0x572   : > { %v1973_v5 = vmul.f32 %v1971_v33, %v1962_v3 }
 0x574   : > { %v1976_v21 = vsub.f32 %v1957_v48, %v1973_v5 }
 0x576   : > { %v1979_v57 = vmul.f32 %v1976_v21, %v1976_v21 }
 0x578   : > { %1983 = vadd.xlane.f32.xlu1 %v1979_v57 }
 0x5a2   : > { %v1964_v40 = vpop.xlane.xlu1 %1963 }
 0x5a3   : > { %v1974_v1 = vmul.f32 %v1971_v33, %v1964_v40 }
 0x5a5   : > { %v1977_v9 = vsub.f32 %v1958_v17, %v1974_v1 }
 0x5a7   : > { %v1980_v53 = vmul.f32 %v1977_v9, %v1977_v9 }
 0x5a9   : > { %1985 = vadd.xlane.f32.xlu0 %v1980_v53 }
 0x5e3   : > { %v1982_v10 = vpop.xlane.xlu0 %1981 }
 0x5e4   : > { %v1987_v11 = vmul.f32 %v1982_v10, %v1971_v33 }
 0x5e6   : > { %v1990_v6 = vadd.f32 1e-12, %v1987_v11 }
 0x5e8   : > { %2740 = vrsqrt.f32 %v1990_v6  ;;  %vm1999_vm9 = vweird.f32 %v1990_v6 }
 0x5eb   : > { %v1984_v8 = vpop.xlane.xlu1 %1983 }
 0x5ec   : > { %v1988_v13 = vmul.f32 %v1984_v8, %v1971_v33 }
 0x5ee   : > { %v2741_v26 = vpop.eup %2740  ;;  %v1991_v42 = vadd.f32 1e-12, %v1988_v13 }
 0x5ef   : > { %v1994_v29 = vmul.f32 %v2741_v26, %v1990_v6  ;;  %vm2000_vm8 = vweird.f32 %v2741_v26 }
 0x5f0   : > { %2742 = vrsqrt.f32 %v1991_v42  ;;  %vm2001_vm10 = vmor %vm1999_vm9, %vm2000_vm8  ;;  %vm2009_vm12 = vweird.f32 %v1991_v42 }
 0x5f1   : > { %v1995_v19 = vmul.f32 %v2741_v26, %v1994_v29 }
 0x5f3   : > { %v1996_v20 = vmul.f32 0.5, %v1995_v19 }
 0x5f5   : > { %v1997_v47 = vsub.f32 1.5, %v1996_v20 }
 0x5f6   : > { %v2743_v16 = vpop.eup %2742 }
 0x5f7   : > { %v1998_v55 = vmul.f32 %v2741_v26, %v1997_v47  ;;  %v2004_v2 = vmul.f32 %v2743_v16, %v1991_v42  ;;  %vm2010_vm11 = vweird.f32 %v2743_v16 }
 0x5f8   : > { %vm2011_vm13 = vmor %vm2009_vm12, %vm2010_vm11 }
 0x5f9   : > { %v2002_v44 = vsel %vm2001_vm10, %v2741_v26, %v1998_v55  ;;  %v2005_v12 = vmul.f32 %v2743_v16, %v2004_v2 }
 0x5fa   : > { %v2023_v15 = vmul.f32 %v2002_v44, %v1975_v14 }
 0x5fb   : > { %v2006_v58 = vmul.f32 0.5, %v2005_v12 }
 0x5fc   : > { %v2027_v51 = vmul.f32 %v2664_v50, %v2023_v15 }
 0x5fd   : > { %v2007_v24 = vsub.f32 1.5, %v2006_v58 }
 0x5fe   : > { %v2031_v32 = vadd.f32 %v2665_v18, %v2027_v51 }
 0x5ff   : > { %v2008_v46 = vmul.f32 %v2743_v16, %v2007_v24 }
 0x600   : > { %2034 = vst [vmem:[%s3719_s23] sm:$0xff] %v2031_v32 }
 0x601   : > { %v2012_v34 = vsel %vm2011_vm13, %v2743_v16, %v2008_v46 }
 0x602   : > { %v2024_v28 = vmul.f32 %v2012_v34, %v1976_v21 }
 0x604   : > { %v2028_v63 = vmul.f32 %v2664_v50, %v2024_v28 }
 0x606   : > { %v2032_v22 = vadd.f32 %v2665_v18, %v2028_v63 }
 0x608   : > { %2035 = vst [vmem:[%s3719_s23 + $0x8] sm:$0xff] %v2032_v22 }
 0x61c   : > { %v1986_v0 = vpop.xlane.xlu0 %1985 }
 0x61d   : > { %v1989_v37 = vmul.f32 %v1986_v0, %v1971_v33 }
 0x61f   : > { %v1992_v38 = vadd.f32 1e-12, %v1989_v37 }
 0x621   : > { %2744 = vrsqrt.f32 %v1992_v38  ;;  %vm2019_vm15 = vweird.f32 %v1992_v38 }
 0x627   : > { %v2745_v4 = vpop.eup %2744 }
 0x628   : > { %v2014_v39 = vmul.f32 %v2745_v4, %v1992_v38  ;;  %vm2020_vm14 = vweird.f32 %v2745_v4 }
 0x629   : > { %vm2021_vm0 = vmor %vm2019_vm15, %vm2020_vm14 }
 0x62a   : > { %v2015_v56 = vmul.f32 %v2745_v4, %v2014_v39 }
 0x62c   : > { %v2016_v25 = vmul.f32 0.5, %v2015_v56 }
 0x62e   : > { %v2017_v27 = vsub.f32 1.5, %v2016_v25 }
 0x630   : > { %v2018_v31 = vmul.f32 %v2745_v4, %v2017_v27 }
 0x632   : > { %v2022_v36 = vsel %vm2021_vm0, %v2745_v4, %v2018_v31 }
 0x633   : > { %v2025_v43 = vmul.f32 %v2022_v36, %v1977_v9 }
 0x635   : > { %v2029_v48 = vmul.f32 %v2664_v50, %v2025_v43 }
 0x637   : > { %v2033_v45 = vadd.f32 %v2665_v18, %v2029_v48 }
 0x639   : > { %2036 = vst [vmem:[%s3719_s23 + $0x10] sm:$0xff] %v2033_v45 }
 0x63a   : > { %3016 = shalt.err (!%p3013_p8)
}
 0x63b   : > { %s3092_s15 = smov 128   ;;  %s3093_s25 = smov 8  }
 0x63c   : > { %2567 = dma.vmem_to_hbm [thread:$0]  (%p3253_p4), %s2051_s29, 384, %s2053_s12, %s2038_s20, %s3092_s15, %s3092_s15, %s3093_s25  }
 0x63d PF: > { %s2067_s17 = sand.u32 1, %s3063_s13   ;;  %p3796_p10 = scmp.ge.s32.totalorder %s3075_s16, 2 }
 0x63e   : > { %s2068_s3 = scalar_lea.sflag [#allocation6], %s2067_s17 }
 0x63f   : > { %p2596_p11 = pnand %p3796_p10, %p3257_p6 }
 0x641   : > { %p2597_p13 = pneg %p2596_p11 }
 0x643   : > { %3058 = dma.done.wait (%p2597_p13), %s2068_s3, 384  }
 0x644   : > { %3060 = vsyncadd (%p2597_p13), %s2068_s3, 4294966912  ;;  %s3797_s5 = sld [smem:[#allocation26_spill]]  ;;  %p29_p0 = scmp.ge.s32.totalorder %s3229_s11, 4  }
 0x645   : > { %s3798_s15 = sld [smem:[#allocation27_spill]]  ;;  %s3799_s13 = smov %s3067_s14 }
 0x646   : > { %s3801_s16 = smov %s3229_s11  ;;  %31 = sbr.rel (!%p29_p0) target bundleno = 18 (0x12), region = 142 }
 0x64a   : > { %s3800_s14 = smov %s3797_s5 }
 0x64b   :  { %2074 = vsyncpa [#allocation5], 1 }
 0x64c   :  { %2076 = vsyncpa [#allocation5 + $0x1], 1 }
 0x64d   :  { %2077 = vsyncpa [#allocation8], 1 }
 0x64e   :  { %2079 = vsyncpa [#allocation8 + $0x1], 1 }
 0x64f   :  { %2080 = vsyncpa [#allocation11], 1 }
 0x650   :  { %2081 = vsyncpa [#allocation14], 1 }
 0x651   :  { %2082 = vsyncpa [#allocation17], 1 }
 0x652   :  { %2083 = vsyncpa [#allocation6], 1 }
 0x653   :  { %2085 = vsyncpa [#allocation6 + $0x1], 1 }

</bundles_post_ra>
